<compile_context>
chip_gen: v6e
topology: v6e:2x2x1
jax: 0.10.0
libtpu: 0.0.40
codegen_flags: <defaults>
</compile_context>

<pallas_src>
import jax
import jax.numpy as jnp
from jax import lax
from jax.experimental import pallas as pl
from jax.experimental.pallas import tpu as pltpu


# --------------------------- Kernel A: bottleneck --------------------------- #
# relu2(norm2(conv1_1x1x1(relu1(norm1(cat(x)))))) over row tiles of flattened
# voxels.  The concat is never materialized: the matmul is split over K by
# prev-feature.  norm2's scale is pre-folded into w1 (w1' = w1 * s2), so the
# epilogue is a single add + relu.  bf16 MXU operands, f32 accumulation.
def _make_bottleneck_kernel(n_feat):
    def kernel(*refs):
        xs = refs[0:n_feat]                       # each (tm, C_i) f32
        s1s = refs[n_feat:2 * n_feat]             # each (1, C_i) f32
        b1s = refs[2 * n_feat:3 * n_feat]         # each (1, C_i) f32
        w1s = refs[3 * n_feat:4 * n_feat]         # each (C_i, Cb) bf16 (s2 folded)
        b2_ref = refs[4 * n_feat]                 # (1, Cb) f32
        o_ref = refs[4 * n_feat + 1]              # (tm, Cb) bf16
        acc = None
        for x_ref, s_ref, b_ref, w_ref in zip(xs, s1s, b1s, w1s):
            h = jnp.maximum(x_ref[...] * s_ref[...] + b_ref[...], 0.0)   # relu1∘norm1
            y = jnp.dot(h.astype(jnp.bfloat16), w_ref[...],
                        preferred_element_type=jnp.float32)
            acc = y if acc is None else acc + y
        o_ref[...] = jnp.maximum(acc + b2_ref[...], 0.0).astype(o_ref.dtype)
    return kernel


# --------------------------- Kernel B: 3x3x3 conv --------------------------- #
_NBUF = 4        # ring-buffer depth: planes d-1, d, d+1 in use + one prefetch


def _make_conv3x3x3_kernel(D):
    def kernel(z_hbm, w_ref, o_ref, buf, sem):
        # z_hbm: (N, D, H, W, Cb) bf16 resident in HBM (pl.ANY)
        # w_ref: (3, 3, 3*Cb, Gpad) bf16 (kw folded into the contraction dim)
        # o_ref: (H*W, Gpad) f32 output tile for this (n, d); also accumulator
        # buf:   (_NBUF, H+2, W, Cb) bf16 ring buffer of single depth planes
        # sem:   DMA semaphores (_NBUF,)
        n = pl.program_id(0)
        d = pl.program_id(1)
        _, Hp2, W, Cb = buf.shape
        H = Hp2 - 2

        def plane_copy(p):
            # Copy unpadded plane z[n, p] into rows 1..H of ring slot (p+1)%_NBUF.
            slot = (p + 1) % _NBUF
            return pltpu.make_async_copy(
                z_hbm.at[n, p], buf.at[slot, pl.ds(1, H)], sem.at[slot])

        # ------------------------------ DMA schedule -------------------------
        @pl.when(d == 0)
        def _():
            # Zero the H-halo rows of every slot (DMAs never touch them); done
            # per batch element so it also holds under megacore N-sharding.
            for s in range(_NBUF):
                zrow = jnp.zeros((1, W, Cb), buf.dtype)
                buf[s, pl.ds(0, 1), :, :] = zrow
                buf[s, pl.ds(H + 1, 1), :, :] = zrow
            plane_copy(0).start()
            if D > 1:
                plane_copy(1).start()
            plane_copy(0).wait()
            if D > 1:
                plane_copy(1).wait()

        @pl.when(jnp.logical_and(d > 0, d + 1 < D))
        def _():
            plane_copy(d + 1).wait()              # prefetched during step d-1

        @pl.when(d + 2 < D)
        def _():
            plane_copy(d + 2).start()             # prefetch for step d+1

        # -------------------------------- compute ----------------------------
        def tap(kd):
            # Contribution of input plane p = d-1+kd (guaranteed in range by
            # the pl.when guards below).  W halo built with zero columns.
            p = d - 1 + kd
            plane = buf[(p + 1) % _NBUF]                        # (H+2, W, Cb)
            zcol = jnp.zeros((Hp2, 1, Cb), plane.dtype)
            shifted = jnp.concatenate(                           # (H+2, W, 3*Cb)
                [jnp.concatenate([zcol, plane[:, :W - 1, :]], axis=1),   # kw=0
                 plane,                                                  # kw=1
                 jnp.concatenate([plane[:, 1:, :], zcol], axis=1)],      # kw=2
                axis=-1)
            acc = None
            for kh in range(3):
                patch = shifted[kh:kh + H].reshape(H * W, 3 * Cb)
                y = jnp.dot(patch, w_ref[kd, kh],
                            preferred_element_type=jnp.float32)
                acc = y if acc is None else acc + y
            return acc

        o_ref[...] = tap(1)                        # plane d: always in range

        @pl.when(d > 0)
        def _():
            o_ref[...] += tap(0)                   # plane d-1

        @pl.when(d + 1 < D)
        def _():
            o_ref[...] += tap(2)                   # plane d+1

    return kernel


# --------------------------------- Wrapper ---------------------------------- #
def _vmem_limit_bytes():
    cap = 64 * 1024 * 1024                         # safe on all generations
    try:
        info = pltpu.get_tpu_info()
        c = int(getattr(info, "vmem_capacity_bytes", 0) or 0)
        if c > 0:
            cap = c
    except Exception:
        pass
    return min((cap * 3) // 4, 100 * 1024 * 1024)  # leave headroom for Mosaic


def _pick_row_tile(rows, target, bytes_per_row, budget=32 * 1024 * 1024):
    t = max(8, min(target, rows))
    t = (t // 8) * 8
    while t > 8 and 2 * t * bytes_per_row > budget:    # double-buffered blocks
        t //= 2
    for cand in range(t, 7, -1):                       # prefer a divisor of rows
        if rows % cand == 0 and cand % 8 == 0:
            return cand
    return t                                           # else Pallas masks the tail


def dense_layer_3d(prev_features, params, *, tm_target=1024):
    """prev_features: list of (N, D, H, W, C_i) float32 arrays (channels last)."""
    n_feat = len(prev_features)
    N, D, H, W = (int(s) for s in prev_features[0].shape[:4])
    c_list = [int(f.shape[-1]) for f in prev_features]
    C_in = sum(c_list)
    Cb = int(params["w1"].shape[1])
    G = int(params["w2"].shape[-1])
    Gpad = ((G + 127) // 128) * 128                    # lane-dense conv output

    # Fold norm2's scale into the 1x1x1 conv weight and split every per-channel
    # parameter by prev-feature so Kernel A never needs the concatenated input.
    w1p = (params["w1"] * params["s2"][None, :]).astype(jnp.bfloat16)
    offs, o = [], 0
    for c in c_list:
        offs.append(o)
        o += c
    s1_parts = [params["s1"][o:o + c].reshape(1, c) for o, c in zip(offs, c_list)]
    b1_parts = [params["b1"][o:o + c].reshape(1, c) for o, c in zip(offs, c_list)]
    w1_parts = [w1p[o:o + c] for o, c in zip(offs, c_list)]
    b2 = params["b2"].reshape(1, Cb)

    R = N * D * H * W
    tm = _pick_row_tile(R, tm_target, C_in * 4 + Cb * 2)
    x_flats = [f.reshape(R, c) for f, c in zip(prev_features, c_list)]

    vmem = _vmem_limit_bytes()

    # --- Kernel A: bottleneck output z (bf16) --------------------------------
    z_flat = pl.pallas_call(
        _make_bottleneck_kernel(n_feat),
        out_shape=jax.ShapeDtypeStruct((R, Cb), jnp.bfloat16),
        grid=(pl.cdiv(R, tm),),
        in_specs=([pl.BlockSpec((tm, c), lambda i: (i, 0)) for c in c_list]
                  + [pl.BlockSpec((1, c), lambda i: (0, 0)) for c in c_list]
                  + [pl.BlockSpec((1, c), lambda i: (0, 0)) for c in c_list]
                  + [pl.BlockSpec((c, Cb), lambda i: (0, 0)) for c in c_list]
                  + [pl.BlockSpec((1, Cb), lambda i: (0, 0))]),
        out_specs=pl.BlockSpec((tm, Cb), lambda i: (i, 0)),
        compiler_params=pltpu.CompilerParams(
            dimension_semantics=("parallel",), vmem_limit_bytes=vmem),
    )(*x_flats, *s1_parts, *b1_parts, *w1_parts, b2)

    z = z_flat.reshape(N, D, H, W, Cb)                 # stays unpadded in HBM

    # --- Kernel B: 3x3x3 conv, padding=1, no bias -----------------------------
    w2p = jnp.pad(params["w2"], ((0, 0),) * 4 + ((0, Gpad - G),))
    w2r = w2p.reshape(3, 3, 3 * Cb, Gpad).astype(jnp.bfloat16)   # fold kw into K

    out_full = pl.pallas_call(
        _make_conv3x3x3_kernel(D),
        out_shape=jax.ShapeDtypeStruct((N, D, H * W, Gpad), jnp.float32),
        grid=(N, D),
        in_specs=[pl.BlockSpec(memory_space=pl.ANY),             # z stays in HBM
                  pl.BlockSpec((3, 3, 3 * Cb, Gpad), lambda n, d: (0, 0, 0, 0))],
        out_specs=pl.BlockSpec((None, None, H * W, Gpad),
                               lambda n, d: (n, d, 0, 0)),
        scratch_shapes=[
            pltpu.VMEM((_NBUF, H + 2, W, Cb), jnp.bfloat16),     # plane ring buffer
            pltpu.SemaphoreType.DMA((_NBUF,)),
        ],
        compiler_params=pltpu.CompilerParams(
            dimension_semantics=("parallel", "arbitrary"), vmem_limit_bytes=vmem),
    )(z, w2r)

    # TODO(synk): F.dropout(p=drop_rate, training=True) not applied (eval /
    # drop_rate=0), and the Gpad->G slice could be folded into the store.
    return out_full[..., :G].reshape(N, D, H, W, G)


# ------------------------------ Param creation ------------------------------ #
def make_params(key, num_input_features, growth_rate, bn_size, eps=1e-5):
    Cb = bn_size * growth_rate
    ks = jax.random.split(key, 10)
    # BatchNorm1 (eval-mode, folded): scale = gamma/sqrt(var+eps), bias = beta - mean*scale
    g1 = jax.random.uniform(ks[0], (num_input_features,), jnp.float32, 0.5, 1.5)
    be1 = jax.random.normal(ks[1], (num_input_features,), jnp.float32) * 0.1
    m1 = jax.random.normal(ks[2], (num_input_features,), jnp.float32) * 0.1
    v1 = jax.random.uniform(ks[3], (num_input_features,), jnp.float32, 0.5, 1.5)
    s1 = g1 / jnp.sqrt(v1 + eps)
    b1 = be1 - m1 * s1
    # conv1: PyTorch weight (Cb, C_in, 1,1,1) -> (C_in, Cb)
    bound1 = 1.0 / jnp.sqrt(float(num_input_features))
    w1 = jax.random.uniform(ks[4], (num_input_features, Cb), jnp.float32, -bound1, bound1)
    # BatchNorm2
    g2 = jax.random.uniform(ks[5], (Cb,), jnp.float32, 0.5, 1.5)
    be2 = jax.random.normal(ks[6], (Cb,), jnp.float32) * 0.1
    m2 = jax.random.normal(ks[7], (Cb,), jnp.float32) * 0.1
    v2 = jax.random.uniform(ks[8], (Cb,), jnp.float32, 0.5, 1.5)
    s2 = g2 / jnp.sqrt(v2 + eps)
    b2 = be2 - m2 * s2
    # conv2: PyTorch weight (G, Cb, 3,3,3) -> (3,3,3,Cb,G) (DHWIO)
    bound2 = 1.0 / jnp.sqrt(float(Cb * 27))
    w2 = jax.random.uniform(ks[9], (3, 3, 3, Cb, growth_rate), jnp.float32,
                            -bound2, bound2)
    return dict(s1=s1, b1=b1, w1=w1, s2=s2, b2=b2, w2=w2)


# ----------------------------- Pure-JAX reference ---------------------------- #
def reference(prev_features, params):
    # Mirrors the kernels' bf16-operand / f32-accumulate precision choices so
    # the check is tight; structure matches the PyTorch module exactly.
    x = jnp.concatenate(prev_features, axis=-1)
    h = jnp.maximum(x * params["s1"] + params["b1"], 0.0)
    w1p = (params["w1"] * params["s2"][None, :]).astype(jnp.bfloat16)
    y = jnp.einsum("ndhwc,co->ndhwo", h.astype(jnp.bfloat16), w1p,
                   preferred_element_type=jnp.float32)
    z = jnp.maximum(y + params["b2"], 0.0).astype(jnp.bfloat16)
    return lax.conv_general_dilated(
        z, params["w2"].astype(jnp.bfloat16),
        window_strides=(1, 1, 1), padding=((1, 1), (1, 1), (1, 1)),
        dimension_numbers=("NDHWC", "DHWIO", "NDHWC"),
        preferred_element_type=jnp.float32)


if __name__ == "__main__":
    # Small config: two prev features of 8 channels each -> num_input_features=16,
    # growth_rate=8, bn_size=4 (Cb=32), drop_rate=0, spatial D=H=W=8, batch N=2.
    N, D, H, W = 2, 8, 8, 8
    c_prev = (8, 8)
    growth_rate, bn_size = 8, 4
    num_input_features = sum(c_prev)

    key = jax.random.PRNGKey(0)
    kx0, kx1, kp = jax.random.split(key, 3)
    prev_features = [
        jax.random.normal(kx0, (N, D, H, W, c_prev[0]), jnp.float32),
        jax.random.normal(kx1, (N, D, H, W, c_prev[1]), jnp.float32),
    ]
    params = make_params(kp, num_input_features, growth_rate, bn_size)

    out = jax.block_until_ready(dense_layer_3d(prev_features, params))
    ref = jax.block_until_ready(reference(prev_features, params))
    assert out.shape == (N, D, H, W, growth_rate), out.shape
    max_err = float(jnp.max(jnp.abs(out - ref)))
    assert jnp.allclose(out, ref, rtol=1e-2, atol=1e-2), max_err

    print("KERNEL_OK")
</pallas_src>

<mosaic_0001>
module attributes {stable_mosaic.version = 11 : i64} {
  func.func @kernel(%arg0: i32, %arg1: memref<1024x8xf32, #tpu.memory_space<vmem>>, %arg2: memref<1024x8xf32, #tpu.memory_space<vmem>>, %arg3: memref<1x8xf32, #tpu.memory_space<vmem>>, %arg4: memref<1x8xf32, #tpu.memory_space<vmem>>, %arg5: memref<1x8xf32, #tpu.memory_space<vmem>>, %arg6: memref<1x8xf32, #tpu.memory_space<vmem>>, %arg7: memref<8x32xbf16, #tpu.memory_space<vmem>>, %arg8: memref<8x32xbf16, #tpu.memory_space<vmem>>, %arg9: memref<1x32xf32, #tpu.memory_space<vmem>>, %arg10: memref<1024x32xbf16, #tpu.memory_space<vmem>>) attributes {dimension_semantics = [#tpu.dimension_semantics<parallel>], iteration_bounds = array<i64: 1>, scalar_prefetch = 0 : i64, scratch_operands = 0 : i64, tpu.core_type = #tpu.core_type<tc>, window_params = [{transform_indices = @transform_0, window_bounds = array<i64: 1024, 8>}, {transform_indices = @transform_1, window_bounds = array<i64: 1024, 8>}, {pipeline_mode = #tpu.pipeline_mode<synchronous>, transform_indices = @transform_2, window_bounds = array<i64: 1, 8>}, {pipeline_mode = #tpu.pipeline_mode<synchronous>, transform_indices = @transform_3, window_bounds = array<i64: 1, 8>}, {pipeline_mode = #tpu.pipeline_mode<synchronous>, transform_indices = @transform_4, window_bounds = array<i64: 1, 8>}, {pipeline_mode = #tpu.pipeline_mode<synchronous>, transform_indices = @transform_5, window_bounds = array<i64: 1, 8>}, {pipeline_mode = #tpu.pipeline_mode<synchronous>, transform_indices = @transform_6, window_bounds = array<i64: 8, 32>}, {pipeline_mode = #tpu.pipeline_mode<synchronous>, transform_indices = @transform_7, window_bounds = array<i64: 8, 32>}, {pipeline_mode = #tpu.pipeline_mode<synchronous>, transform_indices = @transform_8, window_bounds = array<i64: 1, 32>}, {transform_indices = @transform_9, window_bounds = array<i64: 1024, 32>}]} {
    %c0 = arith.constant 0 : index
    %c0_0 = arith.constant 0 : index
    %0 = vector.load %arg1[%c0, %c0_0] : memref<1024x8xf32, #tpu.memory_space<vmem>>, vector<1024x8xf32>
    %c0_1 = arith.constant 0 : index
    %c0_2 = arith.constant 0 : index
    %1 = vector.load %arg3[%c0_1, %c0_2] : memref<1x8xf32, #tpu.memory_space<vmem>>, vector<1x8xf32>
    %2 = vector.broadcast %1 : vector<1x8xf32> to vector<1024x8xf32>
    %3 = arith.mulf %0, %2 : vector<1024x8xf32>
    %c0_3 = arith.constant 0 : index
    %c0_4 = arith.constant 0 : index
    %4 = vector.load %arg5[%c0_3, %c0_4] : memref<1x8xf32, #tpu.memory_space<vmem>>, vector<1x8xf32>
    %5 = vector.broadcast %4 : vector<1x8xf32> to vector<1024x8xf32>
    %6 = arith.addf %3, %5 : vector<1024x8xf32>
    %cst = arith.constant 0.000000e+00 : f32
    %7 = vector.broadcast %cst : f32 to vector<1024x8xf32>
    %8 = arith.maximumf %6, %7 : vector<1024x8xf32>
    %9 = arith.truncf %8 : vector<1024x8xf32> to vector<1024x8xbf16>
    %c0_5 = arith.constant 0 : index
    %c0_6 = arith.constant 0 : index
    %10 = vector.load %arg7[%c0_5, %c0_6] : memref<8x32xbf16, #tpu.memory_space<vmem>>, vector<8x32xbf16>
    %cst_7 = arith.constant dense<0.000000e+00> : vector<1024x32xf32>
    %11 = tpu.matmul %9, %10, %cst_7 {dimension_numbers = #tpu.dot_dimension_numbers<[1], [0], [0], [1], [0, 0, 1, 1], [], []>} : vector<1024x8xbf16>, vector<8x32xbf16>, vector<1024x32xf32> -> vector<1024x32xf32>
    %c0_8 = arith.constant 0 : index
    %c0_9 = arith.constant 0 : index
    %12 = vector.load %arg2[%c0_8, %c0_9] : memref<1024x8xf32, #tpu.memory_space<vmem>>, vector<1024x8xf32>
    %c0_10 = arith.constant 0 : index
    %c0_11 = arith.constant 0 : index
    %13 = vector.load %arg4[%c0_10, %c0_11] : memref<1x8xf32, #tpu.memory_space<vmem>>, vector<1x8xf32>
    %14 = vector.broadcast %13 : vector<1x8xf32> to vector<1024x8xf32>
    %15 = arith.mulf %12, %14 : vector<1024x8xf32>
    %c0_12 = arith.constant 0 : index
    %c0_13 = arith.constant 0 : index
    %16 = vector.load %arg6[%c0_12, %c0_13] : memref<1x8xf32, #tpu.memory_space<vmem>>, vector<1x8xf32>
    %17 = vector.broadcast %16 : vector<1x8xf32> to vector<1024x8xf32>
    %18 = arith.addf %15, %17 : vector<1024x8xf32>
    %cst_14 = arith.constant 0.000000e+00 : f32
    %19 = vector.broadcast %cst_14 : f32 to vector<1024x8xf32>
    %20 = arith.maximumf %18, %19 : vector<1024x8xf32>
    %21 = arith.truncf %20 : vector<1024x8xf32> to vector<1024x8xbf16>
    %c0_15 = arith.constant 0 : index
    %c0_16 = arith.constant 0 : index
    %22 = vector.load %arg8[%c0_15, %c0_16] : memref<8x32xbf16, #tpu.memory_space<vmem>>, vector<8x32xbf16>
    %cst_17 = arith.constant dense<0.000000e+00> : vector<1024x32xf32>
    %23 = tpu.matmul %21, %22, %cst_17 {dimension_numbers = #tpu.dot_dimension_numbers<[1], [0], [0], [1], [0, 0, 1, 1], [], []>} : vector<1024x8xbf16>, vector<8x32xbf16>, vector<1024x32xf32> -> vector<1024x32xf32>
    %24 = arith.addf %11, %23 : vector<1024x32xf32>
    %c0_18 = arith.constant 0 : index
    %c0_19 = arith.constant 0 : index
    %25 = vector.load %arg9[%c0_18, %c0_19] : memref<1x32xf32, #tpu.memory_space<vmem>>, vector<1x32xf32>
    %26 = vector.broadcast %25 : vector<1x32xf32> to vector<1024x32xf32>
    %27 = arith.addf %24, %26 : vector<1024x32xf32>
    %cst_20 = arith.constant 0.000000e+00 : f32
    %28 = vector.broadcast %cst_20 : f32 to vector<1024x32xf32>
    %29 = arith.maximumf %27, %28 : vector<1024x32xf32>
    %30 = arith.truncf %29 : vector<1024x32xf32> to vector<1024x32xbf16>
    %c0_21 = arith.constant 0 : index
    %c0_22 = arith.constant 0 : index
    %31 = vector.load %arg10[%c0_21, %c0_22] : memref<1024x32xbf16, #tpu.memory_space<vmem>>, vector<1024x32xbf16>
    tpu.vector_store %arg10[%c0_21, %c0_22], %30 {strides = array<i32>} : memref<1024x32xbf16, #tpu.memory_space<vmem>>, vector<1024x32xbf16>,
    return
  }
  func.func @transform_0(%arg0: i32) -> (i32, i32) {
    %c0_i32 = arith.constant 0 : i32
    %c0_i32_0 = arith.constant 0 : i32
    return %arg0, %c0_i32 : i32, i32
  }
  func.func @transform_1(%arg0: i32) -> (i32, i32) {
    %c0_i32 = arith.constant 0 : i32
    %c0_i32_0 = arith.constant 0 : i32
    return %arg0, %c0_i32 : i32, i32
  }
  func.func @transform_2(%arg0: i32) -> (i32, i32) {
    %c0_i32 = arith.constant 0 : i32
    %c0_i32_0 = arith.constant 0 : i32
    %c0_i32_1 = arith.constant 0 : i32
    return %c0_i32, %c0_i32_0 : i32, i32
  }
  func.func @transform_3(%arg0: i32) -> (i32, i32) {
    %c0_i32 = arith.constant 0 : i32
    %c0_i32_0 = arith.constant 0 : i32
    %c0_i32_1 = arith.constant 0 : i32
    return %c0_i32, %c0_i32_0 : i32, i32
  }
  func.func @transform_4(%arg0: i32) -> (i32, i32) {
    %c0_i32 = arith.constant 0 : i32
    %c0_i32_0 = arith.constant 0 : i32
    %c0_i32_1 = arith.constant 0 : i32
    return %c0_i32, %c0_i32_0 : i32, i32
  }
  func.func @transform_5(%arg0: i32) -> (i32, i32) {
    %c0_i32 = arith.constant 0 : i32
    %c0_i32_0 = arith.constant 0 : i32
    %c0_i32_1 = arith.constant 0 : i32
    return %c0_i32, %c0_i32_0 : i32, i32
  }
  func.func @transform_6(%arg0: i32) -> (i32, i32) {
    %c0_i32 = arith.constant 0 : i32
    %c0_i32_0 = arith.constant 0 : i32
    %c0_i32_1 = arith.constant 0 : i32
    return %c0_i32, %c0_i32_0 : i32, i32
  }
  func.func @transform_7(%arg0: i32) -> (i32, i32) {
    %c0_i32 = arith.constant 0 : i32
    %c0_i32_0 = arith.constant 0 : i32
    %c0_i32_1 = arith.constant 0 : i32
    return %c0_i32, %c0_i32_0 : i32, i32
  }
  func.func @transform_8(%arg0: i32) -> (i32, i32) {
    %c0_i32 = arith.constant 0 : i32
    %c0_i32_0 = arith.constant 0 : i32
    %c0_i32_1 = arith.constant 0 : i32
    return %c0_i32, %c0_i32_0 : i32, i32
  }
  func.func @transform_9(%arg0: i32) -> (i32, i32) {
    %c0_i32 = arith.constant 0 : i32
    %c0_i32_0 = arith.constant 0 : i32
    return %arg0, %c0_i32 : i32, i32
  }
}

</mosaic_0001>

<bundles_post_ra>
// kernel: tpu_custom_call.1
= control target key start
LH: loop header
LB: loop body
LE: loop exit
PB: predicated region body
PF: predicated region fallthrough
CT: control target
= control target key end

     0   :  { %vm1408_vm0 = vcmask 1043456   ;;  %vm1215_vm1 = vcmask 64512   ;;  %vm3472_vm2 = vcmask 257024   ;;  %s6747_s7 = inlined_call_operand.vmem [shape: bf16[8,32], index: 7, kind: input, shape index: {}]   ;;  %s6748_s6 = inlined_call_operand.vmem [shape: bf16[8,32], index: 6, kind: input, shape index: {}]   ;;  %s6749_s1 = inlined_call_operand.vmem [shape: f32[1024,8], index: 1, kind: input, shape index: {}]   ;;  %s6750_s3 = inlined_call_operand.vmem [shape: f32[1,8], index: 3, kind: input, shape index: {}]   ;;  %s6751_s5 = inlined_call_operand.vmem [shape: f32[1,8], index: 5, kind: input, shape index: {}]   ;;  %s6752_s0 = inlined_call_operand.vmem [shape: f32[1024,8], index: 0, kind: input, shape index: {}]   ;;  %s6753_s2 = inlined_call_operand.vmem [shape: f32[1,8], index: 2, kind: input, shape index: {}]   ;;  %s6754_s4 = inlined_call_operand.vmem [shape: f32[1,8], index: 4, kind: input, shape index: {}]   ;;  %s6755_s8 = inlined_call_operand.vmem [shape: f32[1,32], index: 8, kind: input, shape index: {}]   ;;  %s6756_s9 = inlined_call_operand.vmem [shape: bf16[1024,32], index: 9, kind: output, shape index: {}]  }
   0x1   :  { %v1214_v0 = vld [vmem:[%s6747_s7] sm:$0xf]  ;;  %v625_v5 = vld [vmem:[%s6749_s1 + $0x8] sm:$0xff]  ;;  %v626_v16 = vld [vmem:[%s6749_s1 + $0x10] sm:$0xff] }
   0x2   :  { %v623_v1 = vld [vmem:[%s6748_s6] sm:$0xf]  ;;  %4384 = vmatprep.subr.msk.bf16.mxu0 %vm1408_vm0, %v1214_v0  ;;  %v1410_v3 = vsel %vm1408_vm0, %v1214_v0, 0  ;;  %v34_v11 = vld [vmem:[%s6752_s0 + $0x8] sm:$0xff]  ;;  %v627_v17 = vld [vmem:[%s6749_s1 + $0x18] sm:$0xff] }
   0x3   :  { %v624_v2 = vld [vmem:[%s6749_s1] sm:$0xff]  ;;  %4385 = vmatprep.subr.msk.bf16.mxu1 %vm1408_vm0, %v623_v1  ;;  %v2150_v4 = vsel %vm1408_vm0, %v623_v1, 0  ;;  %4125 = vmatpush3.bf16.msra.mxu0 %v1410_v3  ;;  %v35_v22 = vld [vmem:[%s6752_s0 + $0x10] sm:$0xff]  ;;  %v36_v23 = vld [vmem:[%s6752_s0 + $0x18] sm:$0xff] }
   0x4   :  { %v4461_v6 = vld [vmem:[%s6750_s3] ss:$0 sm:$0xff]  ;;  %4255 = vmatpush3.bf16.msra.mxu1 %v2150_v4  ;;  %v629_v33 = vld [vmem:[%s6749_s1 + $0x28] sm:$0xff]  ;;  %v630_v44 = vld [vmem:[%s6749_s1 + $0x30] sm:$0xff] }
   0x5   :  { %v33_v7 = vld [vmem:[%s6752_s0] sm:$0xff]  ;;  %v759_v8 = vmul.f32 %v4461_v6, %v624_v2  ;;  %v760_v9 = vmul.f32 %v4461_v6, %v625_v5  ;;  %v761_v20 = vmul.f32 %v4461_v6, %v626_v16  ;;  %v762_v21 = vmul.f32 %v4461_v6, %v627_v17  ;;  %v38_v39 = vld [vmem:[%s6752_s0 + $0x28] sm:$0xff]  ;;  %v631_v45 = vld [vmem:[%s6749_s1 + $0x38] sm:$0xff] }
   0x6   :  { %v4471_v10 = vld [vmem:[%s6751_s5] ss:$0 sm:$0xff]  ;;  %v764_v49 = vmul.f32 %v4461_v6, %v629_v33  ;;  %v39_v50 = vld [vmem:[%s6752_s0 + $0x30] sm:$0xff]  ;;  %v40_v55 = vld [vmem:[%s6752_s0 + $0x38] sm:$0xff]  ;;  %v765_v58 = vmul.f32 %v4461_v6, %v630_v44  ;;  %v766_v59 = vmul.f32 %v4461_v6, %v631_v45 }
   0x7   :  { %v4479_v12 = vld [vmem:[%s6753_s2] ss:$0 sm:$0xff]  ;;  %v894_v18 = vadd.f32 %v4471_v10, %v759_v8  ;;  %v895_v19 = vadd.f32 %v4471_v10, %v760_v9  ;;  %v896_v31 = vadd.f32 %v4471_v10, %v761_v20  ;;  %v897_v32 = vadd.f32 %v4471_v10, %v762_v21  ;;  %v633_v5 = vld [vmem:[%s6749_s1 + $0x48] sm:$0xff]  ;;  %v634_v20 = vld [vmem:[%s6749_s1 + $0x50] sm:$0xff] }
   0x8   :  { %v168_v13 = vmul.f32 %v4479_v12, %v33_v7  ;;  %v169_v14 = vmul.f32 %v4479_v12, %v34_v11  ;;  %v4486_v15 = vld [vmem:[%s6754_s4] ss:$0 sm:$0xff]  ;;  %v170_v26 = vmul.f32 %v4479_v12, %v35_v22  ;;  %v171_v27 = vmul.f32 %v4479_v12, %v36_v23  ;;  %v635_v21 = vld [vmem:[%s6749_s1 + $0x58] sm:$0xff]  ;;  %v637_v45 = vld [vmem:[%s6749_s1 + $0x68] sm:$0xff] }
   0x9   :  { %v628_v28 = vld [vmem:[%s6749_s1 + $0x20] sm:$0xff]  ;;  %v1022_v29 = vmax.f32 %v894_v18, 0.0  ;;  %v1023_v30 = vmax.f32 %v895_v19, 0.0  ;;  %v1024_v41 = vmax.f32 %v896_v31, 0.0  ;;  %v1025_v42 = vmax.f32 %v897_v32, 0.0  ;;  %v44_v31 = vld [vmem:[%s6752_s0 + $0x58] sm:$0xff] }
   0xa   :  { %v303_v24 = vadd.f32 %v4486_v15, %v168_v13  ;;  %v304_v25 = vadd.f32 %v4486_v15, %v169_v14  ;;  %v305_v36 = vadd.f32 %v4486_v15, %v170_v26  ;;  %v306_v37 = vadd.f32 %v4486_v15, %v171_v27  ;;  %v37_v38 = vld [vmem:[%s6752_s0 + $0x20] sm:$0xff]  ;;  %v42_v14 = vld [vmem:[%s6752_s0 + $0x48] sm:$0xff]  ;;  %v43_v26 = vld [vmem:[%s6752_s0 + $0x50] sm:$0xff] }
   0xb   :  { %v1150_v40 = vpack.c.bf16 %v1023_v30, %v1022_v29  ;;  %v763_v43 = vmul.f32 %v4461_v6, %v628_v28  ;;  %v1151_v51 = vpack.c.bf16 %v1025_v42, %v1024_v41  ;;  %v172_v53 = vmul.f32 %v4479_v12, %v37_v38  ;;  %v632_v60 = vld [vmem:[%s6749_s1 + $0x40] sm:$0xff] }
   0xc   :  { %v431_v34 = vmax.f32 %v303_v24, 0.0  ;;  %v432_v35 = vmax.f32 %v304_v25, 0.0  ;;  %v433_v47 = vmax.f32 %v305_v36, 0.0  ;;  %v434_v48 = vmax.f32 %v306_v37, 0.0  ;;  %v41_v13 = vld [vmem:[%s6752_s0 + $0x40] sm:$0xff] }
   0xd   :  { %4126 = vmatprep.mubr.msk.bf16.mxu0 %vm1215_vm1, %v1150_v40  ;;  %v898_v52 = vadd.f32 %v4471_v10, %v763_v43  ;;  %v173_v54 = vmul.f32 %v4479_v12, %v38_v39  ;;  %v899_v57 = vadd.f32 %v4471_v10, %v764_v49  ;;  %v307_v62 = vadd.f32 %v4486_v15, %v172_v53  ;;  %v636_v36 = vld [vmem:[%s6749_s1 + $0x60] sm:$0xff] }
   0xe   :  { %v559_v46 = vpack.c.bf16 %v432_v35, %v431_v34  ;;  %v560_v56 = vpack.c.bf16 %v434_v48, %v433_v47  ;;  %4127 = vmatmul.mubr.msk.bf16.vlgmr.msra.gmra.mxu0 %vm1215_vm1, %v1151_v51  ;;  %v174_v0 = vmul.f32 %v4479_v12, %v39_v50  ;;  %v900_v2 = vadd.f32 %v4471_v10, %v765_v58  ;;  %v45_v50 = vld [vmem:[%s6752_s0 + $0x60] sm:$0xff]  ;;  %v46_v51 = vld [vmem:[%s6752_s0 + $0x68] sm:$0xff] }
   0xf   :  { %v1026_v61 = vmax.f32 %v898_v52, 0.0  ;;  %v308_v63 = vadd.f32 %v4486_v15, %v173_v54  ;;  %v1027_v1 = vmax.f32 %v899_v57, 0.0  ;;  %v901_v3 = vadd.f32 %v4471_v10, %v766_v59  ;;  %v639_v57 = vld [vmem:[%s6749_s1 + $0x78] sm:$0xff] }
  0x10   :  { %4256 = vmatprep.mubr.msk.bf16.mxu1 %vm1215_vm1, %v559_v46  ;;  %v175_v4 = vmul.f32 %v4479_v12, %v40_v55  ;;  %v435_v7 = vmax.f32 %v307_v62, 0.0  ;;  %v309_v9 = vadd.f32 %v4486_v15, %v174_v0  ;;  %v767_v11 = vmul.f32 %v4461_v6, %v632_v60  ;;  %v47_v62 = vld [vmem:[%s6752_s0 + $0x70] sm:$0xff] }
  0x11   :  { %4257 = vmatmul.mubr.msk.bf16.vlgmr.msra.gmra.mxu1 %vm1215_vm1, %v560_v56  ;;  %v436_v8 = vmax.f32 %v308_v63, 0.0  ;;  %v1152_v16 = vpack.c.bf16 %v1027_v1, %v1026_v61  ;;  %v1028_v17 = vmax.f32 %v900_v2, 0.0  ;;  %v1029_v18 = vmax.f32 %v901_v3, 0.0  ;;  %v638_v56 = vld [vmem:[%s6749_s1 + $0x70] sm:$0xff]  ;;  %v48_v3 = vld [vmem:[%s6752_s0 + $0x78] sm:$0xff] }
  0x12   :  { %v310_v19 = vadd.f32 %v4486_v15, %v175_v4  ;;  %v437_v23 = vmax.f32 %v309_v9, 0.0  ;;  %v768_v24 = vmul.f32 %v4461_v6, %v633_v5  ;;  %v902_v25 = vadd.f32 %v4471_v10, %v767_v11  ;;  %v640_v9 = vld [vmem:[%s6749_s1 + $0x80] sm:$0xff] }
  0x13   :  { %v561_v22 = vpack.c.bf16 %v436_v8, %v435_v7  ;;  %4130 = vmatprep.mubr.msk.bf16.mxu0 %vm1215_vm1, %v1152_v16  ;;  %v1153_v27 = vpack.c.bf16 %v1029_v18, %v1028_v17  ;;  %v176_v29 = vmul.f32 %v4479_v12, %v41_v13  ;;  %v177_v30 = vmul.f32 %v4479_v12, %v42_v14 }
  0x14   :  { %v438_v28 = vmax.f32 %v310_v19, 0.0  ;;  %v903_v32 = vadd.f32 %v4471_v10, %v768_v24  ;;  %v1030_v33 = vmax.f32 %v902_v25, 0.0  ;;  %v769_v34 = vmul.f32 %v4461_v6, %v634_v20 }
  0x15   :  { %4260 = vmatprep.mubr.msk.bf16.mxu1 %vm1215_vm1, %v561_v22  ;;  %v770_v35 = vmul.f32 %v4461_v6, %v635_v21  ;;  %v311_v38 = vadd.f32 %v4486_v15, %v176_v29  ;;  %v312_v39 = vadd.f32 %v4486_v15, %v177_v30  ;;  %v178_v40 = vmul.f32 %v4479_v12, %v43_v26  ;;  %v641_v21 = vld [vmem:[%s6749_s1 + $0x88] sm:$0xff]  ;;  %v49_v26 = vld [vmem:[%s6752_s0 + $0x80] sm:$0xff] }
  0x16   :  { %v562_v37 = vpack.c.bf16 %v438_v28, %v437_v23  ;;  %4131 = vmatmul.mubr.msk.bf16.gmra.mxu0 %vm1215_vm1, %v1153_v27  ;;  %v1031_v41 = vmax.f32 %v903_v32, 0.0  ;;  %v904_v42 = vadd.f32 %v4471_v10, %v769_v34  ;;  %v179_v44 = vmul.f32 %v4479_v12, %v44_v31  ;;  %v50_v27 = vld [vmem:[%s6752_s0 + $0x88] sm:$0xff]  ;;  %v642_v32 = vld [vmem:[%s6749_s1 + $0x90] sm:$0xff] }
  0x17   :  { %v905_v43 = vadd.f32 %v4471_v10, %v770_v35  ;;  %v439_v46 = vmax.f32 %v311_v38, 0.0  ;;  %v440_v47 = vmax.f32 %v312_v39, 0.0  ;;  %v313_v48 = vadd.f32 %v4486_v15, %v178_v40  ;;  %v51_v38 = vld [vmem:[%s6752_s0 + $0x90] sm:$0xff] }
  0x18   :  { %v771_v49 = vmul.f32 %v4461_v6, %v636_v36  ;;  %v1154_v52 = vpack.c.bf16 %v1031_v41, %v1030_v33  ;;  %v1032_v53 = vmax.f32 %v904_v42, 0.0  ;;  %v314_v55 = vadd.f32 %v4486_v15, %v179_v44  ;;  %v643_v33 = vld [vmem:[%s6749_s1 + $0x98] sm:$0xff] }
  0x19   :  { %4261 = vmatmul.mubr.msk.bf16.gmra.mxu1 %vm1215_vm1, %v562_v37  ;;  %v1033_v54 = vmax.f32 %v905_v43, 0.0  ;;  %v563_v58 = vpack.c.bf16 %v440_v47, %v439_v46  ;;  %v441_v59 = vmax.f32 %v313_v48, 0.0  ;;  %v772_v60 = vmul.f32 %v4461_v6, %v637_v45  ;;  %v52_v43 = vld [vmem:[%s6752_s0 + $0x98] sm:$0xff]  ;;  %v644_v48 = vld [vmem:[%s6749_s1 + $0xa0] sm:$0xff] }
  0x1a   :  { %v906_v61 = vadd.f32 %v4471_v10, %v771_v49  ;;  %4134 = vmatprep.mubr.msk.bf16.mxu0 %vm1215_vm1, %v1154_v52  ;;  %v442_v0 = vmax.f32 %v314_v55, 0.0  ;;  %v180_v1 = vmul.f32 %v4479_v12, %v45_v50  ;;  %v181_v2 = vmul.f32 %v4479_v12, %v46_v51 }
  0x1b   :  { %v1155_v63 = vpack.c.bf16 %v1033_v54, %v1032_v53  ;;  %4264 = vmatprep.mubr.msk.bf16.mxu1 %vm1215_vm1, %v563_v58  ;;  %v907_v4 = vadd.f32 %v4471_v10, %v772_v60  ;;  %v773_v7 = vmul.f32 %v4461_v6, %v638_v56  ;;  %v774_v8 = vmul.f32 %v4461_v6, %v639_v57  ;;  %v645_v57 = vld [vmem:[%s6749_s1 + $0xa8] sm:$0xff] }
  0x1c   :  { %v1034_v5 = vmax.f32 %v906_v61, 0.0  ;;  %v564_v11 = vpack.c.bf16 %v442_v0, %v441_v59  ;;  %v315_v13 = vadd.f32 %v4486_v15, %v180_v1  ;;  %v316_v14 = vadd.f32 %v4486_v15, %v181_v2 }
  0x1d   :  { %v182_v16 = vmul.f32 %v4479_v12, %v47_v62  ;;  %v1035_v17 = vmax.f32 %v907_v4, 0.0  ;;  %v908_v18 = vadd.f32 %v4471_v10, %v773_v7  ;;  %v909_v19 = vadd.f32 %v4471_v10, %v774_v8  ;;  %v53_v62 = vld [vmem:[%s6752_s0 + $0xa0] sm:$0xff]  ;;  %v646_v4 = vld [vmem:[%s6749_s1 + $0xb0] sm:$0xff] }
  0x1e   :  { %v183_v20 = vmul.f32 %v4479_v12, %v48_v3  ;;  %4135 = vmatmul.mubr.msk.bf16.gmra.mxu0 %vm1215_vm1, %v1155_v63  ;;  %v443_v22 = vmax.f32 %v315_v13, 0.0  ;;  %v444_v23 = vmax.f32 %v316_v14, 0.0  ;;  %v775_v25 = vmul.f32 %v4461_v6, %v640_v9  ;;  %v54_v63 = vld [vmem:[%s6752_s0 + $0xa8] sm:$0xff]  ;;  %v55_v13 = vld [vmem:[%s6752_s0 + $0xb0] sm:$0xff] }
  0x1f   :  { %v317_v24 = vadd.f32 %v4486_v15, %v182_v16  ;;  %v1156_v28 = vpack.c.bf16 %v1035_v17, %v1034_v5  ;;  %v1036_v29 = vmax.f32 %v908_v18, 0.0  ;;  %v1037_v30 = vmax.f32 %v909_v19, 0.0  ;;  %v647_v5 = vld [vmem:[%s6749_s1 + $0xb8] sm:$0xff] }
  0x20   :  { %v318_v31 = vadd.f32 %v4486_v15, %v183_v20  ;;  %v565_v34 = vpack.c.bf16 %v444_v23, %v443_v22  ;;  %v776_v36 = vmul.f32 %v4461_v6, %v641_v21  ;;  %v910_v37 = vadd.f32 %v4471_v10, %v775_v25  ;;  %v56_v19 = vld [vmem:[%s6752_s0 + $0xb8] sm:$0xff] }
  0x21   :  { %4265 = vmatmul.mubr.msk.bf16.gmra.mxu1 %vm1215_vm1, %v564_v11  ;;  %v445_v35 = vmax.f32 %v317_v24, 0.0  ;;  %4138 = vmatprep.mubr.msk.bf16.mxu0 %vm1215_vm1, %v1156_v28  ;;  %v1157_v39 = vpack.c.bf16 %v1037_v30, %v1036_v29  ;;  %v184_v41 = vmul.f32 %v4479_v12, %v49_v26  ;;  %v185_v42 = vmul.f32 %v4479_v12, %v50_v27  ;;  %v648_v24 = vld [vmem:[%s6749_s1 + $0xc0] sm:$0xff] }
  0x22   :  { %v446_v40 = vmax.f32 %v318_v31, 0.0  ;;  %4268 = vmatprep.mubr.msk.bf16.mxu1 %vm1215_vm1, %v565_v34  ;;  %v911_v44 = vadd.f32 %v4471_v10, %v776_v36  ;;  %v1038_v45 = vmax.f32 %v910_v37, 0.0  ;;  %v777_v46 = vmul.f32 %v4461_v6, %v642_v32 }
  0x23   :  { %v778_v47 = vmul.f32 %v4461_v6, %v643_v33  ;;  %v319_v50 = vadd.f32 %v4486_v15, %v184_v41  ;;  %v320_v51 = vadd.f32 %v4486_v15, %v185_v42  ;;  %v186_v52 = vmul.f32 %v4479_v12, %v51_v38  ;;  %v649_v33 = vld [vmem:[%s6749_s1 + $0xc8] sm:$0xff]  ;;  %v57_v38 = vld [vmem:[%s6752_s0 + $0xc0] sm:$0xff] }
  0x24   :  { %v566_v49 = vpack.c.bf16 %v446_v40, %v445_v35  ;;  %v1039_v53 = vmax.f32 %v911_v44, 0.0  ;;  %v912_v54 = vadd.f32 %v4471_v10, %v777_v46  ;;  %v187_v56 = vmul.f32 %v4479_v12, %v52_v43  ;;  %v650_v44 = vld [vmem:[%s6749_s1 + $0xd0] sm:$0xff] }
  0x25   :  { %v913_v55 = vadd.f32 %v4471_v10, %v778_v47  ;;  %v447_v58 = vmax.f32 %v319_v50, 0.0  ;;  %v448_v59 = vmax.f32 %v320_v51, 0.0  ;;  %v321_v60 = vadd.f32 %v4486_v15, %v186_v52  ;;  %v59_v50 = vld [vmem:[%s6752_s0 + $0xd0] sm:$0xff] }
  0x26   :  { %v779_v61 = vmul.f32 %v4461_v6, %v644_v48  ;;  %4139 = vmatmul.mubr.msk.bf16.gmra.mxu0 %vm1215_vm1, %v1157_v39  ;;  %v1158_v0 = vpack.c.bf16 %v1039_v53, %v1038_v45  ;;  %v1040_v1 = vmax.f32 %v912_v54, 0.0  ;;  %v322_v3 = vadd.f32 %v4486_v15, %v187_v56  ;;  %v58_v39 = vld [vmem:[%s6752_s0 + $0xc8] sm:$0xff]  ;;  %v651_v45 = vld [vmem:[%s6749_s1 + $0xd8] sm:$0xff] }
  0x27   :  { %v1041_v2 = vmax.f32 %v913_v55, 0.0  ;;  %v567_v7 = vpack.c.bf16 %v448_v59, %v447_v58  ;;  %v449_v8 = vmax.f32 %v321_v60, 0.0  ;;  %v780_v9 = vmul.f32 %v4461_v6, %v645_v57  ;;  %v60_v55 = vld [vmem:[%s6752_s0 + $0xd8] sm:$0xff]  ;;  %v652_v60 = vld [vmem:[%s6749_s1 + $0xe0] sm:$0xff] }
  0x28   :  { %v914_v11 = vadd.f32 %v4471_v10, %v779_v61  ;;  %4142 = vmatprep.mubr.msk.bf16.mxu0 %vm1215_vm1, %v1158_v0  ;;  %v450_v16 = vmax.f32 %v322_v3, 0.0  ;;  %v188_v17 = vmul.f32 %v4479_v12, %v53_v62  ;;  %v189_v18 = vmul.f32 %v4479_v12, %v54_v63 }
  0x29   :  { %4269 = vmatmul.mubr.msk.bf16.gmra.mxu1 %vm1215_vm1, %v566_v49  ;;  %v1159_v14 = vpack.c.bf16 %v1041_v2, %v1040_v1  ;;  %v915_v20 = vadd.f32 %v4471_v10, %v780_v9  ;;  %v781_v22 = vmul.f32 %v4461_v6, %v646_v4  ;;  %v782_v23 = vmul.f32 %v4461_v6, %v647_v5  ;;  %v653_v5 = vld [vmem:[%s6749_s1 + $0xe8] sm:$0xff] }
  0x2a   :  { %4272 = vmatprep.mubr.msk.bf16.mxu1 %vm1215_vm1, %v567_v7  ;;  %v1042_v21 = vmax.f32 %v914_v11, 0.0  ;;  %v568_v25 = vpack.c.bf16 %v450_v16, %v449_v8  ;;  %v323_v26 = vadd.f32 %v4486_v15, %v188_v17  ;;  %v324_v27 = vadd.f32 %v4486_v15, %v189_v18 }
  0x2b   :  { %v190_v28 = vmul.f32 %v4479_v12, %v55_v13  ;;  %v1043_v29 = vmax.f32 %v915_v20, 0.0  ;;  %v916_v30 = vadd.f32 %v4471_v10, %v781_v22  ;;  %v917_v31 = vadd.f32 %v4471_v10, %v782_v23  ;;  %v61_v13 = vld [vmem:[%s6752_s0 + $0xe0] sm:$0xff]  ;;  %v654_v20 = vld [vmem:[%s6749_s1 + $0xf0] sm:$0xff] }
  0x2c   :  { %v191_v32 = vmul.f32 %v4479_v12, %v56_v19  ;;  %v451_v34 = vmax.f32 %v323_v26, 0.0  ;;  %v452_v35 = vmax.f32 %v324_v27, 0.0  ;;  %v783_v37 = vmul.f32 %v4461_v6, %v648_v24  ;;  %v63_v26 = vld [vmem:[%s6752_s0 + $0xf0] sm:$0xff] }
  0x2d   :  { %v325_v36 = vadd.f32 %v4486_v15, %v190_v28  ;;  %v1160_v40 = vpack.c.bf16 %v1043_v29, %v1042_v21  ;;  %v1044_v41 = vmax.f32 %v916_v30, 0.0  ;;  %v1045_v42 = vmax.f32 %v917_v31, 0.0  ;;  %v655_v21 = vld [vmem:[%s6749_s1 + $0xf8] sm:$0xff] }
  0x2e   :  { %v326_v43 = vadd.f32 %v4486_v15, %v191_v32  ;;  %4143 = vmatmul.mubr.msk.bf16.gmra.mxu0 %vm1215_vm1, %v1159_v14  ;;  %v569_v46 = vpack.c.bf16 %v452_v35, %v451_v34  ;;  %v784_v48 = vmul.f32 %v4461_v6, %v649_v33  ;;  %v918_v49 = vadd.f32 %v4471_v10, %v783_v37  ;;  %v62_v14 = vld [vmem:[%s6752_s0 + $0xe8] sm:$0xff]  ;;  %v64_v31 = vld [vmem:[%s6752_s0 + $0xf8] sm:$0xff] }
  0x2f   :  { %v453_v47 = vmax.f32 %v325_v36, 0.0  ;;  %4146 = vmatprep.mubr.msk.bf16.mxu0 %vm1215_vm1, %v1160_v40  ;;  %v1161_v51 = vpack.c.bf16 %v1045_v42, %v1044_v41  ;;  %v192_v53 = vmul.f32 %v4479_v12, %v57_v38  ;;  %v193_v54 = vmul.f32 %v4479_v12, %v58_v39  ;;  %v656_v36 = vld [vmem:[%s6749_s1 + $0x100] sm:$0xff] }
  0x30   :  { %v454_v52 = vmax.f32 %v326_v43, 0.0  ;;  %v919_v56 = vadd.f32 %v4471_v10, %v784_v48  ;;  %v1046_v57 = vmax.f32 %v918_v49, 0.0  ;;  %v785_v58 = vmul.f32 %v4461_v6, %v650_v44 }
  0x31   :  { %4273 = vmatmul.mubr.msk.bf16.gmra.mxu1 %vm1215_vm1, %v568_v25  ;;  %v786_v59 = vmul.f32 %v4461_v6, %v651_v45  ;;  %v327_v62 = vadd.f32 %v4486_v15, %v192_v53  ;;  %v328_v63 = vadd.f32 %v4486_v15, %v193_v54  ;;  %v194_v0 = vmul.f32 %v4479_v12, %v59_v50  ;;  %v657_v45 = vld [vmem:[%s6749_s1 + $0x108] sm:$0xff]  ;;  %v65_v50 = vld [vmem:[%s6752_s0 + $0x100] sm:$0xff] }
  0x32   :  { %4276 = vmatprep.mubr.msk.bf16.mxu1 %vm1215_vm1, %v569_v46  ;;  %v570_v61 = vpack.c.bf16 %v454_v52, %v453_v47  ;;  %v1047_v1 = vmax.f32 %v919_v56, 0.0  ;;  %v920_v2 = vadd.f32 %v4471_v10, %v785_v58  ;;  %v195_v4 = vmul.f32 %v4479_v12, %v60_v55  ;;  %v658_v56 = vld [vmem:[%s6749_s1 + $0x110] sm:$0xff] }
  0x33   :  { %v921_v3 = vadd.f32 %v4471_v10, %v786_v59  ;;  %v455_v7 = vmax.f32 %v327_v62, 0.0  ;;  %v456_v8 = vmax.f32 %v328_v63, 0.0  ;;  %v329_v9 = vadd.f32 %v4486_v15, %v194_v0 }
  0x34   :  { %v787_v11 = vmul.f32 %v4461_v6, %v652_v60  ;;  %v1162_v16 = vpack.c.bf16 %v1047_v1, %v1046_v57  ;;  %v1048_v17 = vmax.f32 %v920_v2, 0.0  ;;  %v330_v19 = vadd.f32 %v4486_v15, %v195_v4  ;;  %v659_v57 = vld [vmem:[%s6749_s1 + $0x118] sm:$0xff]  ;;  %v67_v1 = vld [vmem:[%s6752_s0 + $0x110] sm:$0xff] }
  0x35   :  { %v1049_v18 = vmax.f32 %v921_v3, 0.0  ;;  %v571_v22 = vpack.c.bf16 %v456_v8, %v455_v7  ;;  %v457_v23 = vmax.f32 %v329_v9, 0.0  ;;  %v788_v24 = vmul.f32 %v4461_v6, %v653_v5  ;;  %v68_v7 = vld [vmem:[%s6752_s0 + $0x118] sm:$0xff]  ;;  %v660_v8 = vld [vmem:[%s6749_s1 + $0x120] sm:$0xff] }
  0x36   :  { %v922_v25 = vadd.f32 %v4471_v10, %v787_v11  ;;  %4147 = vmatmul.mubr.msk.bf16.gmra.mxu0 %vm1215_vm1, %v1161_v51  ;;  %v458_v28 = vmax.f32 %v330_v19, 0.0  ;;  %v196_v29 = vmul.f32 %v4479_v12, %v61_v13  ;;  %v197_v30 = vmul.f32 %v4479_v12, %v62_v14  ;;  %v66_v51 = vld [vmem:[%s6752_s0 + $0x108] sm:$0xff] }
  0x37   :  { %v1163_v27 = vpack.c.bf16 %v1049_v18, %v1048_v17  ;;  %4150 = vmatprep.mubr.msk.bf16.mxu0 %vm1215_vm1, %v1162_v16  ;;  %v923_v32 = vadd.f32 %v4471_v10, %v788_v24  ;;  %v789_v34 = vmul.f32 %v4461_v6, %v654_v20  ;;  %v790_v35 = vmul.f32 %v4461_v6, %v655_v21  ;;  %v661_v19 = vld [vmem:[%s6749_s1 + $0x128] sm:$0xff]  ;;  %v69_v24 = vld [vmem:[%s6752_s0 + $0x120] sm:$0xff] }
  0x38   :  { %v1050_v33 = vmax.f32 %v922_v25, 0.0  ;;  %v572_v37 = vpack.c.bf16 %v458_v28, %v457_v23  ;;  %v331_v38 = vadd.f32 %v4486_v15, %v196_v29  ;;  %v332_v39 = vadd.f32 %v4486_v15, %v197_v30  ;;  %v70_v25 = vld [vmem:[%s6752_s0 + $0x128] sm:$0xff]  ;;  %v662_v30 = vld [vmem:[%s6749_s1 + $0x130] sm:$0xff] }
  0x39   :  { %4277 = vmatmul.mubr.msk.bf16.gmra.mxu1 %vm1215_vm1, %v570_v61  ;;  %v198_v40 = vmul.f32 %v4479_v12, %v63_v26  ;;  %v1051_v41 = vmax.f32 %v923_v32, 0.0  ;;  %v924_v42 = vadd.f32 %v4471_v10, %v789_v34  ;;  %v925_v43 = vadd.f32 %v4471_v10, %v790_v35  ;;  %v663_v35 = vld [vmem:[%s6749_s1 + $0x138] sm:$0xff] }
  0x3a   :  { %4280 = vmatprep.mubr.msk.bf16.mxu1 %vm1215_vm1, %v571_v22  ;;  %v199_v44 = vmul.f32 %v4479_v12, %v64_v31  ;;  %v459_v46 = vmax.f32 %v331_v38, 0.0  ;;  %v460_v47 = vmax.f32 %v332_v39, 0.0  ;;  %v791_v49 = vmul.f32 %v4461_v6, %v656_v36  ;;  %v71_v36 = vld [vmem:[%s6752_s0 + $0x130] sm:$0xff] }
  0x3b   :  { %v333_v48 = vadd.f32 %v4486_v15, %v198_v40  ;;  %v1164_v52 = vpack.c.bf16 %v1051_v41, %v1050_v33  ;;  %v1052_v53 = vmax.f32 %v924_v42, 0.0  ;;  %v1053_v54 = vmax.f32 %v925_v43, 0.0  ;;  %v72_v41 = vld [vmem:[%s6752_s0 + $0x138] sm:$0xff] }
  0x3c   :  { %v334_v55 = vadd.f32 %v4486_v15, %v199_v44  ;;  %v573_v58 = vpack.c.bf16 %v460_v47, %v459_v46  ;;  %v792_v59 = vmul.f32 %v4461_v6, %v657_v45  ;;  %v926_v60 = vadd.f32 %v4471_v10, %v791_v49 }
  0x3d   :  { %v461_v61 = vmax.f32 %v333_v48, 0.0  ;;  %v200_v63 = vmul.f32 %v4479_v12, %v65_v50  ;;  %v201_v0 = vmul.f32 %v4479_v12, %v66_v51  ;;  %v793_v4 = vmul.f32 %v4461_v6, %v658_v56  ;;  %v664_v50 = vld [vmem:[%s6749_s1 + $0x140] sm:$0xff] }
  0x3e   :  { %v462_v62 = vmax.f32 %v334_v55, 0.0  ;;  %4151 = vmatmul.mubr.msk.bf16.gmra.mxu0 %vm1215_vm1, %v1163_v27  ;;  %v927_v2 = vadd.f32 %v4471_v10, %v792_v59  ;;  %v1054_v3 = vmax.f32 %v926_v60, 0.0  ;;  %v794_v5 = vmul.f32 %v4461_v6, %v659_v57  ;;  %v665_v55 = vld [vmem:[%s6749_s1 + $0x148] sm:$0xff]  ;;  %v73_v60 = vld [vmem:[%s6752_s0 + $0x140] sm:$0xff] }
  0x3f   :  { %4154 = vmatprep.mubr.msk.bf16.mxu0 %vm1215_vm1, %v1164_v52  ;;  %v1165_v9 = vpack.c.bf16 %v1053_v54, %v1052_v53  ;;  %v335_v11 = vadd.f32 %v4486_v15, %v200_v63  ;;  %v336_v13 = vadd.f32 %v4486_v15, %v201_v0  ;;  %v928_v16 = vadd.f32 %v4471_v10, %v793_v4 }
  0x40   :  { %v1055_v14 = vmax.f32 %v927_v2, 0.0  ;;  %v929_v17 = vadd.f32 %v4471_v10, %v794_v5  ;;  %v202_v18 = vmul.f32 %v4479_v12, %v67_v1  ;;  %v203_v22 = vmul.f32 %v4479_v12, %v68_v7  ;;  %v666_v2 = vld [vmem:[%s6749_s1 + $0x150] sm:$0xff] }
  0x41   :  { %4281 = vmatmul.mubr.msk.bf16.gmra.mxu1 %vm1215_vm1, %v572_v37  ;;  %v463_v20 = vmax.f32 %v335_v11, 0.0  ;;  %v464_v21 = vmax.f32 %v336_v13, 0.0  ;;  %v795_v23 = vmul.f32 %v4461_v6, %v660_v8  ;;  %v574_v26 = vpack.c.bf16 %v462_v62, %v461_v61  ;;  %v74_v61 = vld [vmem:[%s6752_s0 + $0x148] sm:$0xff] }
  0x42   :  { %4284 = vmatprep.mubr.msk.bf16.mxu1 %vm1215_vm1, %v573_v58  ;;  %v1166_v27 = vpack.c.bf16 %v1055_v14, %v1054_v3  ;;  %v1056_v28 = vmax.f32 %v928_v16, 0.0  ;;  %v337_v29 = vadd.f32 %v4486_v15, %v202_v18  ;;  %v1057_v31 = vmax.f32 %v929_v17, 0.0  ;;  %v667_v3 = vld [vmem:[%s6749_s1 + $0x158] sm:$0xff]  ;;  %v75_v16 = vld [vmem:[%s6752_s0 + $0x150] sm:$0xff] }
  0x43   :  { %v338_v32 = vadd.f32 %v4486_v15, %v203_v22  ;;  %v796_v33 = vmul.f32 %v4461_v6, %v661_v19  ;;  %v930_v34 = vadd.f32 %v4471_v10, %v795_v23  ;;  %v575_v37 = vpack.c.bf16 %v464_v21, %v463_v20  ;;  %v76_v21 = vld [vmem:[%s6752_s0 + $0x158] sm:$0xff]  ;;  %v668_v22 = vld [vmem:[%s6749_s1 + $0x160] sm:$0xff] }
  0x44   :  { %v465_v38 = vmax.f32 %v337_v29, 0.0  ;;  %v204_v39 = vmul.f32 %v4479_v12, %v69_v24  ;;  %v205_v40 = vmul.f32 %v4479_v12, %v70_v25  ;;  %v797_v45 = vmul.f32 %v4461_v6, %v662_v30  ;;  %v669_v30 = vld [vmem:[%s6749_s1 + $0x168] sm:$0xff] }
  0x45   :  { %v466_v42 = vmax.f32 %v338_v32, 0.0  ;;  %v931_v43 = vadd.f32 %v4471_v10, %v796_v33  ;;  %v1058_v44 = vmax.f32 %v930_v34, 0.0  ;;  %v798_v48 = vmul.f32 %v4461_v6, %v663_v35  ;;  %v77_v34 = vld [vmem:[%s6752_s0 + $0x160] sm:$0xff]  ;;  %v78_v35 = vld [vmem:[%s6752_s0 + $0x168] sm:$0xff] }
  0x46   :  { %4155 = vmatmul.mubr.msk.bf16.gmra.mxu0 %vm1215_vm1, %v1165_v9  ;;  %v339_v46 = vadd.f32 %v4486_v15, %v204_v39  ;;  %v340_v47 = vadd.f32 %v4486_v15, %v205_v40  ;;  %v206_v49 = vmul.f32 %v4479_v12, %v71_v36  ;;  %v1167_v51 = vpack.c.bf16 %v1057_v31, %v1056_v28  ;;  %v670_v40 = vld [vmem:[%s6749_s1 + $0x170] sm:$0xff] }
  0x47   :  { %4158 = vmatprep.mubr.msk.bf16.mxu0 %vm1215_vm1, %v1166_v27  ;;  %v1059_v52 = vmax.f32 %v931_v43, 0.0  ;;  %v932_v53 = vadd.f32 %v4471_v10, %v797_v45  ;;  %v207_v54 = vmul.f32 %v4479_v12, %v72_v41  ;;  %v933_v58 = vadd.f32 %v4471_v10, %v798_v48  ;;  %v671_v45 = vld [vmem:[%s6749_s1 + $0x178] sm:$0xff] }
  0x48   :  { %v467_v56 = vmax.f32 %v339_v46, 0.0  ;;  %v468_v57 = vmax.f32 %v340_v47, 0.0  ;;  %v341_v59 = vadd.f32 %v4486_v15, %v206_v49  ;;  %v576_v62 = vpack.c.bf16 %v466_v42, %v465_v38 }
  0x49   :  { %4285 = vmatmul.mubr.msk.bf16.gmra.mxu1 %vm1215_vm1, %v574_v26  ;;  %v1168_v63 = vpack.c.bf16 %v1059_v52, %v1058_v44  ;;  %v342_v0 = vadd.f32 %v4486_v15, %v207_v54  ;;  %v799_v1 = vmul.f32 %v4461_v6, %v664_v50  ;;  %v1060_v5 = vmax.f32 %v932_v53, 0.0  ;;  %v79_v50 = vld [vmem:[%s6752_s0 + $0x170] sm:$0xff] }
  0x4a   :  { %4288 = vmatprep.mubr.msk.bf16.mxu1 %vm1215_vm1, %v575_v37  ;;  %v577_v4 = vpack.c.bf16 %v468_v57, %v467_v56  ;;  %v1061_v7 = vmax.f32 %v933_v58, 0.0  ;;  %v800_v8 = vmul.f32 %v4461_v6, %v665_v55  ;;  %v469_v9 = vmax.f32 %v341_v59, 0.0 }
  0x4b   :  { %v934_v11 = vadd.f32 %v4471_v10, %v799_v1  ;;  %v208_v13 = vmul.f32 %v4479_v12, %v73_v60  ;;  %v209_v14 = vmul.f32 %v4479_v12, %v74_v61  ;;  %v470_v17 = vmax.f32 %v342_v0, 0.0  ;;  %v672_v60 = vld [vmem:[%s6749_s1 + $0x180] sm:$0xff] }
  0x4c   :  { %v935_v18 = vadd.f32 %v4471_v10, %v800_v8  ;;  %v801_v19 = vmul.f32 %v4461_v6, %v666_v2  ;;  %v802_v20 = vmul.f32 %v4461_v6, %v667_v3  ;;  %v210_v29 = vmul.f32 %v4479_v12, %v75_v16  ;;  %v81_v2 = vld [vmem:[%s6752_s0 + $0x180] sm:$0xff]  ;;  %v82_v3 = vld [vmem:[%s6752_s0 + $0x188] sm:$0xff] }
  0x4d   :  { %v1062_v23 = vmax.f32 %v934_v11, 0.0  ;;  %v343_v24 = vadd.f32 %v4486_v15, %v208_v13  ;;  %v344_v25 = vadd.f32 %v4486_v15, %v209_v14  ;;  %v1169_v31 = vpack.c.bf16 %v1061_v7, %v1060_v5  ;;  %v675_v11 = vld [vmem:[%s6749_s1 + $0x198] sm:$0xff] }
  0x4e   :  { %4159 = vmatmul.mubr.msk.bf16.gmra.mxu0 %vm1215_vm1, %v1167_v51  ;;  %v1063_v26 = vmax.f32 %v935_v18, 0.0  ;;  %v936_v27 = vadd.f32 %v4471_v10, %v801_v19  ;;  %v937_v28 = vadd.f32 %v4471_v10, %v802_v20  ;;  %v211_v32 = vmul.f32 %v4479_v12, %v76_v21  ;;  %v80_v51 = vld [vmem:[%s6752_s0 + $0x178] sm:$0xff] }
  0x4f   :  { %4162 = vmatprep.mubr.msk.bf16.mxu0 %vm1215_vm1, %v1168_v63  ;;  %v803_v33 = vmul.f32 %v4461_v6, %v668_v22  ;;  %v578_v36 = vpack.c.bf16 %v470_v17, %v469_v9  ;;  %v471_v37 = vmax.f32 %v343_v24, 0.0  ;;  %v472_v38 = vmax.f32 %v344_v25, 0.0  ;;  %v673_v63 = vld [vmem:[%s6749_s1 + $0x188] sm:$0xff]  ;;  %v674_v9 = vld [vmem:[%s6749_s1 + $0x190] sm:$0xff] }
  0x50   :  { %v345_v39 = vadd.f32 %v4486_v15, %v210_v29  ;;  %v1170_v41 = vpack.c.bf16 %v1063_v26, %v1062_v23  ;;  %v1064_v42 = vmax.f32 %v936_v27, 0.0  ;;  %v346_v43 = vadd.f32 %v4486_v15, %v211_v32  ;;  %v83_v22 = vld [vmem:[%s6752_s0 + $0x190] sm:$0xff]  ;;  %v84_v27 = vld [vmem:[%s6752_s0 + $0x198] sm:$0xff]  ;;  %v676_v32 = vld [vmem:[%s6749_s1 + $0x1a0] sm:$0xff] }
  0x51   :  { %4289 = vmatmul.mubr.msk.bf16.gmra.mxu1 %vm1215_vm1, %v576_v62  ;;  %v804_v44 = vmul.f32 %v4461_v6, %v669_v30  ;;  %v1065_v46 = vmax.f32 %v937_v28, 0.0  ;;  %v938_v47 = vadd.f32 %v4471_v10, %v803_v33  ;;  %v212_v48 = vmul.f32 %v4479_v12, %v77_v34 }
  0x52   :  { %4292 = vmatprep.mubr.msk.bf16.mxu1 %vm1215_vm1, %v577_v4  ;;  %v213_v49 = vmul.f32 %v4479_v12, %v78_v35  ;;  %v473_v52 = vmax.f32 %v345_v39, 0.0  ;;  %v474_v53 = vmax.f32 %v346_v43, 0.0  ;;  %v805_v55 = vmul.f32 %v4461_v6, %v670_v40 }
  0x53   :  { %v939_v54 = vadd.f32 %v4471_v10, %v804_v44  ;;  %v579_v56 = vpack.c.bf16 %v472_v38, %v471_v37  ;;  %v347_v57 = vadd.f32 %v4486_v15, %v212_v48  ;;  %v806_v59 = vmul.f32 %v4461_v6, %v671_v45  ;;  %v677_v37 = vld [vmem:[%s6749_s1 + $0x1a8] sm:$0xff] }
  0x54   :  { %v348_v58 = vadd.f32 %v4486_v15, %v213_v49  ;;  %v214_v61 = vmul.f32 %v4479_v12, %v79_v50  ;;  %v215_v62 = vmul.f32 %v4479_v12, %v80_v51  ;;  %v1171_v0 = vpack.c.bf16 %v1065_v46, %v1064_v42  ;;  %v85_v42 = vld [vmem:[%s6752_s0 + $0x1a0] sm:$0xff]  ;;  %v86_v46 = vld [vmem:[%s6752_s0 + $0x1a8] sm:$0xff]  ;;  %v679_v51 = vld [vmem:[%s6749_s1 + $0x1b8] sm:$0xff] }
  0x55   :  { %v1066_v1 = vmax.f32 %v938_v47, 0.0  ;;  %v580_v4 = vpack.c.bf16 %v474_v53, %v473_v52  ;;  %v1067_v5 = vmax.f32 %v939_v54, 0.0  ;;  %v940_v7 = vadd.f32 %v4471_v10, %v805_v55  ;;  %v678_v47 = vld [vmem:[%s6749_s1 + $0x1b0] sm:$0xff] }
  0x56   :  { %4163 = vmatmul.mubr.msk.bf16.gmra.mxu0 %vm1215_vm1, %v1169_v31  ;;  %v807_v8 = vmul.f32 %v4461_v6, %v672_v60  ;;  %v475_v13 = vmax.f32 %v347_v57, 0.0  ;;  %v476_v14 = vmax.f32 %v348_v58, 0.0  ;;  %v941_v16 = vadd.f32 %v4471_v10, %v806_v59  ;;  %v87_v52 = vld [vmem:[%s6752_s0 + $0x1b0] sm:$0xff]  ;;  %v88_v60 = vld [vmem:[%s6752_s0 + $0x1b8] sm:$0xff] }
  0x57   :  { %4166 = vmatprep.mubr.msk.bf16.mxu0 %vm1215_vm1, %v1170_v41  ;;  %v808_v17 = vmul.f32 %v4461_v6, %v673_v63  ;;  %v349_v18 = vadd.f32 %v4486_v15, %v214_v61  ;;  %v350_v19 = vadd.f32 %v4486_v15, %v215_v62  ;;  %v216_v20 = vmul.f32 %v4479_v12, %v81_v2  ;;  %v5080_v61 = vld [vmem:[%s6751_s5] ss:$0 sm:$0xff] }
  0x58   :  { %v217_v21 = vmul.f32 %v4479_v12, %v82_v3  ;;  %v942_v23 = vadd.f32 %v4471_v10, %v807_v8  ;;  %v809_v25 = vmul.f32 %v4461_v6, %v674_v9  ;;  %v810_v26 = vmul.f32 %v4461_v6, %v675_v11  ;;  %v680_v2 = vld [vmem:[%s6749_s1 + $0x1c0] sm:$0xff]  ;;  %v681_v8 = vld [vmem:[%s6749_s1 + $0x1c8] sm:$0xff] }
  0x59   :  { %4293 = vmatmul.mubr.msk.bf16.gmra.mxu1 %vm1215_vm1, %v578_v36  ;;  %v943_v24 = vadd.f32 %v4471_v10, %v808_v17  ;;  %v1172_v28 = vpack.c.bf16 %v1067_v5, %v1066_v1  ;;  %v1068_v29 = vmax.f32 %v940_v7, 0.0  ;;  %v351_v30 = vadd.f32 %v4486_v15, %v216_v20  ;;  %v5095_v11 = vld [vmem:[%s6754_s4] ss:$0 sm:$0xff] }
  0x5a   :  { %4296 = vmatprep.mubr.msk.bf16.mxu1 %vm1215_vm1, %v579_v56  ;;  %v352_v31 = vadd.f32 %v4486_v15, %v217_v21  ;;  %v581_v33 = vpack.c.bf16 %v476_v14, %v475_v13  ;;  %v944_v34 = vadd.f32 %v4471_v10, %v809_v25  ;;  %v945_v35 = vadd.f32 %v4471_v10, %v810_v26  ;;  %v89_v17 = vld [vmem:[%s6752_s0 + $0x1c0] sm:$0xff] }
  0x5b   :  { %v218_v36 = vmul.f32 %v4479_v12, %v83_v22  ;;  %v1069_v38 = vmax.f32 %v941_v16, 0.0  ;;  %v477_v39 = vmax.f32 %v349_v18, 0.0  ;;  %v478_v40 = vmax.f32 %v350_v19, 0.0  ;;  %v90_v22 = vld [vmem:[%s6752_s0 + $0x1c8] sm:$0xff] }
  0x5c   :  { %v219_v41 = vmul.f32 %v4479_v12, %v84_v27  ;;  %v1070_v43 = vmax.f32 %v942_v23, 0.0  ;;  %v1071_v44 = vmax.f32 %v943_v24, 0.0  ;;  %v479_v10 = vmax.f32 %v351_v30, 0.0  ;;  %v682_v30 = vld [vmem:[%s6749_s1 + $0x1d0] sm:$0xff] }
  0x5d   :  { %v811_v45 = vmul.f32 %v4461_v6, %v676_v32  ;;  %v480_v12 = vmax.f32 %v352_v31, 0.0  ;;  %v353_v48 = vadd.f32 %v4486_v15, %v218_v36  ;;  %v5056_v6 = vld [vmem:[%s6750_s3] ss:$0 sm:$0xff]  ;;  %v1072_v53 = vmax.f32 %v944_v34, 0.0  ;;  %v683_v31 = vld [vmem:[%s6749_s1 + $0x1d8] sm:$0xff]  ;;  %v91_v36 = vld [vmem:[%s6752_s0 + $0x1d0] sm:$0xff] }
  0x5e   :  { %4167 = vmatmul.mubr.msk.bf16.gmra.mxu0 %vm1215_vm1, %v1171_v0  ;;  %v354_v49 = vadd.f32 %v4486_v15, %v219_v41  ;;  %v812_v50 = vmul.f32 %v5056_v6, %v677_v37  ;;  %v1073_v54 = vmax.f32 %v945_v35, 0.0  ;;  %v5069_v15 = vld [vmem:[%s6753_s2] ss:$0 sm:$0xff]  ;;  %v1173_v56 = vpack.c.bf16 %v1069_v38, %v1068_v29  ;;  %v92_v41 = vld [vmem:[%s6752_s0 + $0x1d8] sm:$0xff] }
  0x5f   :  { %4170 = vmatprep.mubr.msk.bf16.mxu0 %vm1215_vm1, %v1172_v28  ;;  %v220_v55 = vmul.f32 %v5069_v15, %v85_v42  ;;  %v582_v57 = vpack.c.bf16 %v478_v40, %v477_v39  ;;  %v221_v58 = vmul.f32 %v5069_v15, %v86_v46  ;;  %v813_v59 = vmul.f32 %v5056_v6, %v678_v47  ;;  %v684_v42 = vld [vmem:[%s6749_s1 + $0x1e0] sm:$0xff]  ;;  %v685_v46 = vld [vmem:[%s6749_s1 + $0x1e8] sm:$0xff] }
  0x60   :  { %v946_v62 = vadd.f32 %v5080_v61, %v811_v45  ;;  %v947_v63 = vadd.f32 %v5080_v61, %v812_v50  ;;  %v814_v0 = vmul.f32 %v5056_v6, %v679_v51  ;;  %v222_v1 = vmul.f32 %v5069_v15, %v87_v52  ;;  %v93_v50 = vld [vmem:[%s6752_s0 + $0x1e0] sm:$0xff] }
  0x61   :  { %4297 = vmatmul.mubr.msk.bf16.gmra.mxu1 %vm1215_vm1, %v580_v4  ;;  %v1174_v3 = vpack.c.bf16 %v1071_v44, %v1070_v43  ;;  %v583_v4 = vpack.c.bf16 %v480_v12, %v479_v10  ;;  %v481_v5 = vmax.f32 %v353_v48, 0.0  ;;  %v482_v7 = vmax.f32 %v354_v49, 0.0 }
  0x62   :  { %4300 = vmatprep.mubr.msk.bf16.mxu1 %vm1215_vm1, %v581_v33  ;;  %v1175_v9 = vpack.c.bf16 %v1073_v54, %v1072_v53  ;;  %v355_v13 = vadd.f32 %v5095_v11, %v220_v55  ;;  %v356_v14 = vadd.f32 %v5095_v11, %v221_v58  ;;  %v223_v16 = vmul.f32 %v5069_v15, %v88_v60  ;;  %v94_v54 = vld [vmem:[%s6752_s0 + $0x1e8] sm:$0xff]  ;;  %v686_v58 = vld [vmem:[%s6749_s1 + $0x1f0] sm:$0xff] }
  0x63   :  { %v948_v18 = vadd.f32 %v5080_v61, %v813_v59  ;;  %v949_v19 = vadd.f32 %v5080_v61, %v814_v0  ;;  %v357_v20 = vadd.f32 %v5095_v11, %v222_v1  ;;  %v815_v21 = vmul.f32 %v5056_v6, %v680_v2  ;;  %v687_v59 = vld [vmem:[%s6749_s1 + $0x1f8] sm:$0xff]  ;;  %v95_v1 = vld [vmem:[%s6752_s0 + $0x1f0] sm:$0xff] }
  0x64   :  { %v1074_v23 = vmax.f32 %v946_v62, 0.0  ;;  %v1075_v24 = vmax.f32 %v947_v63, 0.0  ;;  %v358_v25 = vadd.f32 %v5095_v11, %v223_v16  ;;  %v816_v26 = vmul.f32 %v5056_v6, %v681_v8  ;;  %v688_v16 = vld [vmem:[%s6749_s1 + $0x200] sm:$0xff] }
  0x65   :  { %v584_v27 = vpack.c.bf16 %v482_v7, %v481_v5  ;;  %v950_v28 = vadd.f32 %v5080_v61, %v815_v21  ;;  %v224_v29 = vmul.f32 %v5069_v15, %v89_v17  ;;  %v483_v32 = vmax.f32 %v355_v13, 0.0  ;;  %v96_v7 = vld [vmem:[%s6752_s0 + $0x1f8] sm:$0xff] }
  0x66   :  { %4171 = vmatmul.mubr.msk.bf16.gmra.mxu0 %vm1215_vm1, %v1173_v56  ;;  %v484_v33 = vmax.f32 %v356_v14, 0.0  ;;  %v951_v34 = vadd.f32 %v5080_v61, %v816_v26  ;;  %v225_v35 = vmul.f32 %v5069_v15, %v90_v22  ;;  %v1076_v37 = vmax.f32 %v948_v18, 0.0 }
  0x67   :  { %4174 = vmatprep.mubr.msk.bf16.mxu0 %vm1215_vm1, %v1174_v3  ;;  %v1077_v38 = vmax.f32 %v949_v19, 0.0  ;;  %v485_v39 = vmax.f32 %v357_v20, 0.0  ;;  %v486_v40 = vmax.f32 %v358_v25, 0.0  ;;  %v1176_v43 = vpack.c.bf16 %v1075_v24, %v1074_v23  ;;  %v689_v25 = vld [vmem:[%s6749_s1 + $0x208] sm:$0xff] }
  0x68   :  { %v359_v44 = vadd.f32 %v5095_v11, %v224_v29  ;;  %v817_v10 = vmul.f32 %v5056_v6, %v682_v30  ;;  %v818_v45 = vmul.f32 %v5056_v6, %v683_v31  ;;  %v1078_v47 = vmax.f32 %v950_v28, 0.0  ;;  %v97_v30 = vld [vmem:[%s6752_s0 + $0x200] sm:$0xff] }
  0x69   :  { %4301 = vmatmul.mubr.msk.bf16.gmra.mxu1 %vm1215_vm1, %v582_v57  ;;  %v1079_v12 = vmax.f32 %v951_v34, 0.0  ;;  %v360_v48 = vadd.f32 %v5095_v11, %v225_v35  ;;  %v226_v49 = vmul.f32 %v5069_v15, %v91_v36  ;;  %v585_v51 = vpack.c.bf16 %v484_v33, %v483_v32  ;;  %v98_v35 = vld [vmem:[%s6752_s0 + $0x208] sm:$0xff]  ;;  %v690_v36 = vld [vmem:[%s6749_s1 + $0x210] sm:$0xff] }
  0x6a   :  { %4304 = vmatprep.mubr.msk.bf16.mxu1 %vm1215_vm1, %v583_v4  ;;  %v227_v52 = vmul.f32 %v5069_v15, %v92_v41  ;;  %v819_v53 = vmul.f32 %v5056_v6, %v684_v42  ;;  %v1177_v55 = vpack.c.bf16 %v1077_v38, %v1076_v37  ;;  %v586_v56 = vpack.c.bf16 %v486_v40, %v485_v39  ;;  %v691_v41 = vld [vmem:[%s6749_s1 + $0x218] sm:$0xff]  ;;  %v99_v42 = vld [vmem:[%s6752_s0 + $0x210] sm:$0xff] }
  0x6b   :  { %v820_v57 = vmul.f32 %v5056_v6, %v685_v46  ;;  %v487_v60 = vmax.f32 %v359_v44, 0.0  ;;  %v952_v62 = vadd.f32 %v5080_v61, %v817_v10  ;;  %v953_v63 = vadd.f32 %v5080_v61, %v818_v45  ;;  %v100_v46 = vld [vmem:[%s6752_s0 + $0x218] sm:$0xff] }
  0x6c   :  { %v228_v0 = vmul.f32 %v5069_v15, %v93_v50  ;;  %v1178_v2 = vpack.c.bf16 %v1079_v12, %v1078_v47  ;;  %v488_v3 = vmax.f32 %v360_v48, 0.0  ;;  %v361_v4 = vadd.f32 %v5095_v11, %v226_v49  ;;  %v692_v50 = vld [vmem:[%s6749_s1 + $0x220] sm:$0xff] }
  0x6d   :  { %v229_v5 = vmul.f32 %v5069_v15, %v94_v54  ;;  %v362_v8 = vadd.f32 %v5095_v11, %v227_v52  ;;  %v821_v13 = vmul.f32 %v5056_v6, %v686_v58  ;;  %v822_v14 = vmul.f32 %v5056_v6, %v687_v59 }
  0x6e   :  { %4175 = vmatmul.mubr.msk.bf16.gmra.mxu0 %vm1215_vm1, %v1175_v9  ;;  %v954_v9 = vadd.f32 %v5080_v61, %v819_v53  ;;  %v955_v17 = vadd.f32 %v5080_v61, %v820_v57  ;;  %v363_v18 = vadd.f32 %v5095_v11, %v228_v0  ;;  %v230_v20 = vmul.f32 %v5069_v15, %v95_v1 }
  0x6f   :  { %4178 = vmatprep.mubr.msk.bf16.mxu0 %vm1215_vm1, %v1176_v43  ;;  %v364_v19 = vadd.f32 %v5095_v11, %v229_v5  ;;  %v1080_v21 = vmax.f32 %v952_v62, 0.0  ;;  %v956_v22 = vadd.f32 %v5080_v61, %v821_v13  ;;  %v957_v23 = vadd.f32 %v5080_v61, %v822_v14 }
  0x70   :  { %v231_v24 = vmul.f32 %v5069_v15, %v96_v7  ;;  %v587_v26 = vpack.c.bf16 %v488_v3, %v487_v60  ;;  %v365_v28 = vadd.f32 %v5095_v11, %v230_v20  ;;  %v823_v29 = vmul.f32 %v5056_v6, %v688_v16  ;;  %v101_v60 = vld [vmem:[%s6752_s0 + $0x220] sm:$0xff] }
  0x71   :  { %4305 = vmatmul.mubr.msk.bf16.gmra.mxu1 %vm1215_vm1, %v584_v27  ;;  %v1081_v27 = vmax.f32 %v953_v63, 0.0  ;;  %v489_v31 = vmax.f32 %v361_v4, 0.0  ;;  %v490_v32 = vmax.f32 %v362_v8, 0.0  ;;  %v1082_v33 = vmax.f32 %v954_v9, 0.0  ;;  %v694_v8 = vld [vmem:[%s6749_s1 + $0x230] sm:$0xff]  ;;  %v695_v9 = vld [vmem:[%s6749_s1 + $0x238] sm:$0xff] }
  0x72   :  { %4308 = vmatprep.mubr.msk.bf16.mxu1 %vm1215_vm1, %v585_v51  ;;  %v366_v34 = vadd.f32 %v5095_v11, %v231_v24  ;;  %v1083_v37 = vmax.f32 %v955_v17, 0.0  ;;  %v491_v38 = vmax.f32 %v363_v18, 0.0  ;;  %v492_v39 = vmax.f32 %v364_v19, 0.0  ;;  %v103_v18 = vld [vmem:[%s6752_s0 + $0x230] sm:$0xff] }
  0x73   :  { %v824_v40 = vmul.f32 %v5056_v6, %v689_v25  ;;  %v1084_v43 = vmax.f32 %v956_v22, 0.0  ;;  %v1085_v44 = vmax.f32 %v957_v23, 0.0  ;;  %v958_v10 = vadd.f32 %v5080_v61, %v823_v29  ;;  %v104_v23 = vld [vmem:[%s6752_s0 + $0x238] sm:$0xff] }
  0x74   :  { %v232_v45 = vmul.f32 %v5069_v15, %v97_v30  ;;  %v493_v47 = vmax.f32 %v365_v28, 0.0  ;;  %v494_v12 = vmax.f32 %v366_v34, 0.0  ;;  %v233_v48 = vmul.f32 %v5069_v15, %v98_v35 }
  0x75   :  { %v825_v49 = vmul.f32 %v5056_v6, %v690_v36  ;;  %v1179_v51 = vpack.c.bf16 %v1081_v27, %v1080_v21  ;;  %v588_v52 = vpack.c.bf16 %v490_v32, %v489_v31  ;;  %v826_v53 = vmul.f32 %v5056_v6, %v691_v41  ;;  %v696_v32 = vld [vmem:[%s6749_s1 + $0x240] sm:$0xff] }
  0x76   :  { %4179 = vmatmul.mubr.msk.bf16.gmra.mxu0 %vm1215_vm1, %v1177_v55  ;;  %v234_v54 = vmul.f32 %v5069_v15, %v99_v42  ;;  %v693_v55 = vld [vmem:[%s6749_s1 + $0x228] sm:$0xff]  ;;  %v589_v57 = vpack.c.bf16 %v492_v39, %v491_v38  ;;  %v959_v58 = vadd.f32 %v5080_v61, %v824_v40  ;;  %v235_v59 = vmul.f32 %v5069_v15, %v100_v46  ;;  %v105_v42 = vld [vmem:[%s6752_s0 + $0x240] sm:$0xff] }
  0x77   :  { %4182 = vmatprep.mubr.msk.bf16.mxu0 %vm1215_vm1, %v1178_v2  ;;  %v5233_v62 = vpack.c.bf16 %v1085_v44, %v1084_v43  ;;  %v1086_v63 = vmax.f32 %v958_v10, 0.0  ;;  %v367_v0 = vadd.f32 %v5095_v11, %v232_v45  ;;  %v827_v1 = vmul.f32 %v5056_v6, %v692_v50  ;;  %v102_v2 = vld [vmem:[%s6752_s0 + $0x228] sm:$0xff] }
  0x78   :  { %v5240_v3 = vpack.c.bf16 %v494_v12, %v493_v47  ;;  %v368_v4 = vadd.f32 %v5095_v11, %v233_v48  ;;  %v960_v5 = vadd.f32 %v5080_v61, %v825_v49  ;;  %v828_v7 = vmul.f32 %v5056_v6, %v693_v55  ;;  %v106_v43 = vld [vmem:[%s6752_s0 + $0x248] sm:$0xff]  ;;  %v698_v47 = vld [vmem:[%s6749_s1 + $0x250] sm:$0xff]  ;;  %v699_v12 = vld [vmem:[%s6749_s1 + $0x258] sm:$0xff] }
  0x79   :  { %4309 = vmatmul.mubr.msk.bf16.gmra.mxu1 %vm1215_vm1, %v586_v56  ;;  %v1180_v56 = vpack.c.bf16 %v1083_v37, %v1082_v33  ;;  %v961_v13 = vadd.f32 %v5080_v61, %v826_v53  ;;  %v369_v14 = vadd.f32 %v5095_v11, %v234_v54  ;;  %v370_v16 = vadd.f32 %v5095_v11, %v235_v59  ;;  %v697_v37 = vld [vmem:[%s6749_s1 + $0x248] sm:$0xff] }
  0x7a   :  { %4312 = vmatprep.mubr.msk.bf16.mxu1 %vm1215_vm1, %v587_v26  ;;  %v236_v17 = vmul.f32 %v5069_v15, %v101_v60  ;;  %v1087_v19 = vmax.f32 %v959_v58, 0.0  ;;  %v962_v20 = vadd.f32 %v5080_v61, %v827_v1  ;;  %v963_v21 = vadd.f32 %v5080_v61, %v828_v7  ;;  %v701_v7 = vld [vmem:[%s6749_s1 + $0x268] sm:$0xff] }
  0x7b   :  { %v237_v22 = vmul.f32 %v5069_v15, %v102_v2  ;;  %v495_v24 = vmax.f32 %v367_v0, 0.0  ;;  %v829_v26 = vmul.f32 %v5056_v6, %v694_v8  ;;  %v830_v27 = vmul.f32 %v5056_v6, %v695_v9  ;;  %v700_v0 = vld [vmem:[%s6749_s1 + $0x260] sm:$0xff] }
  0x7c   :  { %v371_v25 = vadd.f32 %v5095_v11, %v236_v17  ;;  %v496_v28 = vmax.f32 %v368_v4, 0.0  ;;  %v1088_v29 = vmax.f32 %v960_v5, 0.0  ;;  %v238_v31 = vmul.f32 %v5069_v15, %v103_v18 }
  0x7d   :  { %v372_v30 = vadd.f32 %v5095_v11, %v237_v22  ;;  %v1089_v33 = vmax.f32 %v961_v13, 0.0  ;;  %v497_v34 = vmax.f32 %v369_v14, 0.0  ;;  %v498_v35 = vmax.f32 %v370_v16, 0.0  ;;  %v109_v14 = vld [vmem:[%s6752_s0 + $0x260] sm:$0xff] }
  0x7e   :  { %4183 = vmatmul.mubr.msk.bf16.gmra.mxu0 %vm1215_vm1, %v1179_v51  ;;  %v239_v36 = vmul.f32 %v5069_v15, %v104_v23  ;;  %v1182_v38 = vpack.c.bf16 %v1087_v19, %v1086_v63  ;;  %v1090_v39 = vmax.f32 %v962_v20, 0.0  ;;  %v1091_v40 = vmax.f32 %v963_v21, 0.0  ;;  %v110_v19 = vld [vmem:[%s6752_s0 + $0x268] sm:$0xff] }
  0x7f   :  { %4186 = vmatprep.mubr.msk.bf16.mxu0 %vm1215_vm1, %v1180_v56  ;;  %v964_v41 = vadd.f32 %v5080_v61, %v829_v26  ;;  %v499_v44 = vmax.f32 %v371_v25, 0.0  ;;  %v500_v10 = vmax.f32 %v372_v30, 0.0  ;;  %v965_v45 = vadd.f32 %v5080_v61, %v830_v27  ;;  %v703_v25 = vld [vmem:[%s6749_s1 + $0x278] sm:$0xff] }
  0x80   :  { %v831_v46 = vmul.f32 %v5056_v6, %v696_v32  ;;  %v591_v48 = vpack.c.bf16 %v496_v28, %v495_v24  ;;  %v373_v49 = vadd.f32 %v5095_v11, %v238_v31  ;;  %v374_v50 = vadd.f32 %v5095_v11, %v239_v36  ;;  %v702_v24 = vld [vmem:[%s6749_s1 + $0x270] sm:$0xff] }
  0x81   :  { %4313 = vmatmul.mubr.msk.bf16.gmra.mxu1 %vm1215_vm1, %v588_v52  ;;  %v832_v51 = vmul.f32 %v5056_v6, %v697_v37  ;;  %v107_v52 = vld [vmem:[%s6752_s0 + $0x250] sm:$0xff]  ;;  %v1183_v53 = vpack.c.bf16 %v1089_v33, %v1088_v29  ;;  %v592_v54 = vpack.c.bf16 %v498_v35, %v497_v34  ;;  %v240_v55 = vmul.f32 %v5069_v15, %v105_v42 }
  0x82   :  { %4316 = vmatprep.mubr.msk.bf16.mxu1 %vm1215_vm1, %v589_v57  ;;  %v241_v56 = vmul.f32 %v5069_v15, %v106_v43  ;;  %v108_v57 = vld [vmem:[%s6752_s0 + $0x258] sm:$0xff]  ;;  %v1184_v58 = vpack.c.bf16 %v1091_v40, %v1090_v39  ;;  %v1092_v59 = vmax.f32 %v964_v41, 0.0  ;;  %v833_v60 = vmul.f32 %v5056_v6, %v698_v47 }
  0x83   :  { %v834_v63 = vmul.f32 %v5056_v6, %v699_v12  ;;  %v593_v1 = vpack.c.bf16 %v500_v10, %v499_v44  ;;  %v1093_v2 = vmax.f32 %v965_v45, 0.0  ;;  %v966_v4 = vadd.f32 %v5080_v61, %v831_v46  ;;  %v112_v43 = vld [vmem:[%s6752_s0 + $0x278] sm:$0xff]  ;;  %v704_v44 = vld [vmem:[%s6749_s1 + $0x280] sm:$0xff]  ;;  %v705_v12 = vld [vmem:[%s6749_s1 + $0x288] sm:$0xff] }
  0x84   :  { %v242_v5 = vmul.f32 %v5069_v15, %v107_v52  ;;  %v501_v8 = vmax.f32 %v373_v49, 0.0  ;;  %v502_v9 = vmax.f32 %v374_v50, 0.0  ;;  %v967_v13 = vadd.f32 %v5080_v61, %v832_v51  ;;  %v114_v52 = vld [vmem:[%s6752_s0 + $0x288] sm:$0xff] }
  0x85   :  { %v375_v16 = vadd.f32 %v5095_v11, %v240_v55  ;;  %v376_v17 = vadd.f32 %v5095_v11, %v241_v56  ;;  %v835_v18 = vmul.f32 %v5056_v6, %v700_v0  ;;  %v969_v20 = vadd.f32 %v5080_v61, %v834_v63 }
  0x86   :  { %4187 = vmatmul.mubr.msk.bf16.gmra.mxu0 %vm1215_vm1, %v5233_v62  ;;  %v243_v62 = vmul.f32 %v5069_v15, %v108_v57  ;;  %v377_v21 = vadd.f32 %v5095_v11, %v242_v5  ;;  %v836_v23 = vmul.f32 %v5056_v6, %v701_v7  ;;  %v5344_v26 = vpack.c.bf16 %v1093_v2, %v1092_v59  ;;  %v706_v57 = vld [vmem:[%s6749_s1 + $0x290] sm:$0xff] }
  0x87   :  { %4190 = vmatprep.mubr.msk.bf16.mxu0 %vm1215_vm1, %v1182_v38  ;;  %v1094_v27 = vmax.f32 %v966_v4, 0.0  ;;  %v970_v28 = vadd.f32 %v5080_v61, %v835_v18  ;;  %v244_v29 = vmul.f32 %v5069_v15, %v109_v14  ;;  %v5348_v30 = vpack.c.bf16 %v502_v9, %v501_v8  ;;  %v111_v38 = vld [vmem:[%s6752_s0 + $0x270] sm:$0xff]  ;;  %v116_v8 = vld [vmem:[%s6752_s0 + $0x298] sm:$0xff] }
  0x88   :  { %v378_v22 = vadd.f32 %v5095_v11, %v243_v62  ;;  %v1095_v31 = vmax.f32 %v967_v13, 0.0  ;;  %v971_v32 = vadd.f32 %v5080_v61, %v836_v23  ;;  %v245_v33 = vmul.f32 %v5069_v15, %v110_v19 }
  0x89   :  { %4317 = vmatmul.mubr.msk.bf16.gmra.mxu1 %vm1215_vm1, %v5240_v3  ;;  %v968_v3 = vadd.f32 %v5080_v61, %v833_v60  ;;  %v503_v34 = vmax.f32 %v375_v16, 0.0  ;;  %v504_v35 = vmax.f32 %v376_v17, 0.0  ;;  %v837_v36 = vmul.f32 %v5056_v6, %v702_v24  ;;  %v708_v16 = vld [vmem:[%s6749_s1 + $0x2a0] sm:$0xff] }
  0x8a   :  { %4320 = vmatprep.mubr.msk.bf16.mxu1 %vm1215_vm1, %v591_v48  ;;  %v838_v37 = vmul.f32 %v5056_v6, %v703_v25  ;;  %v1097_v40 = vmax.f32 %v969_v20, 0.0  ;;  %v505_v41 = vmax.f32 %v377_v21, 0.0  ;;  %v506_v42 = vmax.f32 %v378_v22, 0.0  ;;  %v113_v48 = vld [vmem:[%s6752_s0 + $0x280] sm:$0xff]  ;;  %v709_v20 = vld [vmem:[%s6749_s1 + $0x2a8] sm:$0xff] }
  0x8b   :  { %v1096_v39 = vmax.f32 %v968_v3, 0.0  ;;  %v1098_v10 = vmax.f32 %v970_v28, 0.0  ;;  %v1099_v45 = vmax.f32 %v971_v32, 0.0  ;;  %v379_v46 = vadd.f32 %v5095_v11, %v244_v29  ;;  %v117_v25 = vld [vmem:[%s6752_s0 + $0x2a0] sm:$0xff]  ;;  %v118_v32 = vld [vmem:[%s6752_s0 + $0x2a8] sm:$0xff] }
  0x8c   :  { %v380_v47 = vadd.f32 %v5095_v11, %v245_v33  ;;  %v1186_v49 = vpack.c.bf16 %v1095_v31, %v1094_v27  ;;  %v972_v50 = vadd.f32 %v5080_v61, %v837_v36  ;;  %v246_v51 = vmul.f32 %v5069_v15, %v111_v38 }
  0x8d   :  { %v973_v55 = vadd.f32 %v5080_v61, %v838_v37  ;;  %v247_v56 = vmul.f32 %v5069_v15, %v112_v43  ;;  %v5389_v59 = vpack.c.bf16 %v1097_v40, %v1096_v39  ;;  %v5391_v60 = vpack.c.bf16 %v506_v42, %v505_v41 }
  0x8e   :  { %4191 = vmatmul.mubr.msk.bf16.gmra.mxu0 %vm1215_vm1, %v1183_v53  ;;  %v595_v53 = vpack.c.bf16 %v504_v35, %v503_v34  ;;  %v840_v63 = vmul.f32 %v5056_v6, %v705_v12  ;;  %v248_v0 = vmul.f32 %v5069_v15, %v113_v48  ;;  %v5398_v2 = vpack.c.bf16 %v1099_v45, %v1098_v10  ;;  %v119_v10 = vld [vmem:[%s6752_s0 + $0x2b0] sm:$0xff]  ;;  %v120_v48 = vld [vmem:[%s6752_s0 + $0x2b8] sm:$0xff] }
  0x8f   :  { %4194 = vmatprep.mubr.msk.bf16.mxu0 %vm1215_vm1, %v1184_v58  ;;  %v707_v58 = vld [vmem:[%s6749_s1 + $0x298] sm:$0xff]  ;;  %v507_v4 = vmax.f32 %v379_v46, 0.0  ;;  %v508_v5 = vmax.f32 %v380_v47, 0.0  ;;  %v249_v7 = vmul.f32 %v5069_v15, %v114_v52  ;;  %v1100_v9 = vmax.f32 %v972_v50, 0.0 }
  0x90   :  { %v381_v13 = vadd.f32 %v5095_v11, %v246_v51  ;;  %v841_v62 = vmul.f32 %v5056_v6, %v706_v57  ;;  %v842_v14 = vmul.f32 %v5056_v6, %v707_v58  ;;  %v1101_v17 = vmax.f32 %v973_v55, 0.0  ;;  %v713_v55 = vld [vmem:[%s6749_s1 + $0x2c8] sm:$0xff] }
  0x91   :  { %4321 = vmatmul.mubr.msk.bf16.gmra.mxu1 %vm1215_vm1, %v592_v54  ;;  %v839_v54 = vmul.f32 %v5056_v6, %v704_v44  ;;  %v382_v3 = vadd.f32 %v5095_v11, %v247_v56  ;;  %v975_v21 = vadd.f32 %v5080_v61, %v840_v63  ;;  %v383_v22 = vadd.f32 %v5095_v11, %v248_v0  ;;  %v711_v44 = vld [vmem:[%s6749_s1 + $0x2b8] sm:$0xff]  ;;  %v121_v63 = vld [vmem:[%s6752_s0 + $0x2c0] sm:$0xff] }
  0x92   :  { %4324 = vmatprep.mubr.msk.bf16.mxu1 %vm1215_vm1, %v593_v1  ;;  %v115_v1 = vld [vmem:[%s6752_s0 + $0x290] sm:$0xff]  ;;  %v384_v23 = vadd.f32 %v5095_v11, %v249_v7  ;;  %v251_v24 = vmul.f32 %v5069_v15, %v116_v8  ;;  %v597_v27 = vpack.c.bf16 %v508_v5, %v507_v4  ;;  %v976_v28 = vadd.f32 %v5080_v61, %v841_v62  ;;  %v122_v7 = vld [vmem:[%s6752_s0 + $0x2c8] sm:$0xff] }
  0x93   :  { %v974_v18 = vadd.f32 %v5080_v61, %v839_v54  ;;  %v250_v19 = vmul.f32 %v5069_v15, %v115_v1  ;;  %v977_v29 = vadd.f32 %v5080_v61, %v842_v14  ;;  %v843_v31 = vmul.f32 %v5056_v6, %v708_v16  ;;  %v714_v14 = vld [vmem:[%s6749_s1 + $0x2d0] sm:$0xff]  ;;  %v715_v16 = vld [vmem:[%s6749_s1 + $0x2d8] sm:$0xff] }
  0x94   :  { %v509_v33 = vmax.f32 %v381_v13, 0.0  ;;  %v844_v35 = vmul.f32 %v5056_v6, %v709_v20  ;;  %v5438_v36 = vpack.c.bf16 %v1101_v17, %v1100_v9  ;;  %v510_v37 = vmax.f32 %v382_v3, 0.0 }
  0x95   :  { %v385_v34 = vadd.f32 %v5095_v11, %v250_v19  ;;  %v1102_v38 = vmax.f32 %v974_v18, 0.0  ;;  %v252_v39 = vmul.f32 %v5069_v15, %v117_v25  ;;  %v1103_v40 = vmax.f32 %v975_v21, 0.0 }
  0x96   :  { %4195 = vmatmul.mubr.msk.bf16.gmra.mxu0 %vm1215_vm1, %v5344_v26  ;;  %v386_v26 = vadd.f32 %v5095_v11, %v251_v24  ;;  %v511_v41 = vmax.f32 %v383_v22, 0.0  ;;  %v512_v42 = vmax.f32 %v384_v23, 0.0  ;;  %v253_v43 = vmul.f32 %v5069_v15, %v118_v32 }
  0x97   :  { %4198 = vmatprep.mubr.msk.bf16.mxu0 %vm1215_vm1, %v1186_v49  ;;  %v1104_v45 = vmax.f32 %v976_v28, 0.0  ;;  %v1105_v46 = vmax.f32 %v977_v29, 0.0  ;;  %v978_v47 = vadd.f32 %v5080_v61, %v843_v31  ;;  %v979_v12 = vadd.f32 %v5080_v61, %v844_v35  ;;  %v712_v49 = vld [vmem:[%s6749_s1 + $0x2c0] sm:$0xff] }
  0x98   :  { %v513_v50 = vmax.f32 %v385_v34, 0.0  ;;  %v514_v51 = vmax.f32 %v386_v26, 0.0  ;;  %v387_v52 = vadd.f32 %v5095_v11, %v252_v39  ;;  %v598_v56 = vpack.c.bf16 %v510_v37, %v509_v33  ;;  %v716_v33 = vld [vmem:[%s6749_s1 + $0x2e0] sm:$0xff]  ;;  %v717_v34 = vld [vmem:[%s6749_s1 + $0x2e8] sm:$0xff] }
  0x99   :  { %4325 = vmatmul.mubr.msk.bf16.gmra.mxu1 %vm1215_vm1, %v5348_v30  ;;  %v710_v30 = vld [vmem:[%s6749_s1 + $0x2b0] sm:$0xff]  ;;  %v388_v54 = vadd.f32 %v5095_v11, %v253_v43  ;;  %v846_v57 = vmul.f32 %v5056_v6, %v711_v44  ;;  %v254_v58 = vmul.f32 %v5069_v15, %v119_v10  ;;  %v1190_v0 = vpack.c.bf16 %v1103_v40, %v1102_v38  ;;  %v125_v39 = vld [vmem:[%s6752_s0 + $0x2e0] sm:$0xff]  ;;  %v126_v43 = vld [vmem:[%s6752_s0 + $0x2e8] sm:$0xff] }
  0x9a   :  { %4328 = vmatprep.mubr.msk.bf16.mxu1 %vm1215_vm1, %v595_v53  ;;  %v845_v53 = vmul.f32 %v5056_v6, %v710_v30  ;;  %v5470_v1 = vpack.c.bf16 %v512_v42, %v511_v41  ;;  %v255_v4 = vmul.f32 %v5069_v15, %v120_v48  ;;  %v847_v5 = vmul.f32 %v5056_v6, %v712_v49 }
  0x9b   :  { %v5479_v8 = vpack.c.bf16 %v1105_v46, %v1104_v45  ;;  %v1106_v9 = vmax.f32 %v978_v47, 0.0  ;;  %v1107_v13 = vmax.f32 %v979_v12, 0.0  ;;  %v848_v62 = vmul.f32 %v5056_v6, %v713_v55  ;;  %v718_v47 = vld [vmem:[%s6749_s1 + $0x2f0] sm:$0xff]  ;;  %v719_v12 = vld [vmem:[%s6749_s1 + $0x2f8] sm:$0xff] }
  0x9c   :  { %v515_v17 = vmax.f32 %v387_v52, 0.0  ;;  %v980_v3 = vadd.f32 %v5080_v61, %v845_v53  ;;  %v256_v18 = vmul.f32 %v5069_v15, %v121_v63  ;;  %v516_v19 = vmax.f32 %v388_v54, 0.0 }
  0x9d   :  { %v981_v20 = vadd.f32 %v5080_v61, %v846_v57  ;;  %v389_v21 = vadd.f32 %v5095_v11, %v254_v58  ;;  %v257_v22 = vmul.f32 %v5069_v15, %v122_v7  ;;  %v982_v23 = vadd.f32 %v5080_v61, %v847_v5  ;;  %v127_v57 = vld [vmem:[%s6752_s0 + $0x2f0] sm:$0xff] }
  0x9e   :  { %4199 = vmatmul.mubr.msk.bf16.gmra.mxu0 %vm1215_vm1, %v5389_v59  ;;  %v5492_v59 = vpack.c.bf16 %v514_v51, %v513_v50  ;;  %v849_v24 = vmul.f32 %v5056_v6, %v714_v14  ;;  %v850_v25 = vmul.f32 %v5056_v6, %v715_v16  ;;  %v5510_v28 = vpack.c.bf16 %v1107_v13, %v1106_v9  ;;  %v721_v13 = vld [vmem:[%s6749_s1 + $0x308] sm:$0xff] }
  0x9f   :  { %4202 = vmatprep.mubr.msk.bf16.mxu0 %vm1215_vm1, %v5398_v2  ;;  %v390_v2 = vadd.f32 %v5095_v11, %v255_v4  ;;  %v983_v29 = vadd.f32 %v5080_v61, %v848_v62  ;;  %v391_v31 = vadd.f32 %v5095_v11, %v256_v18  ;;  %v392_v32 = vadd.f32 %v5095_v11, %v257_v22  ;;  %v720_v4 = vld [vmem:[%s6749_s1 + $0x300] sm:$0xff]  ;;  %v130_v22 = vld [vmem:[%s6752_s0 + $0x308] sm:$0xff] }
  0xa0   :  { %v1108_v26 = vmax.f32 %v980_v3, 0.0  ;;  %v984_v35 = vadd.f32 %v5080_v61, %v849_v24  ;;  %v985_v37 = vadd.f32 %v5080_v61, %v850_v25  ;;  %v5527_v30 = vpack.c.bf16 %v516_v19, %v515_v17  ;;  %v129_v3 = vld [vmem:[%s6752_s0 + $0x300] sm:$0xff]  ;;  %v722_v25 = vld [vmem:[%s6749_s1 + $0x310] sm:$0xff] }
  0xa1   :  { %4329 = vmatmul.mubr.msk.bf16.gmra.mxu1 %vm1215_vm1, %v5391_v60  ;;  %v123_v60 = vld [vmem:[%s6752_s0 + $0x2d0] sm:$0xff]  ;;  %v1109_v40 = vmax.f32 %v981_v20, 0.0  ;;  %v517_v41 = vmax.f32 %v389_v21, 0.0  ;;  %v518_v44 = vmax.f32 %v390_v2, 0.0  ;;  %v1110_v10 = vmax.f32 %v982_v23, 0.0 }
  0xa2   :  { %4332 = vmatprep.mubr.msk.bf16.mxu1 %vm1215_vm1, %v597_v27  ;;  %v124_v27 = vld [vmem:[%s6752_s0 + $0x2d8] sm:$0xff]  ;;  %v258_v38 = vmul.f32 %v5069_v15, %v123_v60  ;;  %v851_v45 = vmul.f32 %v5056_v6, %v716_v33  ;;  %v852_v46 = vmul.f32 %v5056_v6, %v717_v34  ;;  %v1111_v48 = vmax.f32 %v983_v29, 0.0 }
  0xa3   :  { %v259_v42 = vmul.f32 %v5069_v15, %v124_v27  ;;  %v519_v49 = vmax.f32 %v391_v31, 0.0  ;;  %v520_v50 = vmax.f32 %v392_v32, 0.0  ;;  %v260_v51 = vmul.f32 %v5069_v15, %v125_v39 }
  0xa4   :  { %v1112_v52 = vmax.f32 %v984_v35, 0.0  ;;  %v1113_v53 = vmax.f32 %v985_v37, 0.0  ;;  %v393_v55 = vadd.f32 %v5095_v11, %v258_v38  ;;  %v261_v54 = vmul.f32 %v5069_v15, %v126_v43  ;;  %v723_v37 = vld [vmem:[%s6749_s1 + $0x318] sm:$0xff]  ;;  %v131_v38 = vld [vmem:[%s6752_s0 + $0x310] sm:$0xff] }
  0xa5   :  { %v394_v58 = vadd.f32 %v5095_v11, %v259_v42  ;;  %v853_v63 = vmul.f32 %v5056_v6, %v718_v47  ;;  %v5564_v5 = vpack.c.bf16 %v518_v44, %v517_v41  ;;  %v986_v7 = vadd.f32 %v5080_v61, %v851_v45  ;;  %v132_v41 = vld [vmem:[%s6752_s0 + $0x318] sm:$0xff] }
  0xa6   :  { %4203 = vmatmul.mubr.msk.bf16.gmra.mxu0 %vm1215_vm1, %v5438_v36  ;;  %v128_v36 = vld [vmem:[%s6752_s0 + $0x2f8] sm:$0xff]  ;;  %v987_v9 = vadd.f32 %v5080_v61, %v852_v46  ;;  %v5572_v62 = vpack.c.bf16 %v1111_v48, %v1110_v10  ;;  %v396_v14 = vadd.f32 %v5095_v11, %v261_v54  ;;  %v262_v16 = vmul.f32 %v5069_v15, %v127_v57 }
  0xa7   :  { %4206 = vmatprep.mubr.msk.bf16.mxu0 %vm1215_vm1, %v1190_v0  ;;  %v854_v0 = vmul.f32 %v5056_v6, %v719_v12  ;;  %v263_v17 = vmul.f32 %v5069_v15, %v128_v36  ;;  %v5580_v18 = vpack.c.bf16 %v520_v50, %v519_v49  ;;  %v5582_v19 = vpack.c.bf16 %v1113_v53, %v1112_v52  ;;  %v133_v12 = vld [vmem:[%s6752_s0 + $0x320] sm:$0xff]  ;;  %v134_v52 = vld [vmem:[%s6752_s0 + $0x328] sm:$0xff]  ;;  %v726_v36 = vld [vmem:[%s6749_s1 + $0x330] sm:$0xff] }
  0xa8   :  { %v521_v20 = vmax.f32 %v393_v55, 0.0  ;;  %v855_v21 = vmul.f32 %v5056_v6, %v720_v4  ;;  %v522_v60 = vmax.f32 %v394_v58, 0.0  ;;  %v988_v2 = vadd.f32 %v5080_v61, %v853_v63  ;;  %v727_v58 = vld [vmem:[%s6749_s1 + $0x338] sm:$0xff] }
  0xa9   :  { %4333 = vmatmul.mubr.msk.bf16.gmra.mxu1 %vm1215_vm1, %v598_v56  ;;  %v5556_v56 = vpack.c.bf16 %v1109_v40, %v1108_v26  ;;  %v989_v23 = vadd.f32 %v5080_v61, %v854_v0  ;;  %v856_v24 = vmul.f32 %v5056_v6, %v721_v13  ;;  %v1114_v27 = vmax.f32 %v986_v7, 0.0 }
  0xaa   :  { %4336 = vmatprep.mubr.msk.bf16.mxu1 %vm1215_vm1, %v5470_v1  ;;  %v395_v1 = vadd.f32 %v5095_v11, %v260_v51  ;;  %v1115_v29 = vmax.f32 %v987_v9, 0.0  ;;  %v264_v32 = vmul.f32 %v5069_v15, %v129_v3  ;;  %v524_v33 = vmax.f32 %v396_v14, 0.0  ;;  %v135_v9 = vld [vmem:[%s6752_s0 + $0x330] sm:$0xff] }
  0xab   :  { %v397_v34 = vadd.f32 %v5095_v11, %v262_v16  ;;  %v398_v26 = vadd.f32 %v5095_v11, %v263_v17  ;;  %v265_v35 = vmul.f32 %v5069_v15, %v130_v22  ;;  %v991_v39 = vadd.f32 %v5080_v61, %v856_v24  ;;  %v136_v17 = vld [vmem:[%s6752_s0 + $0x338] sm:$0xff]  ;;  %v728_v24 = vld [vmem:[%s6749_s1 + $0x340] sm:$0xff] }
  0xac   :  { %v523_v31 = vmax.f32 %v395_v1, 0.0  ;;  %v857_v40 = vmul.f32 %v5056_v6, %v722_v25  ;;  %v5618_v42 = vpack.c.bf16 %v522_v60, %v521_v20  ;;  %v1116_v43 = vmax.f32 %v988_v2, 0.0 }
  0xad   :  { %v399_v44 = vadd.f32 %v5095_v11, %v264_v32  ;;  %v5624_v10 = vpack.c.bf16 %v1115_v29, %v1114_v27  ;;  %v400_v45 = vadd.f32 %v5095_v11, %v265_v35  ;;  %v858_v46 = vmul.f32 %v5056_v6, %v723_v37  ;;  %v729_v29 = vld [vmem:[%s6749_s1 + $0x348] sm:$0xff] }
  0xae   :  { %4207 = vmatmul.mubr.msk.bf16.gmra.mxu0 %vm1215_vm1, %v5479_v8  ;;  %v990_v8 = vadd.f32 %v5080_v61, %v855_v21  ;;  %v266_v47 = vmul.f32 %v5069_v15, %v131_v38  ;;  %v5635_v48 = vpack.c.bf16 %v524_v33, %v523_v31  ;;  %v525_v49 = vmax.f32 %v397_v34, 0.0  ;;  %v137_v31 = vld [vmem:[%s6752_s0 + $0x340] sm:$0xff] }
  0xaf   :  { %4210 = vmatprep.mubr.msk.bf16.mxu0 %vm1215_vm1, %v5510_v28  ;;  %v724_v28 = vld [vmem:[%s6749_s1 + $0x320] sm:$0xff]  ;;  %v526_v50 = vmax.f32 %v398_v26, 0.0  ;;  %v267_v51 = vmul.f32 %v5069_v15, %v132_v41  ;;  %v1119_v55 = vmax.f32 %v991_v39, 0.0  ;;  %v992_v54 = vadd.f32 %v5080_v61, %v857_v40  ;;  %v138_v26 = vld [vmem:[%s6752_s0 + $0x348] sm:$0xff]  ;;  %v730_v39 = vld [vmem:[%s6749_s1 + $0x350] sm:$0xff] }
  0xb0   :  { %v1118_v53 = vmax.f32 %v990_v8, 0.0  ;;  %v859_v57 = vmul.f32 %v5056_v6, %v724_v28  ;;  %v527_v0 = vmax.f32 %v399_v44, 0.0  ;;  %v268_v7 = vmul.f32 %v5069_v15, %v133_v12  ;;  %v731_v40 = vld [vmem:[%s6749_s1 + $0x358] sm:$0xff] }
  0xb1   :  { %4337 = vmatmul.mubr.msk.bf16.gmra.mxu1 %vm1215_vm1, %v5492_v59  ;;  %v1117_v59 = vmax.f32 %v989_v23, 0.0  ;;  %v528_v1 = vmax.f32 %v400_v45, 0.0  ;;  %v993_v13 = vadd.f32 %v5080_v61, %v858_v46  ;;  %v5658_v14 = vadd.f32 %v5095_v11, %v266_v47 }
  0xb2   :  { %4340 = vmatprep.mubr.msk.bf16.mxu1 %vm1215_vm1, %v5527_v30  ;;  %v725_v30 = vld [vmem:[%s6749_s1 + $0x328] sm:$0xff]  ;;  %v269_v16 = vmul.f32 %v5069_v15, %v134_v52  ;;  %v5666_v3 = vpack.c.bf16 %v526_v50, %v525_v49  ;;  %v402_v20 = vadd.f32 %v5095_v11, %v267_v51  ;;  %v861_v21 = vmul.f32 %v5056_v6, %v726_v36 }
  0xb3   :  { %v5649_v63 = vpack.c.bf16 %v1117_v59, %v1116_v43  ;;  %v860_v4 = vmul.f32 %v5056_v6, %v725_v30  ;;  %v862_v22 = vmul.f32 %v5056_v6, %v727_v58  ;;  %v5675_v60 = vpack.c.bf16 %v1119_v55, %v1118_v53  ;;  %v140_v30 = vld [vmem:[%s6752_s0 + $0x358] sm:$0xff]  ;;  %v5734_v53 = vld [vmem:[%s6751_s5] ss:$0 sm:$0xff]  ;;  %v733_v36 = vld [vmem:[%s6749_s1 + $0x368] sm:$0xff] }
  0xb4   :  { %v1120_v2 = vmax.f32 %v992_v54, 0.0  ;;  %v994_v23 = vadd.f32 %v5080_v61, %v859_v57  ;;  %v271_v27 = vmul.f32 %v5069_v15, %v136_v17  ;;  %v5694_v32 = vpack.c.bf16 %v528_v1, %v527_v0  ;;  %v5740_v54 = vld [vmem:[%s6753_s2] ss:$0 sm:$0xff] }
  0xb5   :  { %v995_v25 = vadd.f32 %v5080_v61, %v860_v4  ;;  %v1121_v33 = vmax.f32 %v993_v13, 0.0  ;;  %v996_v34 = vadd.f32 %v5080_v61, %v861_v21  ;;  %v530_v35 = vmax.f32 %v402_v20, 0.0  ;;  %v142_v20 = vld [vmem:[%s6752_s0 + $0x368] sm:$0xff]  ;;  %v734_v21 = vld [vmem:[%s6749_s1 + $0x370] sm:$0xff] }
  0xb6   :  { %4211 = vmatmul.mubr.msk.bf16.gmra.mxu0 %vm1215_vm1, %v5556_v56  ;;  %v270_v56 = vmul.f32 %v5069_v15, %v135_v9  ;;  %v997_v37 = vadd.f32 %v5080_v61, %v862_v22  ;;  %v863_v8 = vmul.f32 %v5056_v6, %v728_v24  ;;  %v1122_v41 = vmax.f32 %v994_v23, 0.0  ;;  %v139_v61 = vld [vmem:[%s6752_s0 + $0x350] sm:$0xff]  ;;  %v735_v22 = vld [vmem:[%s6749_s1 + $0x378] sm:$0xff] }
  0xb7   :  { %4214 = vmatprep.mubr.msk.bf16.mxu0 %vm1215_vm1, %v5572_v62  ;;  %v404_v62 = vadd.f32 %v5095_v11, %v269_v16  ;;  %v406_v43 = vadd.f32 %v5095_v11, %v271_v27  ;;  %v864_v59 = vmul.f32 %v5056_v6, %v729_v29  ;;  %v272_v44 = vmul.f32 %v5069_v15, %v137_v31  ;;  %v5725_v6 = vld [vmem:[%s6750_s3] ss:$0 sm:$0xff]  ;;  %v143_v29 = vld [vmem:[%s6752_s0 + $0x370] sm:$0xff]  ;;  %v144_v31 = vld [vmem:[%s6752_s0 + $0x378] sm:$0xff] }
  0xb8   :  { %v405_v38 = vadd.f32 %v5095_v11, %v270_v56  ;;  %v1123_v28 = vmax.f32 %v995_v25, 0.0  ;;  %v273_v47 = vmul.f32 %v5069_v15, %v138_v26  ;;  %v5720_v12 = vpack.c.bf16 %v1121_v33, %v1120_v2 }
  0xb9   :  { %4341 = vmatmul.mubr.msk.bf16.gmra.mxu1 %vm1215_vm1, %v5564_v5  ;;  %v403_v5 = vadd.f32 %v5095_v11, %v268_v7  ;;  %v532_v46 = vmax.f32 %v404_v62, 0.0  ;;  %v1124_v49 = vmax.f32 %v996_v34, 0.0  ;;  %v865_v50 = vmul.f32 %v5725_v6, %v730_v39 }
  0xba   :  { %4344 = vmatprep.mubr.msk.bf16.mxu1 %vm1215_vm1, %v5580_v18  ;;  %v529_v18 = vmax.f32 %v5658_v14, 0.0  ;;  %v866_v51 = vmul.f32 %v5725_v6, %v731_v40  ;;  %v1125_v15 = vmax.f32 %v997_v37, 0.0  ;;  %v533_v52 = vmax.f32 %v405_v38, 0.0  ;;  %v737_v40 = vld [vmem:[%s6749_s1 + $0x388] sm:$0xff] }
  0xbb   :  { %v531_v45 = vmax.f32 %v403_v5, 0.0  ;;  %v998_v55 = vadd.f32 %v5734_v53, %v863_v8  ;;  %v274_v57 = vmul.f32 %v5740_v54, %v139_v61  ;;  %v534_v58 = vmax.f32 %v406_v43, 0.0 }
  0xbc   :  { %v999_v0 = vadd.f32 %v5734_v53, %v864_v59  ;;  %v407_v4 = vadd.f32 %v5095_v11, %v272_v44  ;;  %v275_v7 = vmul.f32 %v5740_v54, %v140_v30  ;;  %v5758_v9 = vpack.c.bf16 %v530_v35, %v529_v18  ;;  %v141_v11 = vld [vmem:[%s6752_s0 + $0x360] sm:$0xff]  ;;  %v146_v30 = vld [vmem:[%s6752_s0 + $0x388] sm:$0xff] }
  0xbd   :  { %v5760_v1 = vpack.c.bf16 %v1123_v28, %v1122_v41  ;;  %v5762_v13 = vpack.c.bf16 %v532_v46, %v531_v45  ;;  %v1000_v14 = vadd.f32 %v5734_v53, %v865_v50  ;;  %v868_v17 = vmul.f32 %v5725_v6, %v733_v36  ;;  %v736_v35 = vld [vmem:[%s6749_s1 + $0x380] sm:$0xff]  ;;  %v739_v36 = vld [vmem:[%s6749_s1 + $0x398] sm:$0xff] }
  0xbe   :  { %4215 = vmatmul.mubr.msk.bf16.gmra.mxu0 %vm1215_vm1, %v5582_v19  ;;  %v732_v19 = vld [vmem:[%s6749_s1 + $0x360] sm:$0xff]  ;;  %v5786_v2 = vpack.c.bf16 %v1125_v15, %v1124_v49  ;;  %v1126_v23 = vmax.f32 %v998_v55, 0.0  ;;  %v5790_v25 = vpack.c.bf16 %v534_v58, %v533_v52  ;;  %v1127_v5 = vmax.f32 %v999_v0, 0.0  ;;  %v147_v58 = vld [vmem:[%s6752_s0 + $0x390] sm:$0xff]  ;;  %v148_v0 = vld [vmem:[%s6752_s0 + $0x398] sm:$0xff] }
  0xbf   :  { %4218 = vmatprep.mubr.msk.bf16.mxu0 %vm1215_vm1, %v5624_v10  ;;  %v867_v16 = vmul.f32 %v5725_v6, %v732_v19  ;;  %v535_v62 = vmax.f32 %v407_v4, 0.0  ;;  %v276_v27 = vmul.f32 %v5740_v54, %v141_v11  ;;  %v277_v18 = vmul.f32 %v5740_v54, %v142_v20 }
  0xc0   :  { %v869_v34 = vmul.f32 %v5725_v6, %v734_v21  ;;  %v870_v26 = vmul.f32 %v5725_v6, %v735_v22  ;;  %v1128_v37 = vmax.f32 %v1000_v14, 0.0  ;;  %v1003_v39 = vadd.f32 %v5734_v53, %v868_v17  ;;  %v740_v14 = vld [vmem:[%s6749_s1 + $0x3a0] sm:$0xff]  ;;  %v741_v21 = vld [vmem:[%s6749_s1 + $0x3a8] sm:$0xff] }
  0xc1   :  { %4345 = vmatmul.mubr.msk.bf16.gmra.mxu1 %vm1215_vm1, %v5618_v42  ;;  %v5767_v42 = vld [vmem:[%s6754_s4] ss:$0 sm:$0xff]  ;;  %v1002_v8 = vadd.f32 %v5734_v53, %v867_v16  ;;  %v278_v59 = vmul.f32 %v5740_v54, %v143_v29  ;;  %v279_v44 = vmul.f32 %v5740_v54, %v144_v31  ;;  %v5818_v61 = vpack.c.bf16 %v1127_v5, %v1126_v23 }
  0xc2   :  { %4348 = vmatprep.mubr.msk.bf16.mxu1 %vm1215_vm1, %v5635_v48  ;;  %v408_v10 = vadd.f32 %v5767_v42, %v273_v47  ;;  %v1001_v48 = vadd.f32 %v5734_v53, %v866_v51  ;;  %v409_v56 = vadd.f32 %v5767_v42, %v274_v57  ;;  %v410_v24 = vadd.f32 %v5767_v42, %v275_v7 }
  0xc3   :  { %v411_v28 = vadd.f32 %v5767_v42, %v276_v27  ;;  %v871_v45 = vmul.f32 %v5725_v6, %v736_v35  ;;  %v412_v46 = vadd.f32 %v5767_v42, %v277_v18  ;;  %v1005_v47 = vadd.f32 %v5734_v53, %v870_v26  ;;  %v5879_v18 = vld [vmem:[%s6755_s8] ss:$0 sm:$0xff] }
  0xc4   :  { %v536_v33 = vmax.f32 %v408_v10, 0.0  ;;  %v1129_v38 = vmax.f32 %v1001_v48, 0.0  ;;  %v537_v41 = vmax.f32 %v409_v56, 0.0  ;;  %v538_v43 = vmax.f32 %v410_v24, 0.0 }
  0xc5   :  { %v1130_v51 = vmax.f32 %v1002_v8, 0.0  ;;  %v1131_v15 = vmax.f32 %v1003_v39, 0.0  ;;  %v413_v55 = vadd.f32 %v5767_v42, %v278_v59  ;;  %v414_v57 = vadd.f32 %v5767_v42, %v279_v44 }
  0xc6   :  { %4219 = vmatmul.mubr.msk.bf16.gmra.mxu0 %vm1215_vm1, %v5649_v63  ;;  %v145_v63 = vld [vmem:[%s6752_s0 + $0x380] sm:$0xff]  ;;  %v5834_v49 = vpack.c.bf16 %v536_v33, %v535_v62  ;;  %v5836_v50 = vpack.c.bf16 %v1129_v38, %v1128_v37  ;;  %v5841_v52 = vpack.c.bf16 %v538_v43, %v537_v41  ;;  %v539_v4 = vmax.f32 %v411_v28, 0.0 }
  0xc7   :  { %4222 = vmatprep.mubr.msk.bf16.mxu0 %vm1215_vm1, %v5675_v60  ;;  %v872_v60 = vmul.f32 %v5725_v6, %v737_v40  ;;  %v280_v19 = vmul.f32 %v5740_v54, %v145_v63  ;;  %v1006_v7 = vadd.f32 %v5734_v53, %v871_v45  ;;  %v281_v11 = vmul.f32 %v5740_v54, %v146_v30 }
  0xc8   :  { %v540_v48 = vmax.f32 %v412_v46, 0.0  ;;  %v1133_v17 = vmax.f32 %v1005_v47, 0.0  ;;  %v5865_v22 = vpack.c.bf16 %v1131_v15, %v1130_v51  ;;  %v874_v23 = vmul.f32 %v5725_v6, %v739_v36  ;;  %v150_v36 = vld [vmem:[%s6752_s0 + $0x3a8] sm:$0xff] }
  0xc9   :  { %4349 = vmatmul.mubr.msk.bf16.gmra.mxu1 %vm1215_vm1, %v5666_v3  ;;  %v1004_v3 = vadd.f32 %v5734_v53, %v869_v34  ;;  %v1007_v10 = vadd.f32 %v5734_v53, %v872_v60  ;;  %v282_v56 = vmul.f32 %v5740_v54, %v147_v58  ;;  %v283_v24 = vmul.f32 %v5740_v54, %v148_v0  ;;  %v742_v58 = vld [vmem:[%s6749_s1 + $0x3b0] sm:$0xff] }
  0xca   :  { %4352 = vmatprep.mubr.msk.bf16.mxu1 %vm1215_vm1, %v5694_v32  ;;  %v738_v32 = vld [vmem:[%s6749_s1 + $0x390] sm:$0xff]  ;;  %v541_v62 = vmax.f32 %v413_v55, 0.0  ;;  %v542_v27 = vmax.f32 %v414_v57, 0.0  ;;  %v5873_v29 = vadd.f32 %v5767_v42, %v280_v19  ;;  %v875_v31 = vmul.f32 %v5725_v6, %v740_v14 }
  0xcb   :  { %v1132_v16 = vmax.f32 %v1004_v3, 0.0  ;;  %v873_v20 = vmul.f32 %v5725_v6, %v738_v32  ;;  %v1135_v34 = vmax.f32 %v1007_v10, 0.0  ;;  %v416_v26 = vadd.f32 %v5767_v42, %v281_v11 }
  0xcc   :  { %v876_v35 = vmul.f32 %v5725_v6, %v741_v21  ;;  %v5889_v8 = vpack.c.bf16 %v540_v48, %v539_v4  ;;  %v1009_v41 = vadd.f32 %v5734_v53, %v874_v23  ;;  %v417_v43 = vadd.f32 %v5767_v42, %v282_v56  ;;  %v743_v21 = vld [vmem:[%s6749_s1 + $0x3b8] sm:$0xff] }
  0xcd   :  { %v5891_v39 = vpack.c.bf16 %v1133_v17, %v1132_v16  ;;  %v418_v59 = vadd.f32 %v5767_v42, %v283_v24  ;;  %v1010_v44 = vadd.f32 %v5734_v53, %v875_v31  ;;  %v5902_v63 = vpack.c.bf16 %v542_v27, %v541_v62 }
  0xce   :  { %v4128_v5 = vpop.f32.mrf.mxu0  ;;  %4223 = vmatmul.mubr.msk.bf16.gmra.mxu0 %vm1215_vm1, %v5720_v12  ;;  %v1134_v12 = vmax.f32 %v1006_v7, 0.0  ;;  %v543_v46 = vmax.f32 %v5873_v29, 0.0  ;;  %v544_v60 = vmax.f32 %v416_v26, 0.0  ;;  %v1011_v30 = vadd.f32 %v5734_v53, %v876_v35 }
  0xcf   :  { %4226 = vmatprep.mubr.msk.bf16.mxu0 %vm1215_vm1, %v5760_v1  ;;  %v149_v1 = vld [vmem:[%s6752_s0 + $0x3a0] sm:$0xff]  ;;  %v1137_v4 = vmax.f32 %v1009_v41, 0.0  ;;  %v545_v7 = vmax.f32 %v417_v43, 0.0  ;;  %v546_v10 = vmax.f32 %v418_v59, 0.0  ;;  %v1138_v11 = vmax.f32 %v1010_v44, 0.0 }
  0xd0   :  { %v1446_v38 = vpop.f32.mrf.mxu0  ;;  %v5905_v47 = vpack.c.bf16 %v1135_v34, %v1134_v12  ;;  %v284_v51 = vmul.f32 %v5740_v54, %v149_v1  ;;  %v1139_v56 = vmax.f32 %v1011_v30, 0.0  ;;  %v285_v24 = vmul.f32 %v5740_v54, %v150_v36  ;;  %v151_v1 = vld [vmem:[%s6752_s0 + $0x3b0] sm:$0xff]  ;;  %v744_v41 = vld [vmem:[%s6749_s1 + $0x3c0] sm:$0xff] }
  0xd1   :  { %v4258_v33 = vpop.f32.mrf.mxu1  ;;  %4353 = vmatmul.mubr.msk.bf16.gmra.mxu1 %vm1215_vm1, %v5758_v9  ;;  %v1008_v9 = vadd.f32 %v5734_v53, %v873_v20  ;;  %v877_v62 = vmul.f32 %v5725_v6, %v742_v58  ;;  %v5942_v34 = vpack.c.bf16 %v546_v10, %v545_v7  ;;  %v878_v26 = vmul.f32 %v5725_v6, %v743_v21 }
  0xd2   :  { %v2195_v37 = vadd.f32 %v4258_v33, %v4128_v5  ;;  %4356 = vmatprep.mubr.msk.bf16.mxu1 %vm1215_vm1, %v5762_v13  ;;  %v4129_v45 = vpop.f32.mrf.mxu0  ;;  %v5928_v5 = vadd.f32 %v5767_v42, %v284_v51  ;;  %v5938_v33 = vpack.c.bf16 %v544_v60, %v543_v46  ;;  %v5959_v59 = vpack.c.bf16 %v1139_v56, %v1138_v11  ;;  %v745_v51 = vld [vmem:[%s6749_s1 + $0x3c8] sm:$0xff] }
  0xd3   :  { %v2186_v40 = vpop.f32.mrf.mxu1  ;;  %v1136_v19 = vmax.f32 %v1008_v9, 0.0  ;;  %v420_v44 = vadd.f32 %v5767_v42, %v285_v24  ;;  %v879_v58 = vmul.f32 %v5725_v6, %v744_v41 }
  0xd4   :  { %v2706_v13 = vadd.f32 %v5879_v18, %v2195_v37  ;;  %v2187_v28 = vadd.f32 %v2186_v40, %v1446_v38  ;;  %v1449_v57 = vpop.f32.mrf.mxu0  ;;  %v152_v40 = vld [vmem:[%s6752_s0 + $0x3b8] sm:$0xff] }
  0xd5   :  { %v4259_v3 = vpop.f32.mrf.mxu1  ;;  %v5940_v12 = vpack.c.bf16 %v1137_v4, %v1136_v19  ;;  %v286_v19 = vmul.f32 %v5740_v54, %v151_v1  ;;  %v287_v36 = vmul.f32 %v5740_v54, %v152_v40 }
  0xd6   :  { %v2834_v15 = vmax.f32 %v2706_v13, 0.0  ;;  %v2704_v32 = vadd.f32 %v5879_v18, %v2187_v28  ;;  %v2198_v55 = vadd.f32 %v4259_v3, %v4129_v45  ;;  %v4132_v20 = vpop.f32.mrf.mxu0  ;;  %4227 = vmatmul.mubr.msk.bf16.gmra.mxu0 %vm1215_vm1, %v5786_v2  ;;  %v547_v13 = vmax.f32 %v5928_v5, 0.0 }
  0xd7   :  { %v2189_v0 = vpop.f32.mrf.mxu1  ;;  %4230 = vmatprep.mubr.msk.bf16.mxu0 %vm1215_vm1, %v5818_v61  ;;  %v5964_v28 = vadd.f32 %v5734_v53, %v877_v62  ;;  %v421_v5 = vadd.f32 %v5767_v42, %v286_v19  ;;  %v422_v62 = vadd.f32 %v5767_v42, %v287_v36 }
  0xd8   :  { %v3868_v14 = vpack.c.bf16 %v2834_v15, %v2834_v15  ;;  %v2832_v48 = vmax.f32 %v2704_v32, 0.0  ;;  %v2707_v16 = vadd.f32 %v5879_v18, %v2198_v55  ;;  %v2190_v17 = vadd.f32 %v2189_v0, %v1449_v57  ;;  %v1462_v31 = vpop.f32.mrf.mxu0  ;;  %v153_v15 = vld [vmem:[%s6752_s0 + $0x3c0] sm:$0xff]  ;;  %v154_v32 = vld [vmem:[%s6752_s0 + $0x3c8] sm:$0xff] }
  0xd9   :  { %v4262_v23 = vpop.f32.mrf.mxu1  ;;  %4357 = vmatmul.mubr.msk.bf16.gmra.mxu1 %vm1215_vm1, %v5790_v25  ;;  %v5981_v57 = vadd.f32 %v5734_v53, %v878_v26  ;;  %v1140_v24 = vmax.f32 %v5964_v28, 0.0  ;;  %v549_v28 = vmax.f32 %v421_v5, 0.0 }
  0xda   :  { %3475 = vst.msk [vmem:[%s6756_s9 + $0x8] sm:$0xf] %vm3472_vm2, %v3868_v14  ;;  %v3866_v2 = vpack.c.bf16 %v2832_v48, %v2832_v48  ;;  %v2835_v27 = vmax.f32 %v2707_v16, 0.0  ;;  %v2705_v25 = vadd.f32 %v5879_v18, %v2190_v17  ;;  %v2211_v29 = vadd.f32 %v4262_v23, %v4132_v20  ;;  %4360 = vmatprep.mubr.msk.bf16.mxu1 %vm1215_vm1, %v5834_v49  ;;  %v4133_v49 = vpop.f32.mrf.mxu0 }
  0xdb   :  { %v2202_v61 = vpop.f32.mrf.mxu1  ;;  %v548_v48 = vmax.f32 %v420_v44, 0.0  ;;  %v880_v16 = vmul.f32 %v5725_v6, %v745_v51  ;;  %v288_v17 = vmul.f32 %v5740_v54, %v153_v15  ;;  %v289_v20 = vmul.f32 %v5740_v54, %v154_v32  ;;  %v747_v32 = vld [vmem:[%s6749_s1 + $0x3d8] sm:$0xff] }
  0xdc   :  { %3473 = vst.msk [vmem:[%s6756_s9] sm:$0xf] %vm3472_vm2, %v3866_v2  ;;  %v3869_v35 = vpack.c.bf16 %v2835_v27, %v2835_v27  ;;  %v2833_v37 = vmax.f32 %v2705_v25, 0.0  ;;  %v2710_v38 = vadd.f32 %v5879_v18, %v2211_v29  ;;  %v2203_v9 = vadd.f32 %v2202_v61, %v1462_v31  ;;  %v1465_v30 = vpop.f32.mrf.mxu0 }
  0xdd   :  { %v4263_v43 = vpop.f32.mrf.mxu1  ;;  %v6011_v2 = vadd.f32 %v5734_v53, %v879_v58  ;;  %v6018_v26 = vpack.c.bf16 %v548_v48, %v547_v13  ;;  %v1141_v13 = vmax.f32 %v5981_v57, 0.0 }
  0xde   :  { %3476 = vst.msk [vmem:[%s6756_s9 + $0xc] sm:$0xf] %vm3472_vm2, %v3869_v35  ;;  %v3867_v45 = vpack.c.bf16 %v2833_v37, %v2833_v37  ;;  %v2838_v46 = vmax.f32 %v2710_v38, 0.0  ;;  %v2708_v3 = vadd.f32 %v5879_v18, %v2203_v9  ;;  %v2214_v60 = vadd.f32 %v4263_v43, %v4133_v49  ;;  %v4136_v11 = vpop.f32.mrf.mxu0  ;;  %4231 = vmatmul.mubr.msk.bf16.gmra.mxu0 %vm1215_vm1, %v5836_v50  ;;  %v746_v43 = vld [vmem:[%s6749_s1 + $0x3d0] sm:$0xff] }
  0xdf   :  { %v2205_v55 = vpop.f32.mrf.mxu1  ;;  %4234 = vmatprep.mubr.msk.bf16.mxu0 %vm1215_vm1, %v5865_v22  ;;  %v1015_v35 = vadd.f32 %v5734_v53, %v880_v16  ;;  %v423_v37 = vadd.f32 %v5767_v42, %v288_v17  ;;  %v424_v38 = vadd.f32 %v5767_v42, %v289_v20  ;;  %v882_v16 = vmul.f32 %v5725_v6, %v747_v32 }
  0xe0   :  { %3474 = vst.msk [vmem:[%s6756_s9 + $0x4] sm:$0xf] %vm3472_vm2, %v3867_v45  ;;  %v3872_v0 = vpack.c.bf16 %v2838_v46, %v2838_v46  ;;  %v2836_v4 = vmax.f32 %v2708_v3, 0.0  ;;  %v2711_v7 = vadd.f32 %v5879_v18, %v2214_v60  ;;  %v2206_v10 = vadd.f32 %v2205_v55, %v1465_v30  ;;  %v1478_v56 = vpop.f32.mrf.mxu0  ;;  %v155_v55 = vld [vmem:[%s6752_s0 + $0x3d0] sm:$0xff] }
  0xe1   :  { %v4266_v14 = vpop.f32.mrf.mxu1  ;;  %4361 = vmatmul.mubr.msk.bf16.gmra.mxu1 %vm1215_vm1, %v5841_v52  ;;  %v550_v45 = vmax.f32 %v422_v62, 0.0  ;;  %v1142_v46 = vmax.f32 %v6011_v2, 0.0  ;;  %v1143_v19 = vmax.f32 %v1015_v35, 0.0  ;;  %v551_v36 = vmax.f32 %v423_v37, 0.0  ;;  %v158_v35 = vld [vmem:[%s6752_s0 + $0x3e8] sm:$0xff] }
  0xe2   :  { %3479 = vst.msk [vmem:[%s6756_s9 + $0x18] sm:$0xf] %vm3472_vm2, %v3872_v0  ;;  %v3870_v50 = vpack.c.bf16 %v2836_v4, %v2836_v4  ;;  %v2839_v21 = vmax.f32 %v2711_v7, 0.0  ;;  %v2709_v23 = vadd.f32 %v5879_v18, %v2206_v10  ;;  %v2227_v52 = vadd.f32 %v4266_v14, %v4136_v11  ;;  %4364 = vmatprep.mubr.msk.bf16.mxu1 %vm1215_vm1, %v5889_v8  ;;  %v4137_v31 = vpop.f32.mrf.mxu0 }
  0xe3   :  { %v2218_v22 = vpop.f32.mrf.mxu1  ;;  %v552_v58 = vmax.f32 %v424_v38, 0.0  ;;  %v6061_v14 = vpack.c.bf16 %v1141_v13, %v1140_v24  ;;  %v6063_v48 = vpack.c.bf16 %v550_v45, %v549_v28  ;;  %v290_v17 = vmul.f32 %v5740_v54, %v155_v55 }
  0xe4   :  { %3477 = vst.msk [vmem:[%s6756_s9 + $0x10] sm:$0xf] %vm3472_vm2, %v3870_v50  ;;  %v3873_v27 = vpack.c.bf16 %v2839_v21, %v2839_v21  ;;  %v2837_v25 = vmax.f32 %v2709_v23, 0.0  ;;  %v2714_v29 = vadd.f32 %v5879_v18, %v2227_v52  ;;  %v2219_v8 = vadd.f32 %v2218_v22, %v1478_v56  ;;  %v1481_v41 = vpop.f32.mrf.mxu0  ;;  %v748_v52 = vld [vmem:[%s6749_s1 + $0x3e0] sm:$0xff]  ;;  %v749_v56 = vld [vmem:[%s6749_s1 + $0x3e8] sm:$0xff] }
  0xe5   :  { %v4267_v61 = vpop.f32.mrf.mxu1  ;;  %v6078_v24 = vpack.c.bf16 %v1143_v19, %v1142_v46  ;;  %v6080_v5 = vpack.c.bf16 %v552_v58, %v551_v36  ;;  %v6098_v38 = vadd.f32 %v5734_v53, %v882_v16 }
  0xe6   :  { %3480 = vst.msk [vmem:[%s6756_s9 + $0x1c] sm:$0xf] %vm3472_vm2, %v3873_v27  ;;  %v3871_v9 = vpack.c.bf16 %v2837_v25, %v2837_v25  ;;  %v2842_v49 = vmax.f32 %v2714_v29, 0.0  ;;  %v2712_v1 = vadd.f32 %v5879_v18, %v2219_v8  ;;  %v2230_v40 = vadd.f32 %v4267_v61, %v4137_v31  ;;  %v4140_v15 = vpop.f32.mrf.mxu0  ;;  %4235 = vmatmul.mubr.msk.bf16.gmra.mxu0 %vm1215_vm1, %v5891_v39  ;;  %v157_v61 = vld [vmem:[%s6752_s0 + $0x3e0] sm:$0xff] }
  0xe7   :  { %v2221_v44 = vpop.f32.mrf.mxu1  ;;  %4238 = vmatprep.mubr.msk.bf16.mxu0 %vm1215_vm1, %v5905_v47  ;;  %v881_v39 = vmul.f32 %v5725_v6, %v746_v43  ;;  %v292_v46 = vmul.f32 %v5740_v54, %v157_v61  ;;  %v1145_v32 = vmax.f32 %v6098_v38, 0.0 }
  0xe8   :  { %3478 = vst.msk [vmem:[%s6756_s9 + $0x14] sm:$0xf] %vm3472_vm2, %v3871_v9  ;;  %v3876_v3 = vpack.c.bf16 %v2842_v49, %v2842_v49  ;;  %v2840_v60 = vmax.f32 %v2712_v1, 0.0  ;;  %v2715_v30 = vadd.f32 %v5879_v18, %v2230_v40  ;;  %v2222_v51 = vadd.f32 %v2221_v44, %v1481_v41  ;;  %v1494_v11 = vpop.f32.mrf.mxu0 }
  0xe9   :  { %v4270_v57 = vpop.f32.mrf.mxu1  ;;  %4365 = vmatmul.mubr.msk.bf16.gmra.mxu1 %vm1215_vm1, %v5902_v63  ;;  %v156_v63 = vld [vmem:[%s6752_s0 + $0x3d8] sm:$0xff]  ;;  %v6083_v62 = vadd.f32 %v5734_v53, %v881_v39  ;;  %v6101_v9 = vadd.f32 %v5767_v42, %v290_v17  ;;  %v883_v49 = vmul.f32 %v5725_v6, %v748_v52  ;;  %v884_v1 = vmul.f32 %v5725_v6, %v749_v56 }
  0xea   :  { %3483 = vst.msk [vmem:[%s6756_s9 + $0x28] sm:$0xf] %vm3472_vm2, %v3876_v3  ;;  %v3874_v0 = vpack.c.bf16 %v2840_v60, %v2840_v60  ;;  %v2843_v4 = vmax.f32 %v2715_v30, 0.0  ;;  %v2713_v7 = vadd.f32 %v5879_v18, %v2222_v51  ;;  %v2243_v10 = vadd.f32 %v4270_v57, %v4140_v15  ;;  %4368 = vmatprep.mubr.msk.bf16.mxu1 %vm1215_vm1, %v5938_v33  ;;  %v4141_v23 = vpop.f32.mrf.mxu0 }
  0xeb   :  { %v2234_v47 = vpop.f32.mrf.mxu1  ;;  %v291_v2 = vmul.f32 %v5740_v54, %v156_v63  ;;  %v293_v3 = vmul.f32 %v5740_v54, %v158_v35  ;;  %v1144_v15 = vmax.f32 %v6083_v62, 0.0  ;;  %v1018_v55 = vadd.f32 %v5734_v53, %v883_v49 }
  0xec   :  { %3481 = vst.msk [vmem:[%s6756_s9 + $0x20] sm:$0xf] %vm3472_vm2, %v3874_v0  ;;  %v3877_v20 = vpack.c.bf16 %v2843_v4, %v2843_v4  ;;  %v2841_v33 = vmax.f32 %v2713_v7, 0.0  ;;  %v2718_v50 = vadd.f32 %v5879_v18, %v2243_v10  ;;  %v2235_v21 = vadd.f32 %v2234_v47, %v1494_v11  ;;  %v1497_v31 = vpop.f32.mrf.mxu0  ;;  %v750_v0 = vld [vmem:[%s6749_s1 + $0x3f0] sm:$0xff]  ;;  %v751_v4 = vld [vmem:[%s6749_s1 + $0x3f8] sm:$0xff] }
  0xed   :  { %v4271_v22 = vpop.f32.mrf.mxu1  ;;  %v6117_v45 = vadd.f32 %v5767_v42, %v291_v2  ;;  %v1019_v57 = vadd.f32 %v5734_v53, %v884_v1  ;;  %v553_v10 = vmax.f32 %v6101_v9, 0.0  ;;  %v427_v63 = vadd.f32 %v5767_v42, %v292_v46 }
  0xee   :  { %3484 = vst.msk [vmem:[%s6756_s9 + $0x2c] sm:$0xf] %vm3472_vm2, %v3877_v20  ;;  %v3875_v27 = vpack.c.bf16 %v2841_v33, %v2841_v33  ;;  %v2846_v25 = vmax.f32 %v2718_v50, 0.0  ;;  %v2716_v29 = vadd.f32 %v5879_v18, %v2235_v21  ;;  %v2246_v8 = vadd.f32 %v4271_v22, %v4141_v23  ;;  %v4144_v13 = vpop.f32.mrf.mxu0  ;;  %4239 = vmatmul.mubr.msk.bf16.gmra.mxu0 %vm1215_vm1, %v5940_v12  ;;  %v159_v21 = vld [vmem:[%s6752_s0 + $0x3f0] sm:$0xff]  ;;  %v160_v23 = vld [vmem:[%s6752_s0 + $0x3f8] sm:$0xff] }
  0xef   :  { %v2237_v37 = vpop.f32.mrf.mxu1  ;;  %4242 = vmatprep.mubr.msk.bf16.mxu0 %vm1215_vm1, %v5959_v59  ;;  %v554_v11 = vmax.f32 %v6117_v45, 0.0  ;;  %v428_v47 = vadd.f32 %v5767_v42, %v293_v3  ;;  %v1146_v56 = vmax.f32 %v1018_v55, 0.0  ;;  %v1147_v22 = vmax.f32 %v1019_v57, 0.0 }
  0xf0   :  { %3482 = vst.msk [vmem:[%s6756_s9 + $0x24] sm:$0xf] %vm3472_vm2, %v3875_v27  ;;  %v3880_v40 = vpack.c.bf16 %v2846_v25, %v2846_v25  ;;  %v2844_v41 = vmax.f32 %v2716_v29, 0.0  ;;  %v2719_v43 = vadd.f32 %v5879_v18, %v2246_v8  ;;  %v2238_v44 = vadd.f32 %v2237_v37, %v1497_v31  ;;  %v1510_v51 = vpop.f32.mrf.mxu0 }
  0xf1   :  { %v4274_v28 = vpop.f32.mrf.mxu1  ;;  %4369 = vmatmul.mubr.msk.bf16.gmra.mxu1 %vm1215_vm1, %v5942_v34  ;;  %v885_v62 = vmul.f32 %v5725_v6, %v750_v0  ;;  %v886_v2 = vmul.f32 %v5725_v6, %v751_v4  ;;  %v555_v6 = vmax.f32 %v427_v63, 0.0  ;;  %v556_v35 = vmax.f32 %v428_v47, 0.0 }
  0xf2   :  { %3487 = vst.msk [vmem:[%s6756_s9 + $0x38] sm:$0xf] %vm3472_vm2, %v3880_v40  ;;  %v3878_v12 = vpack.c.bf16 %v2844_v41, %v2844_v41  ;;  %v2847_v60 = vmax.f32 %v2719_v43, 0.0  ;;  %v2717_v30 = vadd.f32 %v5879_v18, %v2238_v44  ;;  %v2259_v34 = vadd.f32 %v4274_v28, %v4144_v13  ;;  %4372 = vmatprep.mubr.msk.bf16.mxu1 %vm1215_vm1, %v6018_v26  ;;  %v4145_v26 = vpop.f32.mrf.mxu0 }
  0xf3   :  { %v2250_v59 = vpop.f32.mrf.mxu1  ;;  %v294_v37 = vmul.f32 %v5740_v54, %v159_v21  ;;  %v295_v38 = vmul.f32 %v5740_v54, %v160_v23  ;;  %v1211_v40 = vpack.c.bf16 %v1145_v32, %v1144_v15  ;;  %v620_v41 = vpack.c.bf16 %v554_v11, %v553_v10 }
  0xf4   :  { %3485 = vst.msk [vmem:[%s6756_s9 + $0x30] sm:$0xf] %vm3472_vm2, %v3878_v12  ;;  %v3881_v19 = vpack.c.bf16 %v2847_v60, %v2847_v60  ;;  %v2845_v36 = vmax.f32 %v2717_v30, 0.0  ;;  %v2722_v58 = vadd.f32 %v5879_v18, %v2259_v34  ;;  %v2251_v39 = vadd.f32 %v2250_v59, %v1510_v51  ;;  %v1513_v50 = vpop.f32.mrf.mxu0 }
  0xf5   :  { %v4275_v7 = vpop.f32.mrf.mxu1  ;;  %v1020_v43 = vadd.f32 %v5734_v53, %v885_v62  ;;  %v1021_v54 = vadd.f32 %v5734_v53, %v886_v2  ;;  %v621_v12 = vpack.c.bf16 %v556_v35, %v555_v6  ;;  %v429_v60 = vadd.f32 %v5767_v42, %v294_v37 }
  0xf6   :  { %3488 = vst.msk [vmem:[%s6756_s9 + $0x3c] sm:$0xf] %vm3472_vm2, %v3881_v19  ;;  %v3879_v16 = vpack.c.bf16 %v2845_v36, %v2845_v36  ;;  %v2850_v17 = vmax.f32 %v2722_v58, 0.0  ;;  %v2720_v20 = vadd.f32 %v5879_v18, %v2251_v39  ;;  %v2262_v33 = vadd.f32 %v4275_v7, %v4145_v26  ;;  %v4148_v31 = vpop.f32.mrf.mxu0  ;;  %4243 = vmatmul.mubr.msk.bf16.gmra.mxu0 %vm1215_vm1, %v6061_v14 }
  0xf7   :  { %v2253_v52 = vpop.f32.mrf.mxu1  ;;  %4246 = vmatprep.mubr.msk.bf16.mxu0 %vm1215_vm1, %v6078_v24  ;;  %v430_v30 = vadd.f32 %v5767_v42, %v295_v38  ;;  %v1148_v55 = vmax.f32 %v1020_v43, 0.0  ;;  %v1149_v57 = vmax.f32 %v1021_v54, 0.0  ;;  %v557_v0 = vmax.f32 %v429_v60, 0.0 }
  0xf8   :  { %3486 = vst.msk [vmem:[%s6756_s9 + $0x34] sm:$0xf] %vm3472_vm2, %v3879_v16  ;;  %v3884_v27 = vpack.c.bf16 %v2850_v17, %v2850_v17  ;;  %v2848_v25 = vmax.f32 %v2720_v20, 0.0  ;;  %v2723_v29 = vadd.f32 %v5879_v18, %v2262_v33  ;;  %v2254_v8 = vadd.f32 %v2253_v52, %v1513_v50 }
  0xf9   :  { %v4278_v61 = vpop.f32.mrf.mxu1  ;;  %4373 = vmatmul.mubr.msk.bf16.gmra.mxu1 %vm1215_vm1, %v6063_v48  ;;  %v1526_v48 = vpop.f32.mrf.mxu0  ;;  %v558_v4 = vmax.f32 %v430_v30, 0.0  ;;  %v1213_v17 = vpack.c.bf16 %v1149_v57, %v1148_v55 }
  0xfa   :  { %3491 = vst.msk [vmem:[%s6756_s9 + $0x48] sm:$0xf] %vm3472_vm2, %v3884_v27  ;;  %v3882_v9 = vpack.c.bf16 %v2848_v25, %v2848_v25  ;;  %v2851_v14 = vmax.f32 %v2723_v29, 0.0  ;;  %v2721_v49 = vadd.f32 %v5879_v18, %v2254_v8  ;;  %v2275_v1 = vadd.f32 %v4278_v61, %v4148_v31  ;;  %4376 = vmatprep.mubr.msk.bf16.mxu1 %vm1215_vm1, %v6080_v5 }
  0xfb   :  { %v2266_v24 = vpop.f32.mrf.mxu1  ;;  %v4149_v46 = vpop.f32.mrf.mxu0  ;;  %v1212_v5 = vpack.c.bf16 %v1147_v22, %v1146_v56  ;;  %v622_v56 = vpack.c.bf16 %v558_v4, %v557_v0 }
  0xfc   :  { %3489 = vst.msk [vmem:[%s6756_s9 + $0x40] sm:$0xf] %vm3472_vm2, %v3882_v9  ;;  %v3885_v44 = vpack.c.bf16 %v2851_v14, %v2851_v14  ;;  %v2849_v13 = vmax.f32 %v2721_v49, 0.0  ;;  %v2726_v28 = vadd.f32 %v5879_v18, %v2275_v1  ;;  %v2267_v45 = vadd.f32 %v2266_v24, %v1526_v48 }
  0xfd   :  { %v4279_v3 = vpop.f32.mrf.mxu1  ;;  %v1529_v15 = vpop.f32.mrf.mxu0 }
  0xfe   :  { %3492 = vst.msk [vmem:[%s6756_s9 + $0x4c] sm:$0xf] %vm3472_vm2, %v3885_v44  ;;  %v3883_v53 = vpack.c.bf16 %v2849_v13, %v2849_v13  ;;  %v2854_v34 = vmax.f32 %v2726_v28, 0.0  ;;  %v2724_v51 = vadd.f32 %v5879_v18, %v2267_v45  ;;  %v2278_v59 = vadd.f32 %v4279_v3, %v4149_v46  ;;  %4247 = vmatmul.mubr.msk.bf16.gmra.mxu0 %vm1215_vm1, %v1211_v40 }
  0xff   :  { %v2269_v32 = vpop.f32.mrf.mxu1  ;;  %v4152_v39 = vpop.f32.mrf.mxu0  ;;  %4250 = vmatprep.mubr.msk.bf16.mxu0 %vm1215_vm1, %v1212_v5 }
 0x100   :  { %3490 = vst.msk [vmem:[%s6756_s9 + $0x44] sm:$0xf] %vm3472_vm2, %v3883_v53  ;;  %v3888_v42 = vpack.c.bf16 %v2854_v34, %v2854_v34  ;;  %v2852_v19 = vmax.f32 %v2724_v51, 0.0  ;;  %v2727_v36 = vadd.f32 %v5879_v18, %v2278_v59  ;;  %v2270_v58 = vadd.f32 %v2269_v32, %v1529_v15 }
 0x101   :  { %v4282_v26 = vpop.f32.mrf.mxu1  ;;  %4377 = vmatmul.mubr.msk.bf16.gmra.mxu1 %vm1215_vm1, %v620_v41  ;;  %v1542_v47 = vpop.f32.mrf.mxu0 }
 0x102   :  { %3495 = vst.msk [vmem:[%s6756_s9 + $0x58] sm:$0xf] %vm3472_vm2, %v3888_v42  ;;  %v3886_v7 = vpack.c.bf16 %v2852_v19, %v2852_v19  ;;  %v2855_v10 = vmax.f32 %v2727_v36, 0.0  ;;  %v2725_v11 = vadd.f32 %v5879_v18, %v2270_v58  ;;  %v2291_v63 = vadd.f32 %v4282_v26, %v4152_v39  ;;  %4380 = vmatprep.mubr.msk.bf16.mxu1 %vm1215_vm1, %v621_v12 }
 0x103   :  { %v2282_v16 = vpop.f32.mrf.mxu1  ;;  %v4153_v23 = vpop.f32.mrf.mxu0 }
 0x104   :  { %3493 = vst.msk [vmem:[%s6756_s9 + $0x50] sm:$0xf] %vm3472_vm2, %v3886_v7  ;;  %v3889_v20 = vpack.c.bf16 %v2855_v10, %v2855_v10  ;;  %v2853_v33 = vmax.f32 %v2725_v11, 0.0  ;;  %v2730_v50 = vadd.f32 %v5879_v18, %v2291_v63  ;;  %v2283_v21 = vadd.f32 %v2282_v16, %v1542_v47 }
 0x105   :  { %v4283_v52 = vpop.f32.mrf.mxu1  ;;  %v1545_v25 = vpop.f32.mrf.mxu0 }
 0x106   :  { %3496 = vst.msk [vmem:[%s6756_s9 + $0x5c] sm:$0xf] %vm3472_vm2, %v3889_v20  ;;  %v3887_v22 = vpack.c.bf16 %v2853_v33, %v2853_v33  ;;  %v2858_v62 = vmax.f32 %v2730_v50, 0.0  ;;  %v2728_v2 = vadd.f32 %v5879_v18, %v2283_v21  ;;  %v2294_v27 = vadd.f32 %v4283_v52, %v4153_v23  ;;  %4251 = vmatmul.mubr.msk.bf16.gmra.mxu0 %vm1215_vm1, %v1213_v17 }
 0x107   :  { %v2285_v29 = vpop.f32.mrf.mxu1  ;;  %v4156_v35 = vpop.f32.mrf.mxu0 }
 0x108   :  { %3494 = vst.msk [vmem:[%s6756_s9 + $0x54] sm:$0xf] %vm3472_vm2, %v3887_v22  ;;  %v3892_v8 = vpack.c.bf16 %v2858_v62, %v2858_v62  ;;  %v2856_v31 = vmax.f32 %v2728_v2, 0.0  ;;  %v2731_v61 = vadd.f32 %v5879_v18, %v2294_v27  ;;  %v2286_v6 = vadd.f32 %v2285_v29, %v1545_v25 }
 0x109   :  { %v4286_v37 = vpop.f32.mrf.mxu1  ;;  %4381 = vmatmul.mubr.msk.bf16.gmra.mxu1 %vm1215_vm1, %v622_v56  ;;  %v1558_v1 = vpop.f32.mrf.mxu0 }
 0x10a   :  { %3499 = vst.msk [vmem:[%s6756_s9 + $0x68] sm:$0xf] %vm3472_vm2, %v3892_v8  ;;  %v3890_v38 = vpack.c.bf16 %v2856_v31, %v2856_v31  ;;  %v2859_v9 = vmax.f32 %v2731_v61, 0.0  ;;  %v2729_v14 = vadd.f32 %v5879_v18, %v2286_v6  ;;  %v2307_v49 = vadd.f32 %v4286_v37, %v4156_v35 }
 0x10b   :  { %v2298_v48 = vpop.f32.mrf.mxu1  ;;  %v4157_v54 = vpop.f32.mrf.mxu0 }
 0x10c   :  { %3497 = vst.msk [vmem:[%s6756_s9 + $0x60] sm:$0xf] %vm3472_vm2, %v3890_v38  ;;  %v3893_v24 = vpack.c.bf16 %v2859_v9, %v2859_v9  ;;  %v2857_v40 = vmax.f32 %v2729_v14, 0.0  ;;  %v2734_v41 = vadd.f32 %v5879_v18, %v2307_v49  ;;  %v2299_v43 = vadd.f32 %v2298_v48, %v1558_v1 }
 0x10d   :  { %v4287_v44 = vpop.f32.mrf.mxu1  ;;  %v1561_v3 = vpop.f32.mrf.mxu0 }
 0x10e   :  { %3500 = vst.msk [vmem:[%s6756_s9 + $0x6c] sm:$0xf] %vm3472_vm2, %v3893_v24  ;;  %v3891_v13 = vpack.c.bf16 %v2857_v40, %v2857_v40  ;;  %v2862_v28 = vmax.f32 %v2734_v41, 0.0  ;;  %v2732_v45 = vadd.f32 %v5879_v18, %v2299_v43  ;;  %v2310_v46 = vadd.f32 %v4287_v44, %v4157_v54 }
 0x10f   :  { %v2301_v5 = vpop.f32.mrf.mxu1  ;;  %v4160_v34 = vpop.f32.mrf.mxu0 }
 0x110   :  { %3498 = vst.msk [vmem:[%s6756_s9 + $0x64] sm:$0xf] %vm3472_vm2, %v3891_v13  ;;  %v3896_v12 = vpack.c.bf16 %v2862_v28, %v2862_v28  ;;  %v2860_v60 = vmax.f32 %v2732_v45, 0.0  ;;  %v2735_v30 = vadd.f32 %v5879_v18, %v2310_v46  ;;  %v2302_v53 = vadd.f32 %v2301_v5, %v1561_v3 }
 0x111   :  { %v4290_v51 = vpop.f32.mrf.mxu1  ;;  %v1574_v57 = vpop.f32.mrf.mxu0 }
 0x112   :  { %3503 = vst.msk [vmem:[%s6756_s9 + $0x78] sm:$0xf] %vm3472_vm2, %v3896_v12  ;;  %v3894_v59 = vpack.c.bf16 %v2860_v60, %v2860_v60  ;;  %v2863_v15 = vmax.f32 %v2735_v30, 0.0  ;;  %v2733_v32 = vadd.f32 %v5879_v18, %v2302_v53  ;;  %v2323_v55 = vadd.f32 %v4290_v51, %v4160_v34 }
 0x113   :  { %v2314_v42 = vpop.f32.mrf.mxu1  ;;  %v4161_v26 = vpop.f32.mrf.mxu0 }
 0x114   :  { %3501 = vst.msk [vmem:[%s6756_s9 + $0x70] sm:$0xf] %vm3472_vm2, %v3894_v59  ;;  %v3897_v19 = vpack.c.bf16 %v2863_v15, %v2863_v15  ;;  %v2861_v36 = vmax.f32 %v2733_v32, 0.0  ;;  %v2738_v58 = vadd.f32 %v5879_v18, %v2323_v55  ;;  %v2315_v39 = vadd.f32 %v2314_v42, %v1574_v57 }
 0x115   :  { %v4291_v0 = vpop.f32.mrf.mxu1  ;;  %v1577_v63 = vpop.f32.mrf.mxu0 }
 0x116   :  { %3504 = vst.msk [vmem:[%s6756_s9 + $0x7c] sm:$0xf] %vm3472_vm2, %v3897_v19  ;;  %v3895_v4 = vpack.c.bf16 %v2861_v36, %v2861_v36  ;;  %v2866_v7 = vmax.f32 %v2738_v58, 0.0  ;;  %v2736_v10 = vadd.f32 %v5879_v18, %v2315_v39  ;;  %v2326_v11 = vadd.f32 %v4291_v0, %v4161_v26 }
 0x117   :  { %v2317_v47 = vpop.f32.mrf.mxu1  ;;  %v4164_v50 = vpop.f32.mrf.mxu0 }
 0x118   :  { %3502 = vst.msk [vmem:[%s6756_s9 + $0x74] sm:$0xf] %vm3472_vm2, %v3895_v4  ;;  %v3900_v16 = vpack.c.bf16 %v2866_v7, %v2866_v7  ;;  %v2864_v17 = vmax.f32 %v2736_v10, 0.0  ;;  %v2739_v20 = vadd.f32 %v5879_v18, %v2326_v11  ;;  %v2318_v33 = vadd.f32 %v2317_v47, %v1577_v63 }
 0x119   :  { %v4294_v21 = vpop.f32.mrf.mxu1  ;;  %v1590_v62 = vpop.f32.mrf.mxu0 }
 0x11a   :  { %3507 = vst.msk [vmem:[%s6756_s9 + $0x88] sm:$0xf] %vm3472_vm2, %v3900_v16  ;;  %v3898_v23 = vpack.c.bf16 %v2864_v17, %v2864_v17  ;;  %v2867_v52 = vmax.f32 %v2739_v20, 0.0  ;;  %v2737_v56 = vadd.f32 %v5879_v18, %v2318_v33  ;;  %v2339_v22 = vadd.f32 %v4294_v21, %v4164_v50 }
 0x11b   :  { %v2330_v2 = vpop.f32.mrf.mxu1  ;;  %v4165_v31 = vpop.f32.mrf.mxu0 }
 0x11c   :  { %3505 = vst.msk [vmem:[%s6756_s9 + $0x80] sm:$0xf] %vm3472_vm2, %v3898_v23  ;;  %v3901_v27 = vpack.c.bf16 %v2867_v52, %v2867_v52  ;;  %v2865_v25 = vmax.f32 %v2737_v56, 0.0  ;;  %v2742_v29 = vadd.f32 %v5879_v18, %v2339_v22  ;;  %v2331_v8 = vadd.f32 %v2330_v2, %v1590_v62 }
 0x11d   :  { %v4295_v61 = vpop.f32.mrf.mxu1  ;;  %v1593_v9 = vpop.f32.mrf.mxu0 }
 0x11e   :  { %3508 = vst.msk [vmem:[%s6756_s9 + $0x8c] sm:$0xf] %vm3472_vm2, %v3901_v27  ;;  %v3899_v6 = vpack.c.bf16 %v2865_v25, %v2865_v25  ;;  %v2870_v35 = vmax.f32 %v2742_v29, 0.0  ;;  %v2740_v37 = vadd.f32 %v5879_v18, %v2331_v8  ;;  %v2342_v38 = vadd.f32 %v4295_v61, %v4165_v31 }
 0x11f   :  { %v2333_v14 = vpop.f32.mrf.mxu1  ;;  %v4168_v40 = vpop.f32.mrf.mxu0 }
 0x120   :  { %3506 = vst.msk [vmem:[%s6756_s9 + $0x84] sm:$0xf] %vm3472_vm2, %v3899_v6  ;;  %v3904_v49 = vpack.c.bf16 %v2870_v35, %v2870_v35  ;;  %v2868_v1 = vmax.f32 %v2740_v37, 0.0  ;;  %v2743_v48 = vadd.f32 %v5879_v18, %v2342_v38  ;;  %v2334_v24 = vadd.f32 %v2333_v14, %v1593_v9 }
 0x121   :  { %v4298_v41 = vpop.f32.mrf.mxu1  ;;  %v1606_v28 = vpop.f32.mrf.mxu0 }
 0x122   :  { %3511 = vst.msk [vmem:[%s6756_s9 + $0x98] sm:$0xf] %vm3472_vm2, %v3904_v49  ;;  %v3902_v43 = vpack.c.bf16 %v2868_v1, %v2868_v1  ;;  %v2871_v54 = vmax.f32 %v2743_v48, 0.0  ;;  %v2741_v44 = vadd.f32 %v5879_v18, %v2334_v24  ;;  %v2355_v13 = vadd.f32 %v4298_v41, %v4168_v40 }
 0x123   :  { %v2346_v45 = vpop.f32.mrf.mxu1  ;;  %v4169_v60 = vpop.f32.mrf.mxu0 }
 0x124   :  { %3509 = vst.msk [vmem:[%s6756_s9 + $0x90] sm:$0xf] %vm3472_vm2, %v3902_v43  ;;  %v3905_v46 = vpack.c.bf16 %v2871_v54, %v2871_v54  ;;  %v2869_v3 = vmax.f32 %v2741_v44, 0.0  ;;  %v2746_v5 = vadd.f32 %v5879_v18, %v2355_v13  ;;  %v2347_v12 = vadd.f32 %v2346_v45, %v1606_v28 }
 0x125   :  { %v4299_v30 = vpop.f32.mrf.mxu1  ;;  %v1609_v15 = vpop.f32.mrf.mxu0 }
 0x126   :  { %3512 = vst.msk [vmem:[%s6756_s9 + $0x9c] sm:$0xf] %vm3472_vm2, %v3905_v46  ;;  %v3903_v53 = vpack.c.bf16 %v2869_v3, %v2869_v3  ;;  %v2874_v34 = vmax.f32 %v2746_v5, 0.0  ;;  %v2744_v51 = vadd.f32 %v5879_v18, %v2347_v12  ;;  %v2358_v59 = vadd.f32 %v4299_v30, %v4169_v60  ;;  %v6352_v30 = vld [vmem:[%s6755_s8] ss:$0 sm:$0xff] }
 0x127   :  { %v2349_v32 = vpop.f32.mrf.mxu1  ;;  %v4172_v36 = vpop.f32.mrf.mxu0 }
 0x128   :  { %3510 = vst.msk [vmem:[%s6756_s9 + $0x94] sm:$0xf] %vm3472_vm2, %v3903_v53  ;;  %v3908_v55 = vpack.c.bf16 %v2874_v34, %v2874_v34  ;;  %v2872_v57 = vmax.f32 %v2744_v51, 0.0  ;;  %v2747_v42 = vadd.f32 %v5879_v18, %v2358_v59  ;;  %v2350_v19 = vadd.f32 %v2349_v32, %v1609_v15 }
 0x129   :  { %v4302_v58 = vpop.f32.mrf.mxu1  ;;  %v1622_v7 = vpop.f32.mrf.mxu0 }
 0x12a   :  { %3515 = vst.msk [vmem:[%s6756_s9 + $0xa8] sm:$0xf] %vm3472_vm2, %v3908_v55  ;;  %v3906_v39 = vpack.c.bf16 %v2872_v57, %v2872_v57  ;;  %v2875_v26 = vmax.f32 %v2747_v42, 0.0  ;;  %v2745_v0 = vadd.f32 %v5879_v18, %v2350_v19  ;;  %v2371_v4 = vadd.f32 %v4302_v58, %v4172_v36 }
 0x12b   :  { %v2362_v10 = vpop.f32.mrf.mxu1  ;;  %v4173_v17 = vpop.f32.mrf.mxu0 }
 0x12c   :  { %3513 = vst.msk [vmem:[%s6756_s9 + $0xa0] sm:$0xf] %vm3472_vm2, %v3906_v39  ;;  %v3909_v11 = vpack.c.bf16 %v2875_v26, %v2875_v26  ;;  %v2873_v63 = vmax.f32 %v2745_v0, 0.0  ;;  %v2750_v47 = vadd.f32 %v5879_v18, %v2371_v4  ;;  %v2363_v16 = vadd.f32 %v2362_v10, %v1622_v7 }
 0x12d   :  { %v4303_v20 = vpop.f32.mrf.mxu1  ;;  %v1625_v52 = vpop.f32.mrf.mxu0 }
 0x12e   :  { %3516 = vst.msk [vmem:[%s6756_s9 + $0xac] sm:$0xf] %vm3472_vm2, %v3909_v11  ;;  %v3907_v33 = vpack.c.bf16 %v2873_v63, %v2873_v63  ;;  %v2878_v50 = vmax.f32 %v2750_v47, 0.0  ;;  %v2748_v21 = vadd.f32 %v5879_v18, %v2363_v16  ;;  %v2374_v23 = vadd.f32 %v4303_v20, %v4173_v17 }
 0x12f   :  { %v2365_v56 = vpop.f32.mrf.mxu1  ;;  %v4176_v25 = vpop.f32.mrf.mxu0 }
 0x130   :  { %3514 = vst.msk [vmem:[%s6756_s9 + $0xa4] sm:$0xf] %vm3472_vm2, %v3907_v33  ;;  %v3912_v22 = vpack.c.bf16 %v2878_v50, %v2878_v50  ;;  %v2876_v62 = vmax.f32 %v2748_v21, 0.0  ;;  %v2751_v2 = vadd.f32 %v5879_v18, %v2374_v23  ;;  %v2366_v27 = vadd.f32 %v2365_v56, %v1625_v52 }
 0x131   :  { %v4306_v29 = vpop.f32.mrf.mxu1  ;;  %v1638_v35 = vpop.f32.mrf.mxu0 }
 0x132   :  { %3519 = vst.msk [vmem:[%s6756_s9 + $0xb8] sm:$0xf] %vm3472_vm2, %v3912_v22  ;;  %v3910_v8 = vpack.c.bf16 %v2876_v62, %v2876_v62  ;;  %v2879_v31 = vmax.f32 %v2751_v2, 0.0  ;;  %v2749_v61 = vadd.f32 %v5879_v18, %v2366_v27  ;;  %v2387_v6 = vadd.f32 %v4306_v29, %v4176_v25 }
 0x133   :  { %v2378_v37 = vpop.f32.mrf.mxu1  ;;  %v4177_v1 = vpop.f32.mrf.mxu0 }
 0x134   :  { %3517 = vst.msk [vmem:[%s6756_s9 + $0xb0] sm:$0xf] %vm3472_vm2, %v3910_v8  ;;  %v3913_v38 = vpack.c.bf16 %v2879_v31, %v2879_v31  ;;  %v2877_v9 = vmax.f32 %v2749_v61, 0.0  ;;  %v2754_v14 = vadd.f32 %v5879_v18, %v2387_v6  ;;  %v2379_v49 = vadd.f32 %v2378_v37, %v1638_v35 }
 0x135   :  { %v4307_v48 = vpop.f32.mrf.mxu1  ;;  %v1641_v54 = vpop.f32.mrf.mxu0 }
 0x136   :  { %3520 = vst.msk [vmem:[%s6756_s9 + $0xbc] sm:$0xf] %vm3472_vm2, %v3913_v38  ;;  %v3911_v24 = vpack.c.bf16 %v2877_v9, %v2877_v9  ;;  %v2882_v40 = vmax.f32 %v2754_v14, 0.0  ;;  %v2752_v41 = vadd.f32 %v5879_v18, %v2379_v49  ;;  %v2390_v43 = vadd.f32 %v4307_v48, %v4177_v1 }
 0x137   :  { %v2381_v44 = vpop.f32.mrf.mxu1  ;;  %v4180_v3 = vpop.f32.mrf.mxu0 }
 0x138   :  { %3518 = vst.msk [vmem:[%s6756_s9 + $0xb4] sm:$0xf] %vm3472_vm2, %v3911_v24  ;;  %v3916_v13 = vpack.c.bf16 %v2882_v40, %v2882_v40  ;;  %v2880_v28 = vmax.f32 %v2752_v41, 0.0  ;;  %v2755_v45 = vadd.f32 %v5879_v18, %v2390_v43  ;;  %v2382_v46 = vadd.f32 %v2381_v44, %v1641_v54 }
 0x139   :  { %v4310_v5 = vpop.f32.mrf.mxu1  ;;  %v1654_v51 = vpop.f32.mrf.mxu0 }
 0x13a   :  { %3523 = vst.msk [vmem:[%s6756_s9 + $0xc8] sm:$0xf] %vm3472_vm2, %v3916_v13  ;;  %v3914_v12 = vpack.c.bf16 %v2880_v28, %v2880_v28  ;;  %v2883_v60 = vmax.f32 %v2755_v45, 0.0  ;;  %v2753_v53 = vadd.f32 %v6352_v30, %v2382_v46  ;;  %v2403_v34 = vadd.f32 %v4310_v5, %v4180_v3 }
 0x13b   :  { %v2394_v18 = vpop.f32.mrf.mxu1  ;;  %v4181_v57 = vpop.f32.mrf.mxu0 }
 0x13c   :  { %3521 = vst.msk [vmem:[%s6756_s9 + $0xc0] sm:$0xf] %vm3472_vm2, %v3914_v12  ;;  %v3917_v59 = vpack.c.bf16 %v2883_v60, %v2883_v60  ;;  %v2881_v15 = vmax.f32 %v2753_v53, 0.0  ;;  %v2758_v32 = vadd.f32 %v6352_v30, %v2403_v34  ;;  %v2395_v55 = vadd.f32 %v2394_v18, %v1654_v51 }
 0x13d   :  { %v4311_v42 = vpop.f32.mrf.mxu1  ;;  %v1657_v26 = vpop.f32.mrf.mxu0 }
 0x13e   :  { %3524 = vst.msk [vmem:[%s6756_s9 + $0xcc] sm:$0xf] %vm3472_vm2, %v3917_v59  ;;  %v3915_v19 = vpack.c.bf16 %v2881_v15, %v2881_v15  ;;  %v2886_v36 = vmax.f32 %v2758_v32, 0.0  ;;  %v2756_v58 = vadd.f32 %v6352_v30, %v2395_v55  ;;  %v2406_v39 = vadd.f32 %v4311_v42, %v4181_v57 }
 0x13f   :  { %v2397_v0 = vpop.f32.mrf.mxu1  ;;  %v4184_v63 = vpop.f32.mrf.mxu0 }
 0x140   :  { %3522 = vst.msk [vmem:[%s6756_s9 + $0xc4] sm:$0xf] %vm3472_vm2, %v3915_v19  ;;  %v3920_v4 = vpack.c.bf16 %v2886_v36, %v2886_v36  ;;  %v2884_v7 = vmax.f32 %v2756_v58, 0.0  ;;  %v2759_v10 = vadd.f32 %v6352_v30, %v2406_v39  ;;  %v2398_v11 = vadd.f32 %v2397_v0, %v1657_v26 }
 0x141   :  { %v4314_v47 = vpop.f32.mrf.mxu1  ;;  %v1670_v50 = vpop.f32.mrf.mxu0 }
 0x142   :  { %3527 = vst.msk [vmem:[%s6756_s9 + $0xd8] sm:$0xf] %vm3472_vm2, %v3920_v4  ;;  %v3918_v16 = vpack.c.bf16 %v2884_v7, %v2884_v7  ;;  %v2887_v17 = vmax.f32 %v2759_v10, 0.0  ;;  %v2757_v20 = vadd.f32 %v6352_v30, %v2398_v11  ;;  %v2419_v33 = vadd.f32 %v4314_v47, %v4184_v63 }
 0x143   :  { %v2410_v21 = vpop.f32.mrf.mxu1  ;;  %v4185_v62 = vpop.f32.mrf.mxu0 }
 0x144   :  { %3525 = vst.msk [vmem:[%s6756_s9 + $0xd0] sm:$0xf] %vm3472_vm2, %v3918_v16  ;;  %v3921_v23 = vpack.c.bf16 %v2887_v17, %v2887_v17  ;;  %v2885_v52 = vmax.f32 %v2757_v20, 0.0  ;;  %v2762_v56 = vadd.f32 %v6352_v30, %v2419_v33  ;;  %v2411_v22 = vadd.f32 %v2410_v21, %v1670_v50 }
 0x145   :  { %v4315_v2 = vpop.f32.mrf.mxu1  ;;  %v1673_v31 = vpop.f32.mrf.mxu0 }
 0x146   :  { %3528 = vst.msk [vmem:[%s6756_s9 + $0xdc] sm:$0xf] %vm3472_vm2, %v3921_v23  ;;  %v3919_v27 = vpack.c.bf16 %v2885_v52, %v2885_v52  ;;  %v2890_v25 = vmax.f32 %v2762_v56, 0.0  ;;  %v2760_v29 = vadd.f32 %v6352_v30, %v2411_v22  ;;  %v2422_v8 = vadd.f32 %v4315_v2, %v4185_v62 }
 0x147   :  { %v2413_v61 = vpop.f32.mrf.mxu1  ;;  %v4188_v9 = vpop.f32.mrf.mxu0 }
 0x148   :  { %3526 = vst.msk [vmem:[%s6756_s9 + $0xd4] sm:$0xf] %vm3472_vm2, %v3919_v27  ;;  %v3924_v6 = vpack.c.bf16 %v2890_v25, %v2890_v25  ;;  %v2888_v35 = vmax.f32 %v2760_v29, 0.0  ;;  %v2763_v37 = vadd.f32 %v6352_v30, %v2422_v8  ;;  %v2414_v38 = vadd.f32 %v2413_v61, %v1673_v31 }
 0x149   :  { %v4318_v14 = vpop.f32.mrf.mxu1  ;;  %v1686_v40 = vpop.f32.mrf.mxu0 }
 0x14a   :  { %3531 = vst.msk [vmem:[%s6756_s9 + $0xe8] sm:$0xf] %vm3472_vm2, %v3924_v6  ;;  %v3922_v49 = vpack.c.bf16 %v2888_v35, %v2888_v35  ;;  %v2891_v1 = vmax.f32 %v2763_v37, 0.0  ;;  %v2761_v48 = vadd.f32 %v6352_v30, %v2414_v38  ;;  %v2435_v24 = vadd.f32 %v4318_v14, %v4188_v9 }
 0x14b   :  { %v2426_v41 = vpop.f32.mrf.mxu1  ;;  %v4189_v28 = vpop.f32.mrf.mxu0 }
 0x14c   :  { %3529 = vst.msk [vmem:[%s6756_s9 + $0xe0] sm:$0xf] %vm3472_vm2, %v3922_v49  ;;  %v3925_v43 = vpack.c.bf16 %v2891_v1, %v2891_v1  ;;  %v2889_v54 = vmax.f32 %v2761_v48, 0.0  ;;  %v2766_v44 = vadd.f32 %v6352_v30, %v2435_v24  ;;  %v2427_v13 = vadd.f32 %v2426_v41, %v1686_v40 }
 0x14d   :  { %v4319_v45 = vpop.f32.mrf.mxu1  ;;  %v1689_v60 = vpop.f32.mrf.mxu0 }
 0x14e   :  { %3532 = vst.msk [vmem:[%s6756_s9 + $0xec] sm:$0xf] %vm3472_vm2, %v3925_v43  ;;  %v3923_v46 = vpack.c.bf16 %v2889_v54, %v2889_v54  ;;  %v2894_v3 = vmax.f32 %v2766_v44, 0.0  ;;  %v2764_v5 = vadd.f32 %v6352_v30, %v2427_v13  ;;  %v2438_v12 = vadd.f32 %v4319_v45, %v4189_v28 }
 0x14f   :  { %v2429_v53 = vpop.f32.mrf.mxu1  ;;  %v4192_v15 = vpop.f32.mrf.mxu0 }
 0x150   :  { %3530 = vst.msk [vmem:[%s6756_s9 + $0xe4] sm:$0xf] %vm3472_vm2, %v3923_v46  ;;  %v3928_v34 = vpack.c.bf16 %v2894_v3, %v2894_v3  ;;  %v2892_v51 = vmax.f32 %v2764_v5, 0.0  ;;  %v2767_v18 = vadd.f32 %v6352_v30, %v2438_v12  ;;  %v2430_v59 = vadd.f32 %v2429_v53, %v1689_v60 }
 0x151   :  { %v4322_v32 = vpop.f32.mrf.mxu1  ;;  %v1702_v36 = vpop.f32.mrf.mxu0 }
 0x152   :  { %3535 = vst.msk [vmem:[%s6756_s9 + $0xf8] sm:$0xf] %vm3472_vm2, %v3928_v34  ;;  %v3926_v55 = vpack.c.bf16 %v2892_v51, %v2892_v51  ;;  %v2895_v57 = vmax.f32 %v2767_v18, 0.0  ;;  %v2765_v42 = vadd.f32 %v6352_v30, %v2430_v59  ;;  %v2451_v19 = vadd.f32 %v4322_v32, %v4192_v15 }
 0x153   :  { %v2442_v58 = vpop.f32.mrf.mxu1  ;;  %v4193_v7 = vpop.f32.mrf.mxu0 }
 0x154   :  { %3533 = vst.msk [vmem:[%s6756_s9 + $0xf0] sm:$0xf] %vm3472_vm2, %v3926_v55  ;;  %v3929_v39 = vpack.c.bf16 %v2895_v57, %v2895_v57  ;;  %v2893_v26 = vmax.f32 %v2765_v42, 0.0  ;;  %v2770_v0 = vadd.f32 %v6352_v30, %v2451_v19  ;;  %v2443_v4 = vadd.f32 %v2442_v58, %v1702_v36 }
 0x155   :  { %v4323_v10 = vpop.f32.mrf.mxu1  ;;  %v1705_v17 = vpop.f32.mrf.mxu0 }
 0x156   :  { %3536 = vst.msk [vmem:[%s6756_s9 + $0xfc] sm:$0xf] %vm3472_vm2, %v3929_v39  ;;  %v3927_v11 = vpack.c.bf16 %v2893_v26, %v2893_v26  ;;  %v2898_v63 = vmax.f32 %v2770_v0, 0.0  ;;  %v2768_v47 = vadd.f32 %v6352_v30, %v2443_v4  ;;  %v2454_v16 = vadd.f32 %v4323_v10, %v4193_v7 }
 0x157   :  { %v2445_v20 = vpop.f32.mrf.mxu1  ;;  %v4196_v52 = vpop.f32.mrf.mxu0 }
 0x158   :  { %3534 = vst.msk [vmem:[%s6756_s9 + $0xf4] sm:$0xf] %vm3472_vm2, %v3927_v11  ;;  %v3932_v33 = vpack.c.bf16 %v2898_v63, %v2898_v63  ;;  %v2896_v50 = vmax.f32 %v2768_v47, 0.0  ;;  %v2771_v21 = vadd.f32 %v6352_v30, %v2454_v16  ;;  %v2446_v23 = vadd.f32 %v2445_v20, %v1705_v17 }
 0x159   :  { %v4326_v56 = vpop.f32.mrf.mxu1  ;;  %v1718_v25 = vpop.f32.mrf.mxu0 }
 0x15a   :  { %3539 = vst.msk [vmem:[%s6756_s9 + $0x108] sm:$0xf] %vm3472_vm2, %v3932_v33  ;;  %v3930_v22 = vpack.c.bf16 %v2896_v50, %v2896_v50  ;;  %v2899_v62 = vmax.f32 %v2771_v21, 0.0  ;;  %v2769_v2 = vadd.f32 %v6352_v30, %v2446_v23  ;;  %v2467_v27 = vadd.f32 %v4326_v56, %v4196_v52 }
 0x15b   :  { %v2458_v29 = vpop.f32.mrf.mxu1  ;;  %v4197_v35 = vpop.f32.mrf.mxu0 }
 0x15c   :  { %3537 = vst.msk [vmem:[%s6756_s9 + $0x100] sm:$0xf] %vm3472_vm2, %v3930_v22  ;;  %v3933_v8 = vpack.c.bf16 %v2899_v62, %v2899_v62  ;;  %v2897_v31 = vmax.f32 %v2769_v2, 0.0  ;;  %v2774_v61 = vadd.f32 %v6352_v30, %v2467_v27  ;;  %v2459_v6 = vadd.f32 %v2458_v29, %v1718_v25 }
 0x15d   :  { %v4327_v37 = vpop.f32.mrf.mxu1  ;;  %v1721_v1 = vpop.f32.mrf.mxu0 }
 0x15e   :  { %3540 = vst.msk [vmem:[%s6756_s9 + $0x10c] sm:$0xf] %vm3472_vm2, %v3933_v8  ;;  %v3931_v38 = vpack.c.bf16 %v2897_v31, %v2897_v31  ;;  %v2902_v9 = vmax.f32 %v2774_v61, 0.0  ;;  %v2772_v14 = vadd.f32 %v6352_v30, %v2459_v6  ;;  %v2470_v49 = vadd.f32 %v4327_v37, %v4197_v35 }
 0x15f   :  { %v2461_v48 = vpop.f32.mrf.mxu1  ;;  %v4200_v54 = vpop.f32.mrf.mxu0 }
 0x160   :  { %3538 = vst.msk [vmem:[%s6756_s9 + $0x104] sm:$0xf] %vm3472_vm2, %v3931_v38  ;;  %v3936_v24 = vpack.c.bf16 %v2902_v9, %v2902_v9  ;;  %v2900_v40 = vmax.f32 %v2772_v14, 0.0  ;;  %v2775_v41 = vadd.f32 %v6352_v30, %v2470_v49  ;;  %v2462_v43 = vadd.f32 %v2461_v48, %v1721_v1 }
 0x161   :  { %v4330_v44 = vpop.f32.mrf.mxu1  ;;  %v1734_v3 = vpop.f32.mrf.mxu0 }
 0x162   :  { %3543 = vst.msk [vmem:[%s6756_s9 + $0x118] sm:$0xf] %vm3472_vm2, %v3936_v24  ;;  %v3934_v13 = vpack.c.bf16 %v2900_v40, %v2900_v40  ;;  %v2903_v28 = vmax.f32 %v2775_v41, 0.0  ;;  %v2773_v45 = vadd.f32 %v6352_v30, %v2462_v43  ;;  %v2483_v46 = vadd.f32 %v4330_v44, %v4200_v54 }
 0x163   :  { %v2474_v5 = vpop.f32.mrf.mxu1  ;;  %v4201_v51 = vpop.f32.mrf.mxu0 }
 0x164   :  { %3541 = vst.msk [vmem:[%s6756_s9 + $0x110] sm:$0xf] %vm3472_vm2, %v3934_v13  ;;  %v3937_v12 = vpack.c.bf16 %v2903_v28, %v2903_v28  ;;  %v2901_v60 = vmax.f32 %v2773_v45, 0.0  ;;  %v2778_v53 = vadd.f32 %v6352_v30, %v2483_v46  ;;  %v2475_v34 = vadd.f32 %v2474_v5, %v1734_v3 }
 0x165   :  { %v4331_v18 = vpop.f32.mrf.mxu1  ;;  %v1737_v57 = vpop.f32.mrf.mxu0 }
 0x166   :  { %3544 = vst.msk [vmem:[%s6756_s9 + $0x11c] sm:$0xf] %vm3472_vm2, %v3937_v12  ;;  %v3935_v59 = vpack.c.bf16 %v2901_v60, %v2901_v60  ;;  %v2906_v15 = vmax.f32 %v2778_v53, 0.0  ;;  %v2776_v32 = vadd.f32 %v6352_v30, %v2475_v34  ;;  %v2486_v55 = vadd.f32 %v4331_v18, %v4201_v51 }
 0x167   :  { %v2477_v42 = vpop.f32.mrf.mxu1  ;;  %v4204_v26 = vpop.f32.mrf.mxu0 }
 0x168   :  { %3542 = vst.msk [vmem:[%s6756_s9 + $0x114] sm:$0xf] %vm3472_vm2, %v3935_v59  ;;  %v3940_v19 = vpack.c.bf16 %v2906_v15, %v2906_v15  ;;  %v2904_v36 = vmax.f32 %v2776_v32, 0.0  ;;  %v2779_v58 = vadd.f32 %v6352_v30, %v2486_v55  ;;  %v2478_v39 = vadd.f32 %v2477_v42, %v1737_v57 }
 0x169   :  { %v4334_v0 = vpop.f32.mrf.mxu1  ;;  %v1750_v63 = vpop.f32.mrf.mxu0 }
 0x16a   :  { %3547 = vst.msk [vmem:[%s6756_s9 + $0x128] sm:$0xf] %vm3472_vm2, %v3940_v19  ;;  %v3938_v4 = vpack.c.bf16 %v2904_v36, %v2904_v36  ;;  %v2907_v7 = vmax.f32 %v2779_v58, 0.0  ;;  %v2777_v10 = vadd.f32 %v6352_v30, %v2478_v39  ;;  %v2499_v11 = vadd.f32 %v4334_v0, %v4204_v26 }
 0x16b   :  { %v2490_v47 = vpop.f32.mrf.mxu1  ;;  %v4205_v50 = vpop.f32.mrf.mxu0 }
 0x16c   :  { %3545 = vst.msk [vmem:[%s6756_s9 + $0x120] sm:$0xf] %vm3472_vm2, %v3938_v4  ;;  %v3941_v16 = vpack.c.bf16 %v2907_v7, %v2907_v7  ;;  %v2905_v17 = vmax.f32 %v2777_v10, 0.0  ;;  %v2782_v20 = vadd.f32 %v6352_v30, %v2499_v11  ;;  %v2491_v33 = vadd.f32 %v2490_v47, %v1750_v63 }
 0x16d   :  { %v4335_v21 = vpop.f32.mrf.mxu1  ;;  %v1753_v62 = vpop.f32.mrf.mxu0 }
 0x16e   :  { %3548 = vst.msk [vmem:[%s6756_s9 + $0x12c] sm:$0xf] %vm3472_vm2, %v3941_v16  ;;  %v3939_v23 = vpack.c.bf16 %v2905_v17, %v2905_v17  ;;  %v2910_v52 = vmax.f32 %v2782_v20, 0.0  ;;  %v2780_v56 = vadd.f32 %v6352_v30, %v2491_v33  ;;  %v2502_v22 = vadd.f32 %v4335_v21, %v4205_v50 }
 0x16f   :  { %v2493_v2 = vpop.f32.mrf.mxu1  ;;  %v4208_v31 = vpop.f32.mrf.mxu0 }
 0x170   :  { %3546 = vst.msk [vmem:[%s6756_s9 + $0x124] sm:$0xf] %vm3472_vm2, %v3939_v23  ;;  %v3944_v27 = vpack.c.bf16 %v2910_v52, %v2910_v52  ;;  %v2908_v25 = vmax.f32 %v2780_v56, 0.0  ;;  %v2783_v29 = vadd.f32 %v6352_v30, %v2502_v22  ;;  %v2494_v8 = vadd.f32 %v2493_v2, %v1753_v62 }
 0x171   :  { %v4338_v61 = vpop.f32.mrf.mxu1  ;;  %v1766_v9 = vpop.f32.mrf.mxu0 }
 0x172   :  { %3551 = vst.msk [vmem:[%s6756_s9 + $0x138] sm:$0xf] %vm3472_vm2, %v3944_v27  ;;  %v3942_v6 = vpack.c.bf16 %v2908_v25, %v2908_v25  ;;  %v2911_v35 = vmax.f32 %v2783_v29, 0.0  ;;  %v2781_v37 = vadd.f32 %v6352_v30, %v2494_v8  ;;  %v2515_v38 = vadd.f32 %v4338_v61, %v4208_v31 }
 0x173   :  { %v2506_v14 = vpop.f32.mrf.mxu1  ;;  %v4209_v40 = vpop.f32.mrf.mxu0 }
 0x174   :  { %3549 = vst.msk [vmem:[%s6756_s9 + $0x130] sm:$0xf] %vm3472_vm2, %v3942_v6  ;;  %v3945_v49 = vpack.c.bf16 %v2911_v35, %v2911_v35  ;;  %v2909_v1 = vmax.f32 %v2781_v37, 0.0  ;;  %v2786_v48 = vadd.f32 %v6352_v30, %v2515_v38  ;;  %v2507_v24 = vadd.f32 %v2506_v14, %v1766_v9 }
 0x175   :  { %v4339_v41 = vpop.f32.mrf.mxu1  ;;  %v1769_v28 = vpop.f32.mrf.mxu0 }
 0x176   :  { %3552 = vst.msk [vmem:[%s6756_s9 + $0x13c] sm:$0xf] %vm3472_vm2, %v3945_v49  ;;  %v3943_v43 = vpack.c.bf16 %v2909_v1, %v2909_v1  ;;  %v2914_v54 = vmax.f32 %v2786_v48, 0.0  ;;  %v2784_v44 = vadd.f32 %v6352_v30, %v2507_v24  ;;  %v2518_v13 = vadd.f32 %v4339_v41, %v4209_v40 }
 0x177   :  { %v2509_v45 = vpop.f32.mrf.mxu1  ;;  %v4212_v60 = vpop.f32.mrf.mxu0 }
 0x178   :  { %3550 = vst.msk [vmem:[%s6756_s9 + $0x134] sm:$0xf] %vm3472_vm2, %v3943_v43  ;;  %v3948_v46 = vpack.c.bf16 %v2914_v54, %v2914_v54  ;;  %v2912_v3 = vmax.f32 %v2784_v44, 0.0  ;;  %v2787_v5 = vadd.f32 %v6352_v30, %v2518_v13  ;;  %v2510_v12 = vadd.f32 %v2509_v45, %v1769_v28 }
 0x179   :  { %v4342_v53 = vpop.f32.mrf.mxu1  ;;  %v1782_v15 = vpop.f32.mrf.mxu0 }
 0x17a   :  { %3555 = vst.msk [vmem:[%s6756_s9 + $0x148] sm:$0xf] %vm3472_vm2, %v3948_v46  ;;  %v3946_v34 = vpack.c.bf16 %v2912_v3, %v2912_v3  ;;  %v2915_v51 = vmax.f32 %v2787_v5, 0.0  ;;  %v2785_v18 = vadd.f32 %v6352_v30, %v2510_v12  ;;  %v2531_v59 = vadd.f32 %v4342_v53, %v4212_v60 }
 0x17b   :  { %v2522_v32 = vpop.f32.mrf.mxu1  ;;  %v4213_v36 = vpop.f32.mrf.mxu0 }
 0x17c   :  { %3553 = vst.msk [vmem:[%s6756_s9 + $0x140] sm:$0xf] %vm3472_vm2, %v3946_v34  ;;  %v3949_v55 = vpack.c.bf16 %v2915_v51, %v2915_v51  ;;  %v2913_v57 = vmax.f32 %v2785_v18, 0.0  ;;  %v2790_v42 = vadd.f32 %v6352_v30, %v2531_v59  ;;  %v2523_v19 = vadd.f32 %v2522_v32, %v1782_v15 }
 0x17d   :  { %v4343_v58 = vpop.f32.mrf.mxu1  ;;  %v1785_v7 = vpop.f32.mrf.mxu0 }
 0x17e   :  { %3556 = vst.msk [vmem:[%s6756_s9 + $0x14c] sm:$0xf] %vm3472_vm2, %v3949_v55  ;;  %v3947_v39 = vpack.c.bf16 %v2913_v57, %v2913_v57  ;;  %v2918_v26 = vmax.f32 %v2790_v42, 0.0  ;;  %v2788_v0 = vadd.f32 %v6352_v30, %v2523_v19  ;;  %v2534_v4 = vadd.f32 %v4343_v58, %v4213_v36 }
 0x17f   :  { %v2525_v10 = vpop.f32.mrf.mxu1  ;;  %v4216_v17 = vpop.f32.mrf.mxu0 }
 0x180   :  { %3554 = vst.msk [vmem:[%s6756_s9 + $0x144] sm:$0xf] %vm3472_vm2, %v3947_v39  ;;  %v3952_v11 = vpack.c.bf16 %v2918_v26, %v2918_v26  ;;  %v2916_v63 = vmax.f32 %v2788_v0, 0.0  ;;  %v2791_v47 = vadd.f32 %v6352_v30, %v2534_v4  ;;  %v2526_v16 = vadd.f32 %v2525_v10, %v1785_v7 }
 0x181   :  { %v4346_v20 = vpop.f32.mrf.mxu1  ;;  %v1798_v52 = vpop.f32.mrf.mxu0 }
 0x182   :  { %3559 = vst.msk [vmem:[%s6756_s9 + $0x158] sm:$0xf] %vm3472_vm2, %v3952_v11  ;;  %v3950_v33 = vpack.c.bf16 %v2916_v63, %v2916_v63  ;;  %v2919_v50 = vmax.f32 %v2791_v47, 0.0  ;;  %v2789_v21 = vadd.f32 %v6352_v30, %v2526_v16  ;;  %v2547_v23 = vadd.f32 %v4346_v20, %v4216_v17 }
 0x183   :  { %v2538_v56 = vpop.f32.mrf.mxu1  ;;  %v4217_v25 = vpop.f32.mrf.mxu0 }
 0x184   :  { %3557 = vst.msk [vmem:[%s6756_s9 + $0x150] sm:$0xf] %vm3472_vm2, %v3950_v33  ;;  %v3953_v22 = vpack.c.bf16 %v2919_v50, %v2919_v50  ;;  %v2917_v62 = vmax.f32 %v2789_v21, 0.0  ;;  %v2794_v2 = vadd.f32 %v6352_v30, %v2547_v23  ;;  %v2539_v27 = vadd.f32 %v2538_v56, %v1798_v52 }
 0x185   :  { %v4347_v29 = vpop.f32.mrf.mxu1  ;;  %v1801_v35 = vpop.f32.mrf.mxu0 }
 0x186   :  { %3560 = vst.msk [vmem:[%s6756_s9 + $0x15c] sm:$0xf] %vm3472_vm2, %v3953_v22  ;;  %v3951_v8 = vpack.c.bf16 %v2917_v62, %v2917_v62  ;;  %v2922_v31 = vmax.f32 %v2794_v2, 0.0  ;;  %v2792_v61 = vadd.f32 %v6352_v30, %v2539_v27  ;;  %v2550_v6 = vadd.f32 %v4347_v29, %v4217_v25 }
 0x187   :  { %v2541_v37 = vpop.f32.mrf.mxu1  ;;  %v4220_v1 = vpop.f32.mrf.mxu0 }
 0x188   :  { %3558 = vst.msk [vmem:[%s6756_s9 + $0x154] sm:$0xf] %vm3472_vm2, %v3951_v8  ;;  %v3956_v38 = vpack.c.bf16 %v2922_v31, %v2922_v31  ;;  %v2920_v9 = vmax.f32 %v2792_v61, 0.0  ;;  %v2795_v14 = vadd.f32 %v6352_v30, %v2550_v6  ;;  %v2542_v49 = vadd.f32 %v2541_v37, %v1801_v35 }
 0x189   :  { %v4350_v48 = vpop.f32.mrf.mxu1  ;;  %v1814_v54 = vpop.f32.mrf.mxu0 }
 0x18a   :  { %3563 = vst.msk [vmem:[%s6756_s9 + $0x168] sm:$0xf] %vm3472_vm2, %v3956_v38  ;;  %v3954_v24 = vpack.c.bf16 %v2920_v9, %v2920_v9  ;;  %v2923_v40 = vmax.f32 %v2795_v14, 0.0  ;;  %v2793_v41 = vadd.f32 %v6352_v30, %v2542_v49  ;;  %v2563_v43 = vadd.f32 %v4350_v48, %v4220_v1 }
 0x18b   :  { %v2554_v44 = vpop.f32.mrf.mxu1  ;;  %v4221_v3 = vpop.f32.mrf.mxu0 }
 0x18c   :  { %3561 = vst.msk [vmem:[%s6756_s9 + $0x160] sm:$0xf] %vm3472_vm2, %v3954_v24  ;;  %v3957_v13 = vpack.c.bf16 %v2923_v40, %v2923_v40  ;;  %v2921_v28 = vmax.f32 %v2793_v41, 0.0  ;;  %v2798_v45 = vadd.f32 %v6352_v30, %v2563_v43  ;;  %v2555_v46 = vadd.f32 %v2554_v44, %v1814_v54 }
 0x18d   :  { %v4351_v5 = vpop.f32.mrf.mxu1  ;;  %v1817_v51 = vpop.f32.mrf.mxu0 }
 0x18e   :  { %3564 = vst.msk [vmem:[%s6756_s9 + $0x16c] sm:$0xf] %vm3472_vm2, %v3957_v13  ;;  %v3955_v12 = vpack.c.bf16 %v2921_v28, %v2921_v28  ;;  %v2926_v60 = vmax.f32 %v2798_v45, 0.0  ;;  %v2796_v53 = vadd.f32 %v6352_v30, %v2555_v46  ;;  %v2566_v34 = vadd.f32 %v4351_v5, %v4221_v3 }
 0x18f   :  { %v2557_v18 = vpop.f32.mrf.mxu1  ;;  %v4224_v57 = vpop.f32.mrf.mxu0 }
 0x190   :  { %3562 = vst.msk [vmem:[%s6756_s9 + $0x164] sm:$0xf] %vm3472_vm2, %v3955_v12  ;;  %v3960_v59 = vpack.c.bf16 %v2926_v60, %v2926_v60  ;;  %v2924_v15 = vmax.f32 %v2796_v53, 0.0  ;;  %v2799_v32 = vadd.f32 %v6352_v30, %v2566_v34  ;;  %v2558_v55 = vadd.f32 %v2557_v18, %v1817_v51 }
 0x191   :  { %v4354_v42 = vpop.f32.mrf.mxu1  ;;  %v1830_v26 = vpop.f32.mrf.mxu0 }
 0x192   :  { %3567 = vst.msk [vmem:[%s6756_s9 + $0x178] sm:$0xf] %vm3472_vm2, %v3960_v59  ;;  %v3958_v19 = vpack.c.bf16 %v2924_v15, %v2924_v15  ;;  %v2927_v36 = vmax.f32 %v2799_v32, 0.0  ;;  %v2797_v58 = vadd.f32 %v6352_v30, %v2558_v55  ;;  %v2579_v39 = vadd.f32 %v4354_v42, %v4224_v57 }
 0x193   :  { %v2570_v0 = vpop.f32.mrf.mxu1  ;;  %v4225_v63 = vpop.f32.mrf.mxu0 }
 0x194   :  { %3565 = vst.msk [vmem:[%s6756_s9 + $0x170] sm:$0xf] %vm3472_vm2, %v3958_v19  ;;  %v3961_v4 = vpack.c.bf16 %v2927_v36, %v2927_v36  ;;  %v2925_v7 = vmax.f32 %v2797_v58, 0.0  ;;  %v2802_v10 = vadd.f32 %v6352_v30, %v2579_v39  ;;  %v2571_v11 = vadd.f32 %v2570_v0, %v1830_v26 }
 0x195   :  { %v4355_v47 = vpop.f32.mrf.mxu1  ;;  %v1833_v50 = vpop.f32.mrf.mxu0 }
 0x196   :  { %3568 = vst.msk [vmem:[%s6756_s9 + $0x17c] sm:$0xf] %vm3472_vm2, %v3961_v4  ;;  %v3959_v16 = vpack.c.bf16 %v2925_v7, %v2925_v7  ;;  %v2930_v17 = vmax.f32 %v2802_v10, 0.0  ;;  %v2800_v20 = vadd.f32 %v6352_v30, %v2571_v11  ;;  %v2582_v33 = vadd.f32 %v4355_v47, %v4225_v63 }
 0x197   :  { %v2573_v21 = vpop.f32.mrf.mxu1  ;;  %v4228_v62 = vpop.f32.mrf.mxu0 }
 0x198   :  { %3566 = vst.msk [vmem:[%s6756_s9 + $0x174] sm:$0xf] %vm3472_vm2, %v3959_v16  ;;  %v3964_v23 = vpack.c.bf16 %v2930_v17, %v2930_v17  ;;  %v2928_v52 = vmax.f32 %v2800_v20, 0.0  ;;  %v2803_v56 = vadd.f32 %v6352_v30, %v2582_v33  ;;  %v2574_v22 = vadd.f32 %v2573_v21, %v1833_v50 }
 0x199   :  { %v4358_v2 = vpop.f32.mrf.mxu1  ;;  %v1846_v31 = vpop.f32.mrf.mxu0 }
 0x19a   :  { %3571 = vst.msk [vmem:[%s6756_s9 + $0x188] sm:$0xf] %vm3472_vm2, %v3964_v23  ;;  %v3962_v27 = vpack.c.bf16 %v2928_v52, %v2928_v52  ;;  %v2931_v25 = vmax.f32 %v2803_v56, 0.0  ;;  %v2801_v29 = vadd.f32 %v6352_v30, %v2574_v22  ;;  %v2595_v8 = vadd.f32 %v4358_v2, %v4228_v62 }
 0x19b   :  { %v2586_v61 = vpop.f32.mrf.mxu1  ;;  %v4229_v9 = vpop.f32.mrf.mxu0 }
 0x19c   :  { %3569 = vst.msk [vmem:[%s6756_s9 + $0x180] sm:$0xf] %vm3472_vm2, %v3962_v27  ;;  %v3965_v6 = vpack.c.bf16 %v2931_v25, %v2931_v25  ;;  %v2929_v35 = vmax.f32 %v2801_v29, 0.0  ;;  %v2806_v37 = vadd.f32 %v6352_v30, %v2595_v8  ;;  %v2587_v38 = vadd.f32 %v2586_v61, %v1846_v31 }
 0x19d   :  { %v4359_v14 = vpop.f32.mrf.mxu1  ;;  %v1849_v40 = vpop.f32.mrf.mxu0 }
 0x19e   :  { %3572 = vst.msk [vmem:[%s6756_s9 + $0x18c] sm:$0xf] %vm3472_vm2, %v3965_v6  ;;  %v3963_v49 = vpack.c.bf16 %v2929_v35, %v2929_v35  ;;  %v2934_v1 = vmax.f32 %v2806_v37, 0.0  ;;  %v2804_v48 = vadd.f32 %v6352_v30, %v2587_v38  ;;  %v2598_v24 = vadd.f32 %v4359_v14, %v4229_v9 }
 0x19f   :  { %v2589_v41 = vpop.f32.mrf.mxu1  ;;  %v4232_v28 = vpop.f32.mrf.mxu0 }
 0x1a0   :  { %3570 = vst.msk [vmem:[%s6756_s9 + $0x184] sm:$0xf] %vm3472_vm2, %v3963_v49  ;;  %v3968_v43 = vpack.c.bf16 %v2934_v1, %v2934_v1  ;;  %v2932_v54 = vmax.f32 %v2804_v48, 0.0  ;;  %v2807_v44 = vadd.f32 %v6352_v30, %v2598_v24  ;;  %v2590_v13 = vadd.f32 %v2589_v41, %v1849_v40 }
 0x1a1   :  { %v4362_v45 = vpop.f32.mrf.mxu1  ;;  %v1862_v60 = vpop.f32.mrf.mxu0 }
 0x1a2   :  { %3575 = vst.msk [vmem:[%s6756_s9 + $0x198] sm:$0xf] %vm3472_vm2, %v3968_v43  ;;  %v3966_v46 = vpack.c.bf16 %v2932_v54, %v2932_v54  ;;  %v2935_v3 = vmax.f32 %v2807_v44, 0.0  ;;  %v2805_v5 = vadd.f32 %v6352_v30, %v2590_v13  ;;  %v2611_v12 = vadd.f32 %v4362_v45, %v4232_v28 }
 0x1a3   :  { %v2602_v53 = vpop.f32.mrf.mxu1  ;;  %v4233_v15 = vpop.f32.mrf.mxu0 }
 0x1a4   :  { %3573 = vst.msk [vmem:[%s6756_s9 + $0x190] sm:$0xf] %vm3472_vm2, %v3966_v46  ;;  %v3969_v34 = vpack.c.bf16 %v2935_v3, %v2935_v3  ;;  %v2933_v51 = vmax.f32 %v2805_v5, 0.0  ;;  %v2810_v18 = vadd.f32 %v6352_v30, %v2611_v12  ;;  %v2603_v59 = vadd.f32 %v2602_v53, %v1862_v60 }
 0x1a5   :  { %v4363_v32 = vpop.f32.mrf.mxu1  ;;  %v1865_v36 = vpop.f32.mrf.mxu0 }
 0x1a6   :  { %3576 = vst.msk [vmem:[%s6756_s9 + $0x19c] sm:$0xf] %vm3472_vm2, %v3969_v34  ;;  %v3967_v55 = vpack.c.bf16 %v2933_v51, %v2933_v51  ;;  %v2938_v57 = vmax.f32 %v2810_v18, 0.0  ;;  %v2808_v42 = vadd.f32 %v6352_v30, %v2603_v59  ;;  %v2614_v19 = vadd.f32 %v4363_v32, %v4233_v15 }
 0x1a7   :  { %v2605_v58 = vpop.f32.mrf.mxu1  ;;  %v4236_v7 = vpop.f32.mrf.mxu0 }
 0x1a8   :  { %3574 = vst.msk [vmem:[%s6756_s9 + $0x194] sm:$0xf] %vm3472_vm2, %v3967_v55  ;;  %v3972_v39 = vpack.c.bf16 %v2938_v57, %v2938_v57  ;;  %v2936_v26 = vmax.f32 %v2808_v42, 0.0  ;;  %v2811_v0 = vadd.f32 %v6352_v30, %v2614_v19  ;;  %v2606_v4 = vadd.f32 %v2605_v58, %v1865_v36 }
 0x1a9   :  { %v4366_v10 = vpop.f32.mrf.mxu1  ;;  %v1878_v17 = vpop.f32.mrf.mxu0 }
 0x1aa   :  { %3579 = vst.msk [vmem:[%s6756_s9 + $0x1a8] sm:$0xf] %vm3472_vm2, %v3972_v39  ;;  %v3970_v11 = vpack.c.bf16 %v2936_v26, %v2936_v26  ;;  %v2939_v63 = vmax.f32 %v2811_v0, 0.0  ;;  %v2809_v47 = vadd.f32 %v6352_v30, %v2606_v4  ;;  %v2627_v16 = vadd.f32 %v4366_v10, %v4236_v7 }
 0x1ab   :  { %v2618_v20 = vpop.f32.mrf.mxu1  ;;  %v4237_v52 = vpop.f32.mrf.mxu0 }
 0x1ac   :  { %3577 = vst.msk [vmem:[%s6756_s9 + $0x1a0] sm:$0xf] %vm3472_vm2, %v3970_v11  ;;  %v3973_v33 = vpack.c.bf16 %v2939_v63, %v2939_v63  ;;  %v2937_v50 = vmax.f32 %v2809_v47, 0.0  ;;  %v2814_v21 = vadd.f32 %v6352_v30, %v2627_v16  ;;  %v2619_v23 = vadd.f32 %v2618_v20, %v1878_v17 }
 0x1ad   :  { %v4367_v56 = vpop.f32.mrf.mxu1  ;;  %v1881_v25 = vpop.f32.mrf.mxu0 }
 0x1ae   :  { %3580 = vst.msk [vmem:[%s6756_s9 + $0x1ac] sm:$0xf] %vm3472_vm2, %v3973_v33  ;;  %v3971_v22 = vpack.c.bf16 %v2937_v50, %v2937_v50  ;;  %v2942_v62 = vmax.f32 %v2814_v21, 0.0  ;;  %v2812_v2 = vadd.f32 %v6352_v30, %v2619_v23  ;;  %v2630_v27 = vadd.f32 %v4367_v56, %v4237_v52 }
 0x1af   :  { %v2621_v29 = vpop.f32.mrf.mxu1  ;;  %v4240_v35 = vpop.f32.mrf.mxu0 }
 0x1b0   :  { %3578 = vst.msk [vmem:[%s6756_s9 + $0x1a4] sm:$0xf] %vm3472_vm2, %v3971_v22  ;;  %v3976_v8 = vpack.c.bf16 %v2942_v62, %v2942_v62  ;;  %v2940_v31 = vmax.f32 %v2812_v2, 0.0  ;;  %v2815_v61 = vadd.f32 %v6352_v30, %v2630_v27  ;;  %v2622_v6 = vadd.f32 %v2621_v29, %v1881_v25 }
 0x1b1   :  { %v4370_v37 = vpop.f32.mrf.mxu1  ;;  %v1894_v1 = vpop.f32.mrf.mxu0 }
 0x1b2   :  { %3583 = vst.msk [vmem:[%s6756_s9 + $0x1b8] sm:$0xf] %vm3472_vm2, %v3976_v8  ;;  %v3974_v38 = vpack.c.bf16 %v2940_v31, %v2940_v31  ;;  %v2943_v9 = vmax.f32 %v2815_v61, 0.0  ;;  %v2813_v14 = vadd.f32 %v6352_v30, %v2622_v6  ;;  %v2643_v49 = vadd.f32 %v4370_v37, %v4240_v35 }
 0x1b3   :  { %v2634_v48 = vpop.f32.mrf.mxu1  ;;  %v4241_v54 = vpop.f32.mrf.mxu0 }
 0x1b4   :  { %3581 = vst.msk [vmem:[%s6756_s9 + $0x1b0] sm:$0xf] %vm3472_vm2, %v3974_v38  ;;  %v3977_v24 = vpack.c.bf16 %v2943_v9, %v2943_v9  ;;  %v2941_v40 = vmax.f32 %v2813_v14, 0.0  ;;  %v2818_v41 = vadd.f32 %v6352_v30, %v2643_v49  ;;  %v2635_v43 = vadd.f32 %v2634_v48, %v1894_v1 }
 0x1b5   :  { %v4371_v44 = vpop.f32.mrf.mxu1  ;;  %v1897_v3 = vpop.f32.mrf.mxu0 }
 0x1b6   :  { %3584 = vst.msk [vmem:[%s6756_s9 + $0x1bc] sm:$0xf] %vm3472_vm2, %v3977_v24  ;;  %v3975_v13 = vpack.c.bf16 %v2941_v40, %v2941_v40  ;;  %v2946_v28 = vmax.f32 %v2818_v41, 0.0  ;;  %v2816_v45 = vadd.f32 %v6352_v30, %v2635_v43  ;;  %v2646_v46 = vadd.f32 %v4371_v44, %v4241_v54 }
 0x1b7   :  { %v2637_v5 = vpop.f32.mrf.mxu1  ;;  %v4244_v51 = vpop.f32.mrf.mxu0 }
 0x1b8   :  { %3582 = vst.msk [vmem:[%s6756_s9 + $0x1b4] sm:$0xf] %vm3472_vm2, %v3975_v13  ;;  %v3980_v12 = vpack.c.bf16 %v2946_v28, %v2946_v28  ;;  %v2944_v60 = vmax.f32 %v2816_v45, 0.0  ;;  %v2819_v53 = vadd.f32 %v6352_v30, %v2646_v46  ;;  %v2638_v34 = vadd.f32 %v2637_v5, %v1897_v3 }
 0x1b9   :  { %v4374_v18 = vpop.f32.mrf.mxu1  ;;  %v1910_v57 = vpop.f32.mrf.mxu0 }
 0x1ba   :  { %3587 = vst.msk [vmem:[%s6756_s9 + $0x1c8] sm:$0xf] %vm3472_vm2, %v3980_v12  ;;  %v3978_v59 = vpack.c.bf16 %v2944_v60, %v2944_v60  ;;  %v2947_v15 = vmax.f32 %v2819_v53, 0.0  ;;  %v2817_v32 = vadd.f32 %v6352_v30, %v2638_v34  ;;  %v2659_v55 = vadd.f32 %v4374_v18, %v4244_v51  ;;  %v4395_v18 = vld [vmem:[%s6755_s8] ss:$0 sm:$0xff] }
 0x1bb   :  { %v2650_v42 = vpop.f32.mrf.mxu1  ;;  %v4245_v26 = vpop.f32.mrf.mxu0 }
 0x1bc   :  { %3585 = vst.msk [vmem:[%s6756_s9 + $0x1c0] sm:$0xf] %vm3472_vm2, %v3978_v59  ;;  %v3981_v19 = vpack.c.bf16 %v2947_v15, %v2947_v15  ;;  %v2945_v36 = vmax.f32 %v2817_v32, 0.0  ;;  %v2822_v58 = vadd.f32 %v6352_v30, %v2659_v55  ;;  %v2651_v39 = vadd.f32 %v2650_v42, %v1910_v57 }
 0x1bd   :  { %v4375_v0 = vpop.f32.mrf.mxu1  ;;  %v1913_v63 = vpop.f32.mrf.mxu0 }
 0x1be   :  { %3588 = vst.msk [vmem:[%s6756_s9 + $0x1cc] sm:$0xf] %vm3472_vm2, %v3981_v19  ;;  %v3979_v4 = vpack.c.bf16 %v2945_v36, %v2945_v36  ;;  %v2950_v7 = vmax.f32 %v2822_v58, 0.0  ;;  %v2820_v10 = vadd.f32 %v6352_v30, %v2651_v39  ;;  %v2662_v11 = vadd.f32 %v4375_v0, %v4245_v26 }
 0x1bf   :  { %v2653_v47 = vpop.f32.mrf.mxu1  ;;  %v4248_v50 = vpop.f32.mrf.mxu0 }
 0x1c0   :  { %3586 = vst.msk [vmem:[%s6756_s9 + $0x1c4] sm:$0xf] %vm3472_vm2, %v3979_v4  ;;  %v3984_v16 = vpack.c.bf16 %v2950_v7, %v2950_v7  ;;  %v2948_v17 = vmax.f32 %v2820_v10, 0.0  ;;  %v2823_v20 = vadd.f32 %v6352_v30, %v2662_v11  ;;  %v2654_v33 = vadd.f32 %v2653_v47, %v1913_v63 }
 0x1c1   :  { %v4378_v21 = vpop.f32.mrf.mxu1  ;;  %v1926_v62 = vpop.f32.mrf.mxu0 }
 0x1c2   :  { %3591 = vst.msk [vmem:[%s6756_s9 + $0x1d8] sm:$0xf] %vm3472_vm2, %v3984_v16  ;;  %v3982_v23 = vpack.c.bf16 %v2948_v17, %v2948_v17  ;;  %v2951_v52 = vmax.f32 %v2823_v20, 0.0  ;;  %v2821_v56 = vadd.f32 %v6352_v30, %v2654_v33  ;;  %v2675_v22 = vadd.f32 %v4378_v21, %v4248_v50 }
 0x1c3   :  { %v2666_v2 = vpop.f32.mrf.mxu1  ;;  %v4249_v31 = vpop.f32.mrf.mxu0 }
 0x1c4   :  { %3589 = vst.msk [vmem:[%s6756_s9 + $0x1d0] sm:$0xf] %vm3472_vm2, %v3982_v23  ;;  %v3985_v27 = vpack.c.bf16 %v2951_v52, %v2951_v52  ;;  %v2949_v25 = vmax.f32 %v2821_v56, 0.0  ;;  %v2826_v29 = vadd.f32 %v6352_v30, %v2675_v22  ;;  %v2667_v8 = vadd.f32 %v2666_v2, %v1926_v62 }
 0x1c5   :  { %v4379_v61 = vpop.f32.mrf.mxu1  ;;  %v1929_v9 = vpop.f32.mrf.mxu0 }
 0x1c6   :  { %3592 = vst.msk [vmem:[%s6756_s9 + $0x1dc] sm:$0xf] %vm3472_vm2, %v3985_v27  ;;  %v3983_v6 = vpack.c.bf16 %v2949_v25, %v2949_v25  ;;  %v2954_v35 = vmax.f32 %v2826_v29, 0.0  ;;  %v2824_v37 = vadd.f32 %v6352_v30, %v2667_v8  ;;  %v2678_v38 = vadd.f32 %v4379_v61, %v4249_v31 }
 0x1c7   :  { %v2669_v14 = vpop.f32.mrf.mxu1  ;;  %v4252_v40 = vpop.f32.mrf.mxu0 }
 0x1c8   :  { %3590 = vst.msk [vmem:[%s6756_s9 + $0x1d4] sm:$0xf] %vm3472_vm2, %v3983_v6  ;;  %v3988_v49 = vpack.c.bf16 %v2954_v35, %v2954_v35  ;;  %v2952_v1 = vmax.f32 %v2824_v37, 0.0  ;;  %v2827_v48 = vadd.f32 %v6352_v30, %v2678_v38  ;;  %v2670_v24 = vadd.f32 %v2669_v14, %v1929_v9 }
 0x1c9   :  { %v4382_v41 = vpop.f32.mrf.mxu1  ;;  %v1942_v28 = vpop.f32.mrf.mxu0 }
 0x1ca   :  { %3595 = vst.msk [vmem:[%s6756_s9 + $0x1e8] sm:$0xf] %vm3472_vm2, %v3988_v49  ;;  %v3986_v43 = vpack.c.bf16 %v2952_v1, %v2952_v1  ;;  %v2955_v54 = vmax.f32 %v2827_v48, 0.0  ;;  %v2825_v44 = vadd.f32 %v6352_v30, %v2670_v24  ;;  %v2691_v13 = vadd.f32 %v4382_v41, %v4252_v40 }
 0x1cb   :  { %v2682_v45 = vpop.f32.mrf.mxu1  ;;  %v4253_v60 = vpop.f32.mrf.mxu0 }
 0x1cc   :  { %3593 = vst.msk [vmem:[%s6756_s9 + $0x1e0] sm:$0xf] %vm3472_vm2, %v3986_v43  ;;  %v3989_v46 = vpack.c.bf16 %v2955_v54, %v2955_v54  ;;  %v2953_v3 = vmax.f32 %v2825_v44, 0.0  ;;  %v2830_v5 = vadd.f32 %v6352_v30, %v2691_v13  ;;  %v2683_v12 = vadd.f32 %v2682_v45, %v1942_v28 }
 0x1cd   :  { %v4383_v53 = vpop.f32.mrf.mxu1  ;;  %v1945_v32 = vpop.f32.mrf.mxu0 }
 0x1ce   :  { %3596 = vst.msk [vmem:[%s6756_s9 + $0x1ec] sm:$0xf] %vm3472_vm2, %v3989_v46  ;;  %v3987_v34 = vpack.c.bf16 %v2953_v3, %v2953_v3  ;;  %v2958_v51 = vmax.f32 %v2830_v5, 0.0  ;;  %v2828_v59 = vadd.f32 %v4395_v18, %v2683_v12  ;;  %v2694_v15 = vadd.f32 %v4383_v53, %v4253_v60 }
 0x1cf   :  { %v2685_v55 = vpop.f32.mrf.mxu1 }
 0x1d0   :  { %3594 = vst.msk [vmem:[%s6756_s9 + $0x1e4] sm:$0xf] %vm3472_vm2, %v3987_v34  ;;  %v3992_v30 = vpack.c.bf16 %v2958_v51, %v2958_v51  ;;  %v2956_v57 = vmax.f32 %v2828_v59, 0.0  ;;  %v2831_v42 = vadd.f32 %v4395_v18, %v2694_v15  ;;  %v2686_v19 = vadd.f32 %v2685_v55, %v1945_v32 }
 0x1d2   :  { %3599 = vst.msk [vmem:[%s6756_s9 + $0x1f8] sm:$0xf] %vm3472_vm2, %v3992_v30  ;;  %v3990_v36 = vpack.c.bf16 %v2956_v57, %v2956_v57  ;;  %v2959_v58 = vmax.f32 %v2831_v42, 0.0  ;;  %v2829_v39 = vadd.f32 %v4395_v18, %v2686_v19 }
 0x1d4   :  { %3597 = vst.msk [vmem:[%s6756_s9 + $0x1f0] sm:$0xf] %vm3472_vm2, %v3990_v36  ;;  %v3993_v26 = vpack.c.bf16 %v2959_v58, %v2959_v58  ;;  %v2957_v0 = vmax.f32 %v2829_v39, 0.0 }
 0x1d6   :  { %3600 = vst.msk [vmem:[%s6756_s9 + $0x1fc] sm:$0xf] %vm3472_vm2, %v3993_v26  ;;  %v3991_v4 = vpack.c.bf16 %v2957_v0, %v2957_v0 }
 0x1d8   :  { %3598 = vst.msk [vmem:[%s6756_s9 + $0x1f4] sm:$0xf] %vm3472_vm2, %v3991_v4 }

</bundles_post_ra>
